<compile_context>
chip_gen: v7x
topology: tpu7x:2x2x1
jax: 0.10.0
libtpu: 0.0.40
codegen_flags: <defaults>
</compile_context>

<pallas_src>
import functools

import jax
import jax.numpy as jnp
from jax.experimental import pallas as pl


# ---------------------------------------------------------------------------
# Fused bidirectional LSTM layer kernel (whole sequence, one invocation)
# ---------------------------------------------------------------------------
def _bilstm_layer_kernel(*refs, T, B, H, with_fc):
    """One bidirectional LSTM layer over the full sequence.

    inputs:
      x_ref    (T*B, D_in)  time-major activations (row = t*B + b)
      wih_ref  (D_in, 8H)   [W_ih_fwd^T | W_ih_bwd^T]
      whhf_ref (H, 4H)      W_hh_fwd^T
      whhb_ref (H, 4H)      W_hh_bwd^T
      b_ref    (1, 8H)      [b_fwd | b_bwd]   (b_ih + b_hh per direction)
      fcw_ref  (2H, H), fcb_ref (1, H)        only when with_fc
    outputs:
      y_ref    (T*B, 2H)    fwd -> lanes [0:H], bwd -> lanes [H:2H]
      hT_ref   (2, B, H)    final hidden (fwd, bwd)
      cT_ref   (2, B, H)    final cell   (fwd, bwd)
      hid_ref  (B, H)       fc(cat(h_fwd, h_bwd))   only when with_fc
    """
    if with_fc:
        (x_ref, wih_ref, whhf_ref, whhb_ref, b_ref, fcw_ref, fcb_ref,
         y_ref, hT_ref, cT_ref, hid_ref) = refs
    else:
        (x_ref, wih_ref, whhf_ref, whhb_ref, b_ref,
         y_ref, hT_ref, cT_ref) = refs

    f32 = jnp.float32
    G = 4 * H

    # Hoisted input projection: one big MXU matmul for all timesteps and both
    # directions, instead of T tiny (B, D) x (D, 4H) per-step matmuls.
    gx = (jnp.dot(x_ref[...], wih_ref[...], preferred_element_type=f32)
          + b_ref[...])                                    # (T*B, 8H)

    whh_f = whhf_ref[...]                                  # (H, 4H)
    whh_b = whhb_ref[...]                                  # (H, 4H)

    # Whole-vreg gate activation: sigmoid/tanh over the full (B, 4H) tile and a
    # static lane-mask select of the "g" lanes [2H, 3H).
    lane = jax.lax.broadcasted_iota(jnp.int32, (B, G), dimension=1)
    is_g = (lane >= 2 * H) & (lane < 3 * H)

    def lstm_cell(gates, c_prev):
        act = jnp.where(is_g, jnp.tanh(gates), jax.nn.sigmoid(gates))
        i = act[:, 0:H]
        f = act[:, H:2 * H]
        g = act[:, 2 * H:3 * H]
        o = act[:, 3 * H:4 * H]
        c_new = f * c_prev + i * g
        h_new = o * jnp.tanh(c_new)
        return h_new, c_new

    zeros = jnp.zeros((B, H), f32)
    h_f, c_f = zeros, zeros
    h_b, c_b = zeros, zeros

    # Static (fully unrolled) time loop: forward processes time s, backward
    # processes time T-1-s, so every slice index is a compile-time constant
    # (no JAX-side sequence reversal, no dynamic sublane addressing).
    for s in range(T):
        tf, tb = s, T - 1 - s

        gates_f = gx[tf * B:(tf + 1) * B, 0:G] + jnp.dot(
            h_f, whh_f, preferred_element_type=f32)
        h_f, c_f = lstm_cell(gates_f, c_f)
        y_ref[tf * B:(tf + 1) * B, 0:H] = h_f

        gates_b = gx[tb * B:(tb + 1) * B, G:2 * G] + jnp.dot(
            h_b, whh_b, preferred_element_type=f32)
        h_b, c_b = lstm_cell(gates_b, c_b)
        y_ref[tb * B:(tb + 1) * B, H:2 * H] = h_b

    # Final states written exactly once (not every timestep).
    hT_ref[0] = h_f
    hT_ref[1] = h_b
    cT_ref[0] = c_f
    cT_ref[1] = c_b

    if with_fc:
        # Fused final Linear: cat(h_fwd, h_bwd) @ W_fc^T + b_fc, without ever
        # materializing the (B, 2H) concatenation.
        fcw = fcw_ref[...]                                 # (2H, H)
        hid_ref[...] = (jnp.dot(h_f, fcw[0:H, :], preferred_element_type=f32)
                        + jnp.dot(h_b, fcw[H:2 * H, :], preferred_element_type=f32)
                        + fcb_ref[...])


def bilstm_layer(x2d, lp, *, T, B, H, fc_w_t=None, fc_b=None):
    """x2d: (T*B, D_in) float32 -> (y2d (T*B, 2H), hT (2,B,H), cT (2,B,H)[, hidden (B,H)])."""
    with_fc = fc_w_t is not None
    kernel = functools.partial(_bilstm_layer_kernel, T=T, B=B, H=H, with_fc=with_fc)

    out_shape = [
        jax.ShapeDtypeStruct((T * B, 2 * H), jnp.float32),   # y  (fwd | bwd lanes)
        jax.ShapeDtypeStruct((2, B, H), jnp.float32),        # h_T
        jax.ShapeDtypeStruct((2, B, H), jnp.float32),        # c_T
    ]
    args = [x2d, lp["w_ih_t"], lp["w_hh_t_f"], lp["w_hh_t_b"], lp["b"]]
    if with_fc:
        args += [fc_w_t, fc_b]
        out_shape.append(jax.ShapeDtypeStruct((B, H), jnp.float32))

    # No grid: whole layer (activations + weights, a few tens of KiB at these
    # shapes) lives in VMEM for a single kernel invocation.
    return pl.pallas_call(kernel, out_shape=tuple(out_shape))(*args)


# ---------------------------------------------------------------------------
# Parameter init (deterministic, PyTorch-style uniform(-1/sqrt(H), 1/sqrt(H)))
# ---------------------------------------------------------------------------
def init_params(key, input_size, hidden_size, num_layers):
    H = hidden_size
    bound = 1.0 / jnp.sqrt(jnp.float32(H))
    params = {}

    key, k = jax.random.split(key)
    params["embedding"] = jax.random.normal(k, (input_size, H), jnp.float32)

    lstm = []
    for layer in range(num_layers):
        d_in = H if layer == 0 else 2 * H
        dir_w_ih_t, dir_b = [], []
        dir_w_hh_t = {}
        for dname in ("f", "b"):
            key, k1, k2, k3, k4 = jax.random.split(key, 5)
            w_ih = jax.random.uniform(k1, (4 * H, d_in), jnp.float32, -bound, bound)
            w_hh = jax.random.uniform(k2, (4 * H, H), jnp.float32, -bound, bound)
            b_ih = jax.random.uniform(k3, (4 * H,), jnp.float32, -bound, bound)
            b_hh = jax.random.uniform(k4, (4 * H,), jnp.float32, -bound, bound)
            dir_w_ih_t.append(w_ih.T)                     # (d_in, 4H)
            dir_w_hh_t[dname] = w_hh.T                    # (H, 4H)
            dir_b.append(b_ih + b_hh)                     # (4H,)
        lstm.append({
            "w_ih_t": jnp.concatenate(dir_w_ih_t, axis=1),          # (d_in, 8H)
            "w_hh_t_f": dir_w_hh_t["f"],                             # (H, 4H)
            "w_hh_t_b": dir_w_hh_t["b"],                             # (H, 4H)
            "b": jnp.concatenate(dir_b)[None, :],                    # (1, 8H)
        })
    params["lstm"] = lstm

    key, k1, k2 = jax.random.split(key, 3)
    fc_bound = 1.0 / jnp.sqrt(jnp.float32(2 * H))
    w_fc = jax.random.uniform(k1, (H, 2 * H), jnp.float32, -fc_bound, fc_bound)
    b_fc = jax.random.uniform(k2, (H,), jnp.float32, -fc_bound, fc_bound)
    params["fc_w_t"] = w_fc.T                             # (2H, H)
    params["fc_b"] = b_fc[None, :]                        # (1, H)
    return params


# ---------------------------------------------------------------------------
# Encoder forward
# ---------------------------------------------------------------------------
@functools.partial(jax.jit, static_argnames=("num_layers",))
def encoder_forward(tokens, params, num_layers):
    # tokens: (T, B) int32 (time-major, like torch.nn.LSTM default)
    T, B = tokens.shape
    H = params["embedding"].shape[1]

    # TODO(synk): embedding lookup (token gather) kept as XLA glue (jnp.take);
    #             no clean/profitable Pallas gather at this scale.
    x = jnp.take(params["embedding"], tokens, axis=0)     # (T, B, H)
    x2d = x.reshape(T * B, H)                             # free leading-dim merge

    cells = []
    hidden = None
    for layer in range(num_layers):
        lp = params["lstm"][layer]
        if layer == num_layers - 1:
            y2d, hT, cT, hidden = bilstm_layer(
                x2d, lp, T=T, B=B, H=H,
                fc_w_t=params["fc_w_t"], fc_b=params["fc_b"])
        else:
            y2d, hT, cT = bilstm_layer(x2d, lp, T=T, B=B, H=H)
        cells.append(cT)
        x2d = y2d                                         # (T*B, 2H) feeds next layer directly

    output = x2d.reshape(T, B, 2 * H)                     # free reshape
    cell = jnp.concatenate(cells, axis=0)                 # (2*num_layers, B, H)
    return output, hidden, cell


# ---------------------------------------------------------------------------
# Pure-JAX reference (lax.scan) for correctness checking
# ---------------------------------------------------------------------------
def _ref_lstm_dir(x, w_ih_t, w_hh_t, b):
    H = w_hh_t.shape[0]
    B = x.shape[1]

    def step(carry, x_t):
        h, c = carry
        gates = x_t @ w_ih_t + h @ w_hh_t + b
        i = jax.nn.sigmoid(gates[:, 0 * H:1 * H])
        f = jax.nn.sigmoid(gates[:, 1 * H:2 * H])
        g = jnp.tanh(gates[:, 2 * H:3 * H])
        o = jax.nn.sigmoid(gates[:, 3 * H:4 * H])
        c = f * c + i * g
        h = o * jnp.tanh(c)
        return (h, c), h

    init = (jnp.zeros((B, H), jnp.float32), jnp.zeros((B, H), jnp.float32))
    (hT, cT), ys = jax.lax.scan(step, init, x)
    return ys, hT, cT


def _ref_encoder(tokens, params, num_layers):
    H = params["embedding"].shape[1]
    G = 4 * H
    x = jnp.take(params["embedding"], tokens, axis=0)
    cs, h_last = [], None
    for layer in range(num_layers):
        lp = params["lstm"][layer]
        wih, b = lp["w_ih_t"], lp["b"]
        y_f, h_f, c_f = _ref_lstm_dir(x, wih[:, :G], lp["w_hh_t_f"], b[:, :G])
        y_b_rev, h_b, c_b = _ref_lstm_dir(x[::-1], wih[:, G:], lp["w_hh_t_b"], b[:, G:])
        x = jnp.concatenate([y_f, y_b_rev[::-1]], axis=-1)
        cs += [c_f, c_b]
        h_last = (h_f, h_b)
    hidden = jnp.concatenate(h_last, axis=1) @ params["fc_w_t"] + params["fc_b"]
    return x, hidden, jnp.stack(cs, axis=0)


# ---------------------------------------------------------------------------
if __name__ == "__main__":
    INPUT_SIZE = 50      # vocab size
    HIDDEN = 32
    NUM_LAYERS = 2
    SEQ = 8
    BATCH = 2

    key = jax.random.PRNGKey(0)
    key, pkey, tkey = jax.random.split(key, 3)
    params = init_params(pkey, INPUT_SIZE, HIDDEN, NUM_LAYERS)
    tokens = jax.random.randint(tkey, (SEQ, BATCH), 0, INPUT_SIZE, dtype=jnp.int32)

    output, hidden, cell = encoder_forward(tokens, params, NUM_LAYERS)
    jax.block_until_ready((output, hidden, cell))

    assert output.shape == (SEQ, BATCH, 2 * HIDDEN)
    assert hidden.shape == (BATCH, HIDDEN)
    assert cell.shape == (2 * NUM_LAYERS, BATCH, HIDDEN)

    ref_out, ref_hidden, ref_cell = _ref_encoder(tokens, params, NUM_LAYERS)
    assert jnp.allclose(output, ref_out, atol=2e-3, rtol=2e-3)
    assert jnp.allclose(hidden, ref_hidden, atol=2e-3, rtol=2e-3)
    assert jnp.allclose(cell, ref_cell, atol=2e-3, rtol=2e-3)

    print("KERNEL_OK")
</pallas_src>

<mosaic_0001>
module attributes {stable_mosaic.version = 11 : i64} {
  func.func @_bilstm_layer_kernel(%arg0: memref<16x64xf32, #tpu.memory_space<vmem>>, %arg1: memref<64x256xf32, #tpu.memory_space<vmem>>, %arg2: memref<32x128xf32, #tpu.memory_space<vmem>>, %arg3: memref<32x128xf32, #tpu.memory_space<vmem>>, %arg4: memref<1x256xf32, #tpu.memory_space<vmem>>, %arg5: memref<64x32xf32, #tpu.memory_space<vmem>>, %arg6: memref<1x32xf32, #tpu.memory_space<vmem>>, %arg7: memref<16x64xf32, #tpu.memory_space<vmem>>, %arg8: memref<2x2x32xf32, #tpu.memory_space<vmem>>, %arg9: memref<2x2x32xf32, #tpu.memory_space<vmem>>, %arg10: memref<2x32xf32, #tpu.memory_space<vmem>>) attributes {dimension_semantics = [], scalar_prefetch = 0 : i64, scratch_operands = 0 : i64, tpu.core_type = #tpu.core_type<tc>} {
    %c0 = arith.constant 0 : index
    %c0_0 = arith.constant 0 : index
    %0 = vector.load %arg0[%c0, %c0_0] : memref<16x64xf32, #tpu.memory_space<vmem>>, vector<16x64xf32>
    %c0_1 = arith.constant 0 : index
    %c0_2 = arith.constant 0 : index
    %1 = vector.load %arg1[%c0_1, %c0_2] : memref<64x256xf32, #tpu.memory_space<vmem>>, vector<64x256xf32>
    %cst = arith.constant dense<0.000000e+00> : vector<16x256xf32>
    %2 = tpu.matmul %0, %1, %cst {dimension_numbers = #tpu.dot_dimension_numbers<[1], [0], [0], [1], [0, 0, 1, 1], [], []>} : vector<16x64xf32>, vector<64x256xf32>, vector<16x256xf32> -> vector<16x256xf32>
    %c0_3 = arith.constant 0 : index
    %c0_4 = arith.constant 0 : index
    %3 = vector.load %arg4[%c0_3, %c0_4] : memref<1x256xf32, #tpu.memory_space<vmem>>, vector<1x256xf32>
    %4 = vector.broadcast %3 : vector<1x256xf32> to vector<16x256xf32>
    %5 = arith.addf %2, %4 : vector<16x256xf32>
    %c0_5 = arith.constant 0 : index
    %c0_6 = arith.constant 0 : index
    %6 = vector.load %arg2[%c0_5, %c0_6] : memref<32x128xf32, #tpu.memory_space<vmem>>, vector<32x128xf32>
    %c0_7 = arith.constant 0 : index
    %c0_8 = arith.constant 0 : index
    %7 = vector.load %arg3[%c0_7, %c0_8] : memref<32x128xf32, #tpu.memory_space<vmem>>, vector<32x128xf32>
    %8 = tpu.iota {dimensions = array<i32: 1>} : vector<2x128xi32>
    %c64_i32 = arith.constant 64 : i32
    %9 = vector.broadcast %c64_i32 : i32 to vector<2x128xi32>
    %10 = arith.cmpi sge, %8, %9 : vector<2x128xi32>
    %c96_i32 = arith.constant 96 : i32
    %11 = vector.broadcast %c96_i32 : i32 to vector<2x128xi32>
    %12 = arith.cmpi slt, %8, %11 : vector<2x128xi32>
    %13 = arith.andi %10, %12 : vector<2x128xi1>
    %cst_9 = arith.constant 0.000000e+00 : f32
    %14 = vector.broadcast %cst_9 : f32 to vector<2x32xf32>
    %15 = vector.extract_strided_slice %5 {offsets = [0, 0], sizes = [2, 128], strides = [1, 1]} : vector<16x256xf32> to vector<2x128xf32>
    %cst_10 = arith.constant dense<0.000000e+00> : vector<2x128xf32>
    %16 = tpu.matmul %14, %6, %cst_10 {dimension_numbers = #tpu.dot_dimension_numbers<[1], [0], [0], [1], [0, 0, 1, 1], [], []>} : vector<2x32xf32>, vector<32x128xf32>, vector<2x128xf32> -> vector<2x128xf32>
    %17 = arith.addf %15, %16 : vector<2x128xf32>
    %18 = math.tanh %17 : vector<2x128xf32>
    %19 = arith.negf %17 : vector<2x128xf32>
    %20 = math.exp %19 : vector<2x128xf32>
    %cst_11 = arith.constant 1.000000e+00 : f32
    %21 = vector.broadcast %cst_11 : f32 to vector<2x128xf32>
    %22 = arith.addf %21, %20 : vector<2x128xf32>
    %23 = arith.divf %21, %22 : vector<2x128xf32>
    %24 = arith.select %13, %18, %23 : vector<2x128xi1>, vector<2x128xf32>
    %25 = vector.extract_strided_slice %24 {offsets = [0, 0], sizes = [2, 32], strides = [1, 1]} : vector<2x128xf32> to vector<2x32xf32>
    %26 = vector.extract_strided_slice %24 {offsets = [0, 32], sizes = [2, 32], strides = [1, 1]} : vector<2x128xf32> to vector<2x32xf32>
    %27 = vector.extract_strided_slice %24 {offsets = [0, 64], sizes = [2, 32], strides = [1, 1]} : vector<2x128xf32> to vector<2x32xf32>
    %28 = vector.extract_strided_slice %24 {offsets = [0, 96], sizes = [2, 32], strides = [1, 1]} : vector<2x128xf32> to vector<2x32xf32>
    %29 = arith.mulf %26, %14 : vector<2x32xf32>
    %30 = arith.mulf %25, %27 : vector<2x32xf32>
    %31 = arith.addf %29, %30 : vector<2x32xf32>
    %32 = math.tanh %31 : vector<2x32xf32>
    %33 = arith.mulf %28, %32 : vector<2x32xf32>
    %c0_12 = arith.constant 0 : index
    %c0_13 = arith.constant 0 : index
    %34 = vector.load %arg7[%c0_12, %c0_13] : memref<16x64xf32, #tpu.memory_space<vmem>>, vector<2x32xf32>
    tpu.vector_store %arg7[%c0_12, %c0_13], %33 {strides = array<i32>} : memref<16x64xf32, #tpu.memory_space<vmem>>, vector<2x32xf32>,
    %35 = vector.extract_strided_slice %5 {offsets = [14, 128], sizes = [2, 128], strides = [1, 1]} : vector<16x256xf32> to vector<2x128xf32>
    %cst_14 = arith.constant dense<0.000000e+00> : vector<2x128xf32>
    %36 = tpu.matmul %14, %7, %cst_14 {dimension_numbers = #tpu.dot_dimension_numbers<[1], [0], [0], [1], [0, 0, 1, 1], [], []>} : vector<2x32xf32>, vector<32x128xf32>, vector<2x128xf32> -> vector<2x128xf32>
    %37 = arith.addf %35, %36 : vector<2x128xf32>
    %38 = math.tanh %37 : vector<2x128xf32>
    %39 = arith.negf %37 : vector<2x128xf32>
    %40 = math.exp %39 : vector<2x128xf32>
    %cst_15 = arith.constant 1.000000e+00 : f32
    %41 = vector.broadcast %cst_15 : f32 to vector<2x128xf32>
    %42 = arith.addf %41, %40 : vector<2x128xf32>
    %43 = arith.divf %41, %42 : vector<2x128xf32>
    %44 = arith.select %13, %38, %43 : vector<2x128xi1>, vector<2x128xf32>
    %45 = vector.extract_strided_slice %44 {offsets = [0, 0], sizes = [2, 32], strides = [1, 1]} : vector<2x128xf32> to vector<2x32xf32>
    %46 = vector.extract_strided_slice %44 {offsets = [0, 32], sizes = [2, 32], strides = [1, 1]} : vector<2x128xf32> to vector<2x32xf32>
    %47 = vector.extract_strided_slice %44 {offsets = [0, 64], sizes = [2, 32], strides = [1, 1]} : vector<2x128xf32> to vector<2x32xf32>
    %48 = vector.extract_strided_slice %44 {offsets = [0, 96], sizes = [2, 32], strides = [1, 1]} : vector<2x128xf32> to vector<2x32xf32>
    %49 = arith.mulf %46, %14 : vector<2x32xf32>
    %50 = arith.mulf %45, %47 : vector<2x32xf32>
    %51 = arith.addf %49, %50 : vector<2x32xf32>
    %52 = math.tanh %51 : vector<2x32xf32>
    %53 = arith.mulf %48, %52 : vector<2x32xf32>
    %c14 = arith.constant 14 : index
    %c32 = arith.constant 32 : index
    %54 = vector.load %arg7[%c14, %c32] : memref<16x64xf32, #tpu.memory_space<vmem>>, vector<2x32xf32>
    tpu.vector_store %arg7[%c14, %c32], %53 {strides = array<i32>} : memref<16x64xf32, #tpu.memory_space<vmem>>, vector<2x32xf32>,
    %55 = vector.extract_strided_slice %5 {offsets = [2, 0], sizes = [2, 128], strides = [1, 1]} : vector<16x256xf32> to vector<2x128xf32>
    %cst_16 = arith.constant dense<0.000000e+00> : vector<2x128xf32>
    %56 = tpu.matmul %33, %6, %cst_16 {dimension_numbers = #tpu.dot_dimension_numbers<[1], [0], [0], [1], [0, 0, 1, 1], [], []>} : vector<2x32xf32>, vector<32x128xf32>, vector<2x128xf32> -> vector<2x128xf32>
    %57 = arith.addf %55, %56 : vector<2x128xf32>
    %58 = math.tanh %57 : vector<2x128xf32>
    %59 = arith.negf %57 : vector<2x128xf32>
    %60 = math.exp %59 : vector<2x128xf32>
    %cst_17 = arith.constant 1.000000e+00 : f32
    %61 = vector.broadcast %cst_17 : f32 to vector<2x128xf32>
    %62 = arith.addf %61, %60 : vector<2x128xf32>
    %63 = arith.divf %61, %62 : vector<2x128xf32>
    %64 = arith.select %13, %58, %63 : vector<2x128xi1>, vector<2x128xf32>
    %65 = vector.extract_strided_slice %64 {offsets = [0, 0], sizes = [2, 32], strides = [1, 1]} : vector<2x128xf32> to vector<2x32xf32>
    %66 = vector.extract_strided_slice %64 {offsets = [0, 32], sizes = [2, 32], strides = [1, 1]} : vector<2x128xf32> to vector<2x32xf32>
    %67 = vector.extract_strided_slice %64 {offsets = [0, 64], sizes = [2, 32], strides = [1, 1]} : vector<2x128xf32> to vector<2x32xf32>
    %68 = vector.extract_strided_slice %64 {offsets = [0, 96], sizes = [2, 32], strides = [1, 1]} : vector<2x128xf32> to vector<2x32xf32>
    %69 = arith.mulf %66, %31 : vector<2x32xf32>
    %70 = arith.mulf %65, %67 : vector<2x32xf32>
    %71 = arith.addf %69, %70 : vector<2x32xf32>
    %72 = math.tanh %71 : vector<2x32xf32>
    %73 = arith.mulf %68, %72 : vector<2x32xf32>
    %c2 = arith.constant 2 : index
    %c0_18 = arith.constant 0 : index
    %74 = vector.load %arg7[%c2, %c0_18] : memref<16x64xf32, #tpu.memory_space<vmem>>, vector<2x32xf32>
    tpu.vector_store %arg7[%c2, %c0_18], %73 {strides = array<i32>} : memref<16x64xf32, #tpu.memory_space<vmem>>, vector<2x32xf32>,
    %75 = vector.extract_strided_slice %5 {offsets = [12, 128], sizes = [2, 128], strides = [1, 1]} : vector<16x256xf32> to vector<2x128xf32>
    %cst_19 = arith.constant dense<0.000000e+00> : vector<2x128xf32>
    %76 = tpu.matmul %53, %7, %cst_19 {dimension_numbers = #tpu.dot_dimension_numbers<[1], [0], [0], [1], [0, 0, 1, 1], [], []>} : vector<2x32xf32>, vector<32x128xf32>, vector<2x128xf32> -> vector<2x128xf32>
    %77 = arith.addf %75, %76 : vector<2x128xf32>
    %78 = math.tanh %77 : vector<2x128xf32>
    %79 = arith.negf %77 : vector<2x128xf32>
    %80 = math.exp %79 : vector<2x128xf32>
    %cst_20 = arith.constant 1.000000e+00 : f32
    %81 = vector.broadcast %cst_20 : f32 to vector<2x128xf32>
    %82 = arith.addf %81, %80 : vector<2x128xf32>
    %83 = arith.divf %81, %82 : vector<2x128xf32>
    %84 = arith.select %13, %78, %83 : vector<2x128xi1>, vector<2x128xf32>
    %85 = vector.extract_strided_slice %84 {offsets = [0, 0], sizes = [2, 32], strides = [1, 1]} : vector<2x128xf32> to vector<2x32xf32>
    %86 = vector.extract_strided_slice %84 {offsets = [0, 32], sizes = [2, 32], strides = [1, 1]} : vector<2x128xf32> to vector<2x32xf32>
    %87 = vector.extract_strided_slice %84 {offsets = [0, 64], sizes = [2, 32], strides = [1, 1]} : vector<2x128xf32> to vector<2x32xf32>
    %88 = vector.extract_strided_slice %84 {offsets = [0, 96], sizes = [2, 32], strides = [1, 1]} : vector<2x128xf32> to vector<2x32xf32>
    %89 = arith.mulf %86, %51 : vector<2x32xf32>
    %90 = arith.mulf %85, %87 : vector<2x32xf32>
    %91 = arith.addf %89, %90 : vector<2x32xf32>
    %92 = math.tanh %91 : vector<2x32xf32>
    %93 = arith.mulf %88, %92 : vector<2x32xf32>
    %c12 = arith.constant 12 : index
    %c32_21 = arith.constant 32 : index
    %94 = vector.load %arg7[%c12, %c32_21] : memref<16x64xf32, #tpu.memory_space<vmem>>, vector<2x32xf32>
    tpu.vector_store %arg7[%c12, %c32_21], %93 {strides = array<i32>} : memref<16x64xf32, #tpu.memory_space<vmem>>, vector<2x32xf32>,
    %95 = vector.extract_strided_slice %5 {offsets = [4, 0], sizes = [2, 128], strides = [1, 1]} : vector<16x256xf32> to vector<2x128xf32>
    %cst_22 = arith.constant dense<0.000000e+00> : vector<2x128xf32>
    %96 = tpu.matmul %73, %6, %cst_22 {dimension_numbers = #tpu.dot_dimension_numbers<[1], [0], [0], [1], [0, 0, 1, 1], [], []>} : vector<2x32xf32>, vector<32x128xf32>, vector<2x128xf32> -> vector<2x128xf32>
    %97 = arith.addf %95, %96 : vector<2x128xf32>
    %98 = math.tanh %97 : vector<2x128xf32>
    %99 = arith.negf %97 : vector<2x128xf32>
    %100 = math.exp %99 : vector<2x128xf32>
    %cst_23 = arith.constant 1.000000e+00 : f32
    %101 = vector.broadcast %cst_23 : f32 to vector<2x128xf32>
    %102 = arith.addf %101, %100 : vector<2x128xf32>
    %103 = arith.divf %101, %102 : vector<2x128xf32>
    %104 = arith.select %13, %98, %103 : vector<2x128xi1>, vector<2x128xf32>
    %105 = vector.extract_strided_slice %104 {offsets = [0, 0], sizes = [2, 32], strides = [1, 1]} : vector<2x128xf32> to vector<2x32xf32>
    %106 = vector.extract_strided_slice %104 {offsets = [0, 32], sizes = [2, 32], strides = [1, 1]} : vector<2x128xf32> to vector<2x32xf32>
    %107 = vector.extract_strided_slice %104 {offsets = [0, 64], sizes = [2, 32], strides = [1, 1]} : vector<2x128xf32> to vector<2x32xf32>
    %108 = vector.extract_strided_slice %104 {offsets = [0, 96], sizes = [2, 32], strides = [1, 1]} : vector<2x128xf32> to vector<2x32xf32>
    %109 = arith.mulf %106, %71 : vector<2x32xf32>
    %110 = arith.mulf %105, %107 : vector<2x32xf32>
    %111 = arith.addf %109, %110 : vector<2x32xf32>
    %112 = math.tanh %111 : vector<2x32xf32>
    %113 = arith.mulf %108, %112 : vector<2x32xf32>
    %c4 = arith.constant 4 : index
    %c0_24 = arith.constant 0 : index
    %114 = vector.load %arg7[%c4, %c0_24] : memref<16x64xf32, #tpu.memory_space<vmem>>, vector<2x32xf32>
    tpu.vector_store %arg7[%c4, %c0_24], %113 {strides = array<i32>} : memref<16x64xf32, #tpu.memory_space<vmem>>, vector<2x32xf32>,
    %115 = vector.extract_strided_slice %5 {offsets = [10, 128], sizes = [2, 128], strides = [1, 1]} : vector<16x256xf32> to vector<2x128xf32>
    %cst_25 = arith.constant dense<0.000000e+00> : vector<2x128xf32>
    %116 = tpu.matmul %93, %7, %cst_25 {dimension_numbers = #tpu.dot_dimension_numbers<[1], [0], [0], [1], [0, 0, 1, 1], [], []>} : vector<2x32xf32>, vector<32x128xf32>, vector<2x128xf32> -> vector<2x128xf32>
    %117 = arith.addf %115, %116 : vector<2x128xf32>
    %118 = math.tanh %117 : vector<2x128xf32>
    %119 = arith.negf %117 : vector<2x128xf32>
    %120 = math.exp %119 : vector<2x128xf32>
    %cst_26 = arith.constant 1.000000e+00 : f32
    %121 = vector.broadcast %cst_26 : f32 to vector<2x128xf32>
    %122 = arith.addf %121, %120 : vector<2x128xf32>
    %123 = arith.divf %121, %122 : vector<2x128xf32>
    %124 = arith.select %13, %118, %123 : vector<2x128xi1>, vector<2x128xf32>
    %125 = vector.extract_strided_slice %124 {offsets = [0, 0], sizes = [2, 32], strides = [1, 1]} : vector<2x128xf32> to vector<2x32xf32>
    %126 = vector.extract_strided_slice %124 {offsets = [0, 32], sizes = [2, 32], strides = [1, 1]} : vector<2x128xf32> to vector<2x32xf32>
    %127 = vector.extract_strided_slice %124 {offsets = [0, 64], sizes = [2, 32], strides = [1, 1]} : vector<2x128xf32> to vector<2x32xf32>
    %128 = vector.extract_strided_slice %124 {offsets = [0, 96], sizes = [2, 32], strides = [1, 1]} : vector<2x128xf32> to vector<2x32xf32>
    %129 = arith.mulf %126, %91 : vector<2x32xf32>
    %130 = arith.mulf %125, %127 : vector<2x32xf32>
    %131 = arith.addf %129, %130 : vector<2x32xf32>
    %132 = math.tanh %131 : vector<2x32xf32>
    %133 = arith.mulf %128, %132 : vector<2x32xf32>
    %c10 = arith.constant 10 : index
    %c32_27 = arith.constant 32 : index
    %134 = vector.load %arg7[%c10, %c32_27] : memref<16x64xf32, #tpu.memory_space<vmem>>, vector<2x32xf32>
    tpu.vector_store %arg7[%c10, %c32_27], %133 {strides = array<i32>} : memref<16x64xf32, #tpu.memory_space<vmem>>, vector<2x32xf32>,
    %135 = vector.extract_strided_slice %5 {offsets = [6, 0], sizes = [2, 128], strides = [1, 1]} : vector<16x256xf32> to vector<2x128xf32>
    %cst_28 = arith.constant dense<0.000000e+00> : vector<2x128xf32>
    %136 = tpu.matmul %113, %6, %cst_28 {dimension_numbers = #tpu.dot_dimension_numbers<[1], [0], [0], [1], [0, 0, 1, 1], [], []>} : vector<2x32xf32>, vector<32x128xf32>, vector<2x128xf32> -> vector<2x128xf32>
    %137 = arith.addf %135, %136 : vector<2x128xf32>
    %138 = math.tanh %137 : vector<2x128xf32>
    %139 = arith.negf %137 : vector<2x128xf32>
    %140 = math.exp %139 : vector<2x128xf32>
    %cst_29 = arith.constant 1.000000e+00 : f32
    %141 = vector.broadcast %cst_29 : f32 to vector<2x128xf32>
    %142 = arith.addf %141, %140 : vector<2x128xf32>
    %143 = arith.divf %141, %142 : vector<2x128xf32>
    %144 = arith.select %13, %138, %143 : vector<2x128xi1>, vector<2x128xf32>
    %145 = vector.extract_strided_slice %144 {offsets = [0, 0], sizes = [2, 32], strides = [1, 1]} : vector<2x128xf32> to vector<2x32xf32>
    %146 = vector.extract_strided_slice %144 {offsets = [0, 32], sizes = [2, 32], strides = [1, 1]} : vector<2x128xf32> to vector<2x32xf32>
    %147 = vector.extract_strided_slice %144 {offsets = [0, 64], sizes = [2, 32], strides = [1, 1]} : vector<2x128xf32> to vector<2x32xf32>
    %148 = vector.extract_strided_slice %144 {offsets = [0, 96], sizes = [2, 32], strides = [1, 1]} : vector<2x128xf32> to vector<2x32xf32>
    %149 = arith.mulf %146, %111 : vector<2x32xf32>
    %150 = arith.mulf %145, %147 : vector<2x32xf32>
    %151 = arith.addf %149, %150 : vector<2x32xf32>
    %152 = math.tanh %151 : vector<2x32xf32>
    %153 = arith.mulf %148, %152 : vector<2x32xf32>
    %c6 = arith.constant 6 : index
    %c0_30 = arith.constant 0 : index
    %154 = vector.load %arg7[%c6, %c0_30] : memref<16x64xf32, #tpu.memory_space<vmem>>, vector<2x32xf32>
    tpu.vector_store %arg7[%c6, %c0_30], %153 {strides = array<i32>} : memref<16x64xf32, #tpu.memory_space<vmem>>, vector<2x32xf32>,
    %155 = vector.extract_strided_slice %5 {offsets = [8, 128], sizes = [2, 128], strides = [1, 1]} : vector<16x256xf32> to vector<2x128xf32>
    %cst_31 = arith.constant dense<0.000000e+00> : vector<2x128xf32>
    %156 = tpu.matmul %133, %7, %cst_31 {dimension_numbers = #tpu.dot_dimension_numbers<[1], [0], [0], [1], [0, 0, 1, 1], [], []>} : vector<2x32xf32>, vector<32x128xf32>, vector<2x128xf32> -> vector<2x128xf32>
    %157 = arith.addf %155, %156 : vector<2x128xf32>
    %158 = math.tanh %157 : vector<2x128xf32>
    %159 = arith.negf %157 : vector<2x128xf32>
    %160 = math.exp %159 : vector<2x128xf32>
    %cst_32 = arith.constant 1.000000e+00 : f32
    %161 = vector.broadcast %cst_32 : f32 to vector<2x128xf32>
    %162 = arith.addf %161, %160 : vector<2x128xf32>
    %163 = arith.divf %161, %162 : vector<2x128xf32>
    %164 = arith.select %13, %158, %163 : vector<2x128xi1>, vector<2x128xf32>
    %165 = vector.extract_strided_slice %164 {offsets = [0, 0], sizes = [2, 32], strides = [1, 1]} : vector<2x128xf32> to vector<2x32xf32>
    %166 = vector.extract_strided_slice %164 {offsets = [0, 32], sizes = [2, 32], strides = [1, 1]} : vector<2x128xf32> to vector<2x32xf32>
    %167 = vector.extract_strided_slice %164 {offsets = [0, 64], sizes = [2, 32], strides = [1, 1]} : vector<2x128xf32> to vector<2x32xf32>
    %168 = vector.extract_strided_slice %164 {offsets = [0, 96], sizes = [2, 32], strides = [1, 1]} : vector<2x128xf32> to vector<2x32xf32>
    %169 = arith.mulf %166, %131 : vector<2x32xf32>
    %170 = arith.mulf %165, %167 : vector<2x32xf32>
    %171 = arith.addf %169, %170 : vector<2x32xf32>
    %172 = math.tanh %171 : vector<2x32xf32>
    %173 = arith.mulf %168, %172 : vector<2x32xf32>
    %c8 = arith.constant 8 : index
    %c32_33 = arith.constant 32 : index
    %174 = vector.load %arg7[%c8, %c32_33] : memref<16x64xf32, #tpu.memory_space<vmem>>, vector<2x32xf32>
    tpu.vector_store %arg7[%c8, %c32_33], %173 {strides = array<i32>} : memref<16x64xf32, #tpu.memory_space<vmem>>, vector<2x32xf32>,
    %175 = vector.extract_strided_slice %5 {offsets = [8, 0], sizes = [2, 128], strides = [1, 1]} : vector<16x256xf32> to vector<2x128xf32>
    %cst_34 = arith.constant dense<0.000000e+00> : vector<2x128xf32>
    %176 = tpu.matmul %153, %6, %cst_34 {dimension_numbers = #tpu.dot_dimension_numbers<[1], [0], [0], [1], [0, 0, 1, 1], [], []>} : vector<2x32xf32>, vector<32x128xf32>, vector<2x128xf32> -> vector<2x128xf32>
    %177 = arith.addf %175, %176 : vector<2x128xf32>
    %178 = math.tanh %177 : vector<2x128xf32>
    %179 = arith.negf %177 : vector<2x128xf32>
    %180 = math.exp %179 : vector<2x128xf32>
    %cst_35 = arith.constant 1.000000e+00 : f32
    %181 = vector.broadcast %cst_35 : f32 to vector<2x128xf32>
    %182 = arith.addf %181, %180 : vector<2x128xf32>
    %183 = arith.divf %181, %182 : vector<2x128xf32>
    %184 = arith.select %13, %178, %183 : vector<2x128xi1>, vector<2x128xf32>
    %185 = vector.extract_strided_slice %184 {offsets = [0, 0], sizes = [2, 32], strides = [1, 1]} : vector<2x128xf32> to vector<2x32xf32>
    %186 = vector.extract_strided_slice %184 {offsets = [0, 32], sizes = [2, 32], strides = [1, 1]} : vector<2x128xf32> to vector<2x32xf32>
    %187 = vector.extract_strided_slice %184 {offsets = [0, 64], sizes = [2, 32], strides = [1, 1]} : vector<2x128xf32> to vector<2x32xf32>
    %188 = vector.extract_strided_slice %184 {offsets = [0, 96], sizes = [2, 32], strides = [1, 1]} : vector<2x128xf32> to vector<2x32xf32>
    %189 = arith.mulf %186, %151 : vector<2x32xf32>
    %190 = arith.mulf %185, %187 : vector<2x32xf32>
    %191 = arith.addf %189, %190 : vector<2x32xf32>
    %192 = math.tanh %191 : vector<2x32xf32>
    %193 = arith.mulf %188, %192 : vector<2x32xf32>
    %c8_36 = arith.constant 8 : index
    %c0_37 = arith.constant 0 : index
    %194 = vector.load %arg7[%c8_36, %c0_37] : memref<16x64xf32, #tpu.memory_space<vmem>>, vector<2x32xf32>
    tpu.vector_store %arg7[%c8_36, %c0_37], %193 {strides = array<i32>} : memref<16x64xf32, #tpu.memory_space<vmem>>, vector<2x32xf32>,
    %195 = vector.extract_strided_slice %5 {offsets = [6, 128], sizes = [2, 128], strides = [1, 1]} : vector<16x256xf32> to vector<2x128xf32>
    %cst_38 = arith.constant dense<0.000000e+00> : vector<2x128xf32>
    %196 = tpu.matmul %173, %7, %cst_38 {dimension_numbers = #tpu.dot_dimension_numbers<[1], [0], [0], [1], [0, 0, 1, 1], [], []>} : vector<2x32xf32>, vector<32x128xf32>, vector<2x128xf32> -> vector<2x128xf32>
    %197 = arith.addf %195, %196 : vector<2x128xf32>
    %198 = math.tanh %197 : vector<2x128xf32>
    %199 = arith.negf %197 : vector<2x128xf32>
    %200 = math.exp %199 : vector<2x128xf32>
    %cst_39 = arith.constant 1.000000e+00 : f32
    %201 = vector.broadcast %cst_39 : f32 to vector<2x128xf32>
    %202 = arith.addf %201, %200 : vector<2x128xf32>
    %203 = arith.divf %201, %202 : vector<2x128xf32>
    %204 = arith.select %13, %198, %203 : vector<2x128xi1>, vector<2x128xf32>
    %205 = vector.extract_strided_slice %204 {offsets = [0, 0], sizes = [2, 32], strides = [1, 1]} : vector<2x128xf32> to vector<2x32xf32>
    %206 = vector.extract_strided_slice %204 {offsets = [0, 32], sizes = [2, 32], strides = [1, 1]} : vector<2x128xf32> to vector<2x32xf32>
    %207 = vector.extract_strided_slice %204 {offsets = [0, 64], sizes = [2, 32], strides = [1, 1]} : vector<2x128xf32> to vector<2x32xf32>
    %208 = vector.extract_strided_slice %204 {offsets = [0, 96], sizes = [2, 32], strides = [1, 1]} : vector<2x128xf32> to vector<2x32xf32>
    %209 = arith.mulf %206, %171 : vector<2x32xf32>
    %210 = arith.mulf %205, %207 : vector<2x32xf32>
    %211 = arith.addf %209, %210 : vector<2x32xf32>
    %212 = math.tanh %211 : vector<2x32xf32>
    %213 = arith.mulf %208, %212 : vector<2x32xf32>
    %c6_40 = arith.constant 6 : index
    %c32_41 = arith.constant 32 : index
    %214 = vector.load %arg7[%c6_40, %c32_41] : memref<16x64xf32, #tpu.memory_space<vmem>>, vector<2x32xf32>
    tpu.vector_store %arg7[%c6_40, %c32_41], %213 {strides = array<i32>} : memref<16x64xf32, #tpu.memory_space<vmem>>, vector<2x32xf32>,
    %215 = vector.extract_strided_slice %5 {offsets = [10, 0], sizes = [2, 128], strides = [1, 1]} : vector<16x256xf32> to vector<2x128xf32>
    %cst_42 = arith.constant dense<0.000000e+00> : vector<2x128xf32>
    %216 = tpu.matmul %193, %6, %cst_42 {dimension_numbers = #tpu.dot_dimension_numbers<[1], [0], [0], [1], [0, 0, 1, 1], [], []>} : vector<2x32xf32>, vector<32x128xf32>, vector<2x128xf32> -> vector<2x128xf32>
    %217 = arith.addf %215, %216 : vector<2x128xf32>
    %218 = math.tanh %217 : vector<2x128xf32>
    %219 = arith.negf %217 : vector<2x128xf32>
    %220 = math.exp %219 : vector<2x128xf32>
    %cst_43 = arith.constant 1.000000e+00 : f32
    %221 = vector.broadcast %cst_43 : f32 to vector<2x128xf32>
    %222 = arith.addf %221, %220 : vector<2x128xf32>
    %223 = arith.divf %221, %222 : vector<2x128xf32>
    %224 = arith.select %13, %218, %223 : vector<2x128xi1>, vector<2x128xf32>
    %225 = vector.extract_strided_slice %224 {offsets = [0, 0], sizes = [2, 32], strides = [1, 1]} : vector<2x128xf32> to vector<2x32xf32>
    %226 = vector.extract_strided_slice %224 {offsets = [0, 32], sizes = [2, 32], strides = [1, 1]} : vector<2x128xf32> to vector<2x32xf32>
    %227 = vector.extract_strided_slice %224 {offsets = [0, 64], sizes = [2, 32], strides = [1, 1]} : vector<2x128xf32> to vector<2x32xf32>
    %228 = vector.extract_strided_slice %224 {offsets = [0, 96], sizes = [2, 32], strides = [1, 1]} : vector<2x128xf32> to vector<2x32xf32>
    %229 = arith.mulf %226, %191 : vector<2x32xf32>
    %230 = arith.mulf %225, %227 : vector<2x32xf32>
    %231 = arith.addf %229, %230 : vector<2x32xf32>
    %232 = math.tanh %231 : vector<2x32xf32>
    %233 = arith.mulf %228, %232 : vector<2x32xf32>
    %c10_44 = arith.constant 10 : index
    %c0_45 = arith.constant 0 : index
    %234 = vector.load %arg7[%c10_44, %c0_45] : memref<16x64xf32, #tpu.memory_space<vmem>>, vector<2x32xf32>
    tpu.vector_store %arg7[%c10_44, %c0_45], %233 {strides = array<i32>} : memref<16x64xf32, #tpu.memory_space<vmem>>, vector<2x32xf32>,
    %235 = vector.extract_strided_slice %5 {offsets = [4, 128], sizes = [2, 128], strides = [1, 1]} : vector<16x256xf32> to vector<2x128xf32>
    %cst_46 = arith.constant dense<0.000000e+00> : vector<2x128xf32>
    %236 = tpu.matmul %213, %7, %cst_46 {dimension_numbers = #tpu.dot_dimension_numbers<[1], [0], [0], [1], [0, 0, 1, 1], [], []>} : vector<2x32xf32>, vector<32x128xf32>, vector<2x128xf32> -> vector<2x128xf32>
    %237 = arith.addf %235, %236 : vector<2x128xf32>
    %238 = math.tanh %237 : vector<2x128xf32>
    %239 = arith.negf %237 : vector<2x128xf32>
    %240 = math.exp %239 : vector<2x128xf32>
    %cst_47 = arith.constant 1.000000e+00 : f32
    %241 = vector.broadcast %cst_47 : f32 to vector<2x128xf32>
    %242 = arith.addf %241, %240 : vector<2x128xf32>
    %243 = arith.divf %241, %242 : vector<2x128xf32>
    %244 = arith.select %13, %238, %243 : vector<2x128xi1>, vector<2x128xf32>
    %245 = vector.extract_strided_slice %244 {offsets = [0, 0], sizes = [2, 32], strides = [1, 1]} : vector<2x128xf32> to vector<2x32xf32>
    %246 = vector.extract_strided_slice %244 {offsets = [0, 32], sizes = [2, 32], strides = [1, 1]} : vector<2x128xf32> to vector<2x32xf32>
    %247 = vector.extract_strided_slice %244 {offsets = [0, 64], sizes = [2, 32], strides = [1, 1]} : vector<2x128xf32> to vector<2x32xf32>
    %248 = vector.extract_strided_slice %244 {offsets = [0, 96], sizes = [2, 32], strides = [1, 1]} : vector<2x128xf32> to vector<2x32xf32>
    %249 = arith.mulf %246, %211 : vector<2x32xf32>
    %250 = arith.mulf %245, %247 : vector<2x32xf32>
    %251 = arith.addf %249, %250 : vector<2x32xf32>
    %252 = math.tanh %251 : vector<2x32xf32>
    %253 = arith.mulf %248, %252 : vector<2x32xf32>
    %c4_48 = arith.constant 4 : index
    %c32_49 = arith.constant 32 : index
    %254 = vector.load %arg7[%c4_48, %c32_49] : memref<16x64xf32, #tpu.memory_space<vmem>>, vector<2x32xf32>
    tpu.vector_store %arg7[%c4_48, %c32_49], %253 {strides = array<i32>} : memref<16x64xf32, #tpu.memory_space<vmem>>, vector<2x32xf32>,
    %255 = vector.extract_strided_slice %5 {offsets = [12, 0], sizes = [2, 128], strides = [1, 1]} : vector<16x256xf32> to vector<2x128xf32>
    %cst_50 = arith.constant dense<0.000000e+00> : vector<2x128xf32>
    %256 = tpu.matmul %233, %6, %cst_50 {dimension_numbers = #tpu.dot_dimension_numbers<[1], [0], [0], [1], [0, 0, 1, 1], [], []>} : vector<2x32xf32>, vector<32x128xf32>, vector<2x128xf32> -> vector<2x128xf32>
    %257 = arith.addf %255, %256 : vector<2x128xf32>
    %258 = math.tanh %257 : vector<2x128xf32>
    %259 = arith.negf %257 : vector<2x128xf32>
    %260 = math.exp %259 : vector<2x128xf32>
    %cst_51 = arith.constant 1.000000e+00 : f32
    %261 = vector.broadcast %cst_51 : f32 to vector<2x128xf32>
    %262 = arith.addf %261, %260 : vector<2x128xf32>
    %263 = arith.divf %261, %262 : vector<2x128xf32>
    %264 = arith.select %13, %258, %263 : vector<2x128xi1>, vector<2x128xf32>
    %265 = vector.extract_strided_slice %264 {offsets = [0, 0], sizes = [2, 32], strides = [1, 1]} : vector<2x128xf32> to vector<2x32xf32>
    %266 = vector.extract_strided_slice %264 {offsets = [0, 32], sizes = [2, 32], strides = [1, 1]} : vector<2x128xf32> to vector<2x32xf32>
    %267 = vector.extract_strided_slice %264 {offsets = [0, 64], sizes = [2, 32], strides = [1, 1]} : vector<2x128xf32> to vector<2x32xf32>
    %268 = vector.extract_strided_slice %264 {offsets = [0, 96], sizes = [2, 32], strides = [1, 1]} : vector<2x128xf32> to vector<2x32xf32>
    %269 = arith.mulf %266, %231 : vector<2x32xf32>
    %270 = arith.mulf %265, %267 : vector<2x32xf32>
    %271 = arith.addf %269, %270 : vector<2x32xf32>
    %272 = math.tanh %271 : vector<2x32xf32>
    %273 = arith.mulf %268, %272 : vector<2x32xf32>
    %c12_52 = arith.constant 12 : index
    %c0_53 = arith.constant 0 : index
    %274 = vector.load %arg7[%c12_52, %c0_53] : memref<16x64xf32, #tpu.memory_space<vmem>>, vector<2x32xf32>
    tpu.vector_store %arg7[%c12_52, %c0_53], %273 {strides = array<i32>} : memref<16x64xf32, #tpu.memory_space<vmem>>, vector<2x32xf32>,
    %275 = vector.extract_strided_slice %5 {offsets = [2, 128], sizes = [2, 128], strides = [1, 1]} : vector<16x256xf32> to vector<2x128xf32>
    %cst_54 = arith.constant dense<0.000000e+00> : vector<2x128xf32>
    %276 = tpu.matmul %253, %7, %cst_54 {dimension_numbers = #tpu.dot_dimension_numbers<[1], [0], [0], [1], [0, 0, 1, 1], [], []>} : vector<2x32xf32>, vector<32x128xf32>, vector<2x128xf32> -> vector<2x128xf32>
    %277 = arith.addf %275, %276 : vector<2x128xf32>
    %278 = math.tanh %277 : vector<2x128xf32>
    %279 = arith.negf %277 : vector<2x128xf32>
    %280 = math.exp %279 : vector<2x128xf32>
    %cst_55 = arith.constant 1.000000e+00 : f32
    %281 = vector.broadcast %cst_55 : f32 to vector<2x128xf32>
    %282 = arith.addf %281, %280 : vector<2x128xf32>
    %283 = arith.divf %281, %282 : vector<2x128xf32>
    %284 = arith.select %13, %278, %283 : vector<2x128xi1>, vector<2x128xf32>
    %285 = vector.extract_strided_slice %284 {offsets = [0, 0], sizes = [2, 32], strides = [1, 1]} : vector<2x128xf32> to vector<2x32xf32>
    %286 = vector.extract_strided_slice %284 {offsets = [0, 32], sizes = [2, 32], strides = [1, 1]} : vector<2x128xf32> to vector<2x32xf32>
    %287 = vector.extract_strided_slice %284 {offsets = [0, 64], sizes = [2, 32], strides = [1, 1]} : vector<2x128xf32> to vector<2x32xf32>
    %288 = vector.extract_strided_slice %284 {offsets = [0, 96], sizes = [2, 32], strides = [1, 1]} : vector<2x128xf32> to vector<2x32xf32>
    %289 = arith.mulf %286, %251 : vector<2x32xf32>
    %290 = arith.mulf %285, %287 : vector<2x32xf32>
    %291 = arith.addf %289, %290 : vector<2x32xf32>
    %292 = math.tanh %291 : vector<2x32xf32>
    %293 = arith.mulf %288, %292 : vector<2x32xf32>
    %c2_56 = arith.constant 2 : index
    %c32_57 = arith.constant 32 : index
    %294 = vector.load %arg7[%c2_56, %c32_57] : memref<16x64xf32, #tpu.memory_space<vmem>>, vector<2x32xf32>
    tpu.vector_store %arg7[%c2_56, %c32_57], %293 {strides = array<i32>} : memref<16x64xf32, #tpu.memory_space<vmem>>, vector<2x32xf32>,
    %295 = vector.extract_strided_slice %5 {offsets = [14, 0], sizes = [2, 128], strides = [1, 1]} : vector<16x256xf32> to vector<2x128xf32>
    %cst_58 = arith.constant dense<0.000000e+00> : vector<2x128xf32>
    %296 = tpu.matmul %273, %6, %cst_58 {dimension_numbers = #tpu.dot_dimension_numbers<[1], [0], [0], [1], [0, 0, 1, 1], [], []>} : vector<2x32xf32>, vector<32x128xf32>, vector<2x128xf32> -> vector<2x128xf32>
    %297 = arith.addf %295, %296 : vector<2x128xf32>
    %298 = math.tanh %297 : vector<2x128xf32>
    %299 = arith.negf %297 : vector<2x128xf32>
    %300 = math.exp %299 : vector<2x128xf32>
    %cst_59 = arith.constant 1.000000e+00 : f32
    %301 = vector.broadcast %cst_59 : f32 to vector<2x128xf32>
    %302 = arith.addf %301, %300 : vector<2x128xf32>
    %303 = arith.divf %301, %302 : vector<2x128xf32>
    %304 = arith.select %13, %298, %303 : vector<2x128xi1>, vector<2x128xf32>
    %305 = vector.extract_strided_slice %304 {offsets = [0, 0], sizes = [2, 32], strides = [1, 1]} : vector<2x128xf32> to vector<2x32xf32>
    %306 = vector.extract_strided_slice %304 {offsets = [0, 32], sizes = [2, 32], strides = [1, 1]} : vector<2x128xf32> to vector<2x32xf32>
    %307 = vector.extract_strided_slice %304 {offsets = [0, 64], sizes = [2, 32], strides = [1, 1]} : vector<2x128xf32> to vector<2x32xf32>
    %308 = vector.extract_strided_slice %304 {offsets = [0, 96], sizes = [2, 32], strides = [1, 1]} : vector<2x128xf32> to vector<2x32xf32>
    %309 = arith.mulf %306, %271 : vector<2x32xf32>
    %310 = arith.mulf %305, %307 : vector<2x32xf32>
    %311 = arith.addf %309, %310 : vector<2x32xf32>
    %312 = math.tanh %311 : vector<2x32xf32>
    %313 = arith.mulf %308, %312 : vector<2x32xf32>
    %c14_60 = arith.constant 14 : index
    %c0_61 = arith.constant 0 : index
    %314 = vector.load %arg7[%c14_60, %c0_61] : memref<16x64xf32, #tpu.memory_space<vmem>>, vector<2x32xf32>
    tpu.vector_store %arg7[%c14_60, %c0_61], %313 {strides = array<i32>} : memref<16x64xf32, #tpu.memory_space<vmem>>, vector<2x32xf32>,
    %315 = vector.extract_strided_slice %5 {offsets = [0, 128], sizes = [2, 128], strides = [1, 1]} : vector<16x256xf32> to vector<2x128xf32>
    %cst_62 = arith.constant dense<0.000000e+00> : vector<2x128xf32>
    %316 = tpu.matmul %293, %7, %cst_62 {dimension_numbers = #tpu.dot_dimension_numbers<[1], [0], [0], [1], [0, 0, 1, 1], [], []>} : vector<2x32xf32>, vector<32x128xf32>, vector<2x128xf32> -> vector<2x128xf32>
    %317 = arith.addf %315, %316 : vector<2x128xf32>
    %318 = math.tanh %317 : vector<2x128xf32>
    %319 = arith.negf %317 : vector<2x128xf32>
    %320 = math.exp %319 : vector<2x128xf32>
    %cst_63 = arith.constant 1.000000e+00 : f32
    %321 = vector.broadcast %cst_63 : f32 to vector<2x128xf32>
    %322 = arith.addf %321, %320 : vector<2x128xf32>
    %323 = arith.divf %321, %322 : vector<2x128xf32>
    %324 = arith.select %13, %318, %323 : vector<2x128xi1>, vector<2x128xf32>
    %325 = vector.extract_strided_slice %324 {offsets = [0, 0], sizes = [2, 32], strides = [1, 1]} : vector<2x128xf32> to vector<2x32xf32>
    %326 = vector.extract_strided_slice %324 {offsets = [0, 32], sizes = [2, 32], strides = [1, 1]} : vector<2x128xf32> to vector<2x32xf32>
    %327 = vector.extract_strided_slice %324 {offsets = [0, 64], sizes = [2, 32], strides = [1, 1]} : vector<2x128xf32> to vector<2x32xf32>
    %328 = vector.extract_strided_slice %324 {offsets = [0, 96], sizes = [2, 32], strides = [1, 1]} : vector<2x128xf32> to vector<2x32xf32>
    %329 = arith.mulf %326, %291 : vector<2x32xf32>
    %330 = arith.mulf %325, %327 : vector<2x32xf32>
    %331 = arith.addf %329, %330 : vector<2x32xf32>
    %332 = math.tanh %331 : vector<2x32xf32>
    %333 = arith.mulf %328, %332 : vector<2x32xf32>
    %c0_64 = arith.constant 0 : index
    %c32_65 = arith.constant 32 : index
    %334 = vector.load %arg7[%c0_64, %c32_65] : memref<16x64xf32, #tpu.memory_space<vmem>>, vector<2x32xf32>
    tpu.vector_store %arg7[%c0_64, %c32_65], %333 {strides = array<i32>} : memref<16x64xf32, #tpu.memory_space<vmem>>, vector<2x32xf32>,
    %c0_66 = arith.constant 0 : index
    %c0_67 = arith.constant 0 : index
    %c0_68 = arith.constant 0 : index
    %335 = vector.load %arg8[%c0_66, %c0_67, %c0_68] : memref<2x2x32xf32, #tpu.memory_space<vmem>>, vector<1x2x32xf32>
    %336 = vector.shape_cast %335 : vector<1x2x32xf32> to vector<2x32xf32>
    %337 = vector.shape_cast %313 : vector<2x32xf32> to vector<1x2x32xf32>
    tpu.vector_store %arg8[%c0_66, %c0_67, %c0_68], %337 {strides = array<i32>} : memref<2x2x32xf32, #tpu.memory_space<vmem>>, vector<1x2x32xf32>,
    %c1 = arith.constant 1 : index
    %c0_69 = arith.constant 0 : index
    %c0_70 = arith.constant 0 : index
    %338 = vector.load %arg8[%c1, %c0_69, %c0_70] : memref<2x2x32xf32, #tpu.memory_space<vmem>>, vector<1x2x32xf32>
    %339 = vector.shape_cast %338 : vector<1x2x32xf32> to vector<2x32xf32>
    %340 = vector.shape_cast %333 : vector<2x32xf32> to vector<1x2x32xf32>
    tpu.vector_store %arg8[%c1, %c0_69, %c0_70], %340 {strides = array<i32>} : memref<2x2x32xf32, #tpu.memory_space<vmem>>, vector<1x2x32xf32>,
    %c0_71 = arith.constant 0 : index
    %c0_72 = arith.constant 0 : index
    %c0_73 = arith.constant 0 : index
    %341 = vector.load %arg9[%c0_71, %c0_72, %c0_73] : memref<2x2x32xf32, #tpu.memory_space<vmem>>, vector<1x2x32xf32>
    %342 = vector.shape_cast %341 : vector<1x2x32xf32> to vector<2x32xf32>
    %343 = vector.shape_cast %311 : vector<2x32xf32> to vector<1x2x32xf32>
    tpu.vector_store %arg9[%c0_71, %c0_72, %c0_73], %343 {strides = array<i32>} : memref<2x2x32xf32, #tpu.memory_space<vmem>>, vector<1x2x32xf32>,
    %c1_74 = arith.constant 1 : index
    %c0_75 = arith.constant 0 : index
    %c0_76 = arith.constant 0 : index
    %344 = vector.load %arg9[%c1_74, %c0_75, %c0_76] : memref<2x2x32xf32, #tpu.memory_space<vmem>>, vector<1x2x32xf32>
    %345 = vector.shape_cast %344 : vector<1x2x32xf32> to vector<2x32xf32>
    %346 = vector.shape_cast %331 : vector<2x32xf32> to vector<1x2x32xf32>
    tpu.vector_store %arg9[%c1_74, %c0_75, %c0_76], %346 {strides = array<i32>} : memref<2x2x32xf32, #tpu.memory_space<vmem>>, vector<1x2x32xf32>,
    %c0_77 = arith.constant 0 : index
    %c0_78 = arith.constant 0 : index
    %347 = vector.load %arg5[%c0_77, %c0_78] : memref<64x32xf32, #tpu.memory_space<vmem>>, vector<64x32xf32>
    %348 = vector.extract_strided_slice %347 {offsets = [0, 0], sizes = [32, 32], strides = [1, 1]} : vector<64x32xf32> to vector<32x32xf32>
    %cst_79 = arith.constant dense<0.000000e+00> : vector<2x32xf32>
    %349 = tpu.matmul %313, %348, %cst_79 {dimension_numbers = #tpu.dot_dimension_numbers<[1], [0], [0], [1], [0, 0, 1, 1], [], []>} : vector<2x32xf32>, vector<32x32xf32>, vector<2x32xf32> -> vector<2x32xf32>
    %350 = vector.extract_strided_slice %347 {offsets = [32, 0], sizes = [32, 32], strides = [1, 1]} : vector<64x32xf32> to vector<32x32xf32>
    %cst_80 = arith.constant dense<0.000000e+00> : vector<2x32xf32>
    %351 = tpu.matmul %333, %350, %cst_80 {dimension_numbers = #tpu.dot_dimension_numbers<[1], [0], [0], [1], [0, 0, 1, 1], [], []>} : vector<2x32xf32>, vector<32x32xf32>, vector<2x32xf32> -> vector<2x32xf32>
    %352 = arith.addf %349, %351 : vector<2x32xf32>
    %c0_81 = arith.constant 0 : index
    %c0_82 = arith.constant 0 : index
    %353 = vector.load %arg6[%c0_81, %c0_82] : memref<1x32xf32, #tpu.memory_space<vmem>>, vector<1x32xf32>
    %354 = vector.broadcast %353 : vector<1x32xf32> to vector<2x32xf32>
    %355 = arith.addf %352, %354 : vector<2x32xf32>
    %c0_83 = arith.constant 0 : index
    %c0_84 = arith.constant 0 : index
    %356 = vector.load %arg10[%c0_83, %c0_84] : memref<2x32xf32, #tpu.memory_space<vmem>>, vector<2x32xf32>
    tpu.vector_store %arg10[%c0_83, %c0_84], %355 {strides = array<i32>} : memref<2x32xf32, #tpu.memory_space<vmem>>, vector<2x32xf32>,
    return
  }
}

module attributes {stable_mosaic.version = 11 : i64} {
  func.func @_bilstm_layer_kernel(%arg0: memref<16x32xf32, #tpu.memory_space<vmem>>, %arg1: memref<32x256xf32, #tpu.memory_space<vmem>>, %arg2: memref<32x128xf32, #tpu.memory_space<vmem>>, %arg3: memref<32x128xf32, #tpu.memory_space<vmem>>, %arg4: memref<1x256xf32, #tpu.memory_space<vmem>>, %arg5: memref<16x64xf32, #tpu.memory_space<vmem>>, %arg6: memref<2x2x32xf32, #tpu.memory_space<vmem>>, %arg7: memref<2x2x32xf32, #tpu.memory_space<vmem>>) attributes {dimension_semantics = [], scalar_prefetch = 0 : i64, scratch_operands = 0 : i64, tpu.core_type = #tpu.core_type<tc>} {
    %c0 = arith.constant 0 : index
    %c0_0 = arith.constant 0 : index
    %0 = vector.load %arg0[%c0, %c0_0] : memref<16x32xf32, #tpu.memory_space<vmem>>, vector<16x32xf32>
    %c0_1 = arith.constant 0 : index
    %c0_2 = arith.constant 0 : index
    %1 = vector.load %arg1[%c0_1, %c0_2] : memref<32x256xf32, #tpu.memory_space<vmem>>, vector<32x256xf32>
    %cst = arith.constant dense<0.000000e+00> : vector<16x256xf32>
    %2 = tpu.matmul %0, %1, %cst {dimension_numbers = #tpu.dot_dimension_numbers<[1], [0], [0], [1], [0, 0, 1, 1], [], []>} : vector<16x32xf32>, vector<32x256xf32>, vector<16x256xf32> -> vector<16x256xf32>
    %c0_3 = arith.constant 0 : index
    %c0_4 = arith.constant 0 : index
    %3 = vector.load %arg4[%c0_3, %c0_4] : memref<1x256xf32, #tpu.memory_space<vmem>>, vector<1x256xf32>
    %4 = vector.broadcast %3 : vector<1x256xf32> to vector<16x256xf32>
    %5 = arith.addf %2, %4 : vector<16x256xf32>
    %c0_5 = arith.constant 0 : index
    %c0_6 = arith.constant 0 : index
    %6 = vector.load %arg2[%c0_5, %c0_6] : memref<32x128xf32, #tpu.memory_space<vmem>>, vector<32x128xf32>
    %c0_7 = arith.constant 0 : index
    %c0_8 = arith.constant 0 : index
    %7 = vector.load %arg3[%c0_7, %c0_8] : memref<32x128xf32, #tpu.memory_space<vmem>>, vector<32x128xf32>
    %8 = tpu.iota {dimensions = array<i32: 1>} : vector<2x128xi32>
    %c64_i32 = arith.constant 64 : i32
    %9 = vector.broadcast %c64_i32 : i32 to vector<2x128xi32>
    %10 = arith.cmpi sge, %8, %9 : vector<2x128xi32>
    %c96_i32 = arith.constant 96 : i32
    %11 = vector.broadcast %c96_i32 : i32 to vector<2x128xi32>
    %12 = arith.cmpi slt, %8, %11 : vector<2x128xi32>
    %13 = arith.andi %10, %12 : vector<2x128xi1>
    %cst_9 = arith.constant 0.000000e+00 : f32
    %14 = vector.broadcast %cst_9 : f32 to vector<2x32xf32>
    %15 = vector.extract_strided_slice %5 {offsets = [0, 0], sizes = [2, 128], strides = [1, 1]} : vector<16x256xf32> to vector<2x128xf32>
    %cst_10 = arith.constant dense<0.000000e+00> : vector<2x128xf32>
    %16 = tpu.matmul %14, %6, %cst_10 {dimension_numbers = #tpu.dot_dimension_numbers<[1], [0], [0], [1], [0, 0, 1, 1], [], []>} : vector<2x32xf32>, vector<32x128xf32>, vector<2x128xf32> -> vector<2x128xf32>
    %17 = arith.addf %15, %16 : vector<2x128xf32>
    %18 = math.tanh %17 : vector<2x128xf32>
    %19 = arith.negf %17 : vector<2x128xf32>
    %20 = math.exp %19 : vector<2x128xf32>
    %cst_11 = arith.constant 1.000000e+00 : f32
    %21 = vector.broadcast %cst_11 : f32 to vector<2x128xf32>
    %22 = arith.addf %21, %20 : vector<2x128xf32>
    %23 = arith.divf %21, %22 : vector<2x128xf32>
    %24 = arith.select %13, %18, %23 : vector<2x128xi1>, vector<2x128xf32>
    %25 = vector.extract_strided_slice %24 {offsets = [0, 0], sizes = [2, 32], strides = [1, 1]} : vector<2x128xf32> to vector<2x32xf32>
    %26 = vector.extract_strided_slice %24 {offsets = [0, 32], sizes = [2, 32], strides = [1, 1]} : vector<2x128xf32> to vector<2x32xf32>
    %27 = vector.extract_strided_slice %24 {offsets = [0, 64], sizes = [2, 32], strides = [1, 1]} : vector<2x128xf32> to vector<2x32xf32>
    %28 = vector.extract_strided_slice %24 {offsets = [0, 96], sizes = [2, 32], strides = [1, 1]} : vector<2x128xf32> to vector<2x32xf32>
    %29 = arith.mulf %26, %14 : vector<2x32xf32>
    %30 = arith.mulf %25, %27 : vector<2x32xf32>
    %31 = arith.addf %29, %30 : vector<2x32xf32>
    %32 = math.tanh %31 : vector<2x32xf32>
    %33 = arith.mulf %28, %32 : vector<2x32xf32>
    %c0_12 = arith.constant 0 : index
    %c0_13 = arith.constant 0 : index
    %34 = vector.load %arg5[%c0_12, %c0_13] : memref<16x64xf32, #tpu.memory_space<vmem>>, vector<2x32xf32>
    tpu.vector_store %arg5[%c0_12, %c0_13], %33 {strides = array<i32>} : memref<16x64xf32, #tpu.memory_space<vmem>>, vector<2x32xf32>,
    %35 = vector.extract_strided_slice %5 {offsets = [14, 128], sizes = [2, 128], strides = [1, 1]} : vector<16x256xf32> to vector<2x128xf32>
    %cst_14 = arith.constant dense<0.000000e+00> : vector<2x128xf32>
    %36 = tpu.matmul %14, %7, %cst_14 {dimension_numbers = #tpu.dot_dimension_numbers<[1], [0], [0], [1], [0, 0, 1, 1], [], []>} : vector<2x32xf32>, vector<32x128xf32>, vector<2x128xf32> -> vector<2x128xf32>
    %37 = arith.addf %35, %36 : vector<2x128xf32>
    %38 = math.tanh %37 : vector<2x128xf32>
    %39 = arith.negf %37 : vector<2x128xf32>
    %40 = math.exp %39 : vector<2x128xf32>
    %cst_15 = arith.constant 1.000000e+00 : f32
    %41 = vector.broadcast %cst_15 : f32 to vector<2x128xf32>
    %42 = arith.addf %41, %40 : vector<2x128xf32>
    %43 = arith.divf %41, %42 : vector<2x128xf32>
    %44 = arith.select %13, %38, %43 : vector<2x128xi1>, vector<2x128xf32>
    %45 = vector.extract_strided_slice %44 {offsets = [0, 0], sizes = [2, 32], strides = [1, 1]} : vector<2x128xf32> to vector<2x32xf32>
    %46 = vector.extract_strided_slice %44 {offsets = [0, 32], sizes = [2, 32], strides = [1, 1]} : vector<2x128xf32> to vector<2x32xf32>
    %47 = vector.extract_strided_slice %44 {offsets = [0, 64], sizes = [2, 32], strides = [1, 1]} : vector<2x128xf32> to vector<2x32xf32>
    %48 = vector.extract_strided_slice %44 {offsets = [0, 96], sizes = [2, 32], strides = [1, 1]} : vector<2x128xf32> to vector<2x32xf32>
    %49 = arith.mulf %46, %14 : vector<2x32xf32>
    %50 = arith.mulf %45, %47 : vector<2x32xf32>
    %51 = arith.addf %49, %50 : vector<2x32xf32>
    %52 = math.tanh %51 : vector<2x32xf32>
    %53 = arith.mulf %48, %52 : vector<2x32xf32>
    %c14 = arith.constant 14 : index
    %c32 = arith.constant 32 : index
    %54 = vector.load %arg5[%c14, %c32] : memref<16x64xf32, #tpu.memory_space<vmem>>, vector<2x32xf32>
    tpu.vector_store %arg5[%c14, %c32], %53 {strides = array<i32>} : memref<16x64xf32, #tpu.memory_space<vmem>>, vector<2x32xf32>,
    %55 = vector.extract_strided_slice %5 {offsets = [2, 0], sizes = [2, 128], strides = [1, 1]} : vector<16x256xf32> to vector<2x128xf32>
    %cst_16 = arith.constant dense<0.000000e+00> : vector<2x128xf32>
    %56 = tpu.matmul %33, %6, %cst_16 {dimension_numbers = #tpu.dot_dimension_numbers<[1], [0], [0], [1], [0, 0, 1, 1], [], []>} : vector<2x32xf32>, vector<32x128xf32>, vector<2x128xf32> -> vector<2x128xf32>
    %57 = arith.addf %55, %56 : vector<2x128xf32>
    %58 = math.tanh %57 : vector<2x128xf32>
    %59 = arith.negf %57 : vector<2x128xf32>
    %60 = math.exp %59 : vector<2x128xf32>
    %cst_17 = arith.constant 1.000000e+00 : f32
    %61 = vector.broadcast %cst_17 : f32 to vector<2x128xf32>
    %62 = arith.addf %61, %60 : vector<2x128xf32>
    %63 = arith.divf %61, %62 : vector<2x128xf32>
    %64 = arith.select %13, %58, %63 : vector<2x128xi1>, vector<2x128xf32>
    %65 = vector.extract_strided_slice %64 {offsets = [0, 0], sizes = [2, 32], strides = [1, 1]} : vector<2x128xf32> to vector<2x32xf32>
    %66 = vector.extract_strided_slice %64 {offsets = [0, 32], sizes = [2, 32], strides = [1, 1]} : vector<2x128xf32> to vector<2x32xf32>
    %67 = vector.extract_strided_slice %64 {offsets = [0, 64], sizes = [2, 32], strides = [1, 1]} : vector<2x128xf32> to vector<2x32xf32>
    %68 = vector.extract_strided_slice %64 {offsets = [0, 96], sizes = [2, 32], strides = [1, 1]} : vector<2x128xf32> to vector<2x32xf32>
    %69 = arith.mulf %66, %31 : vector<2x32xf32>
    %70 = arith.mulf %65, %67 : vector<2x32xf32>
    %71 = arith.addf %69, %70 : vector<2x32xf32>
    %72 = math.tanh %71 : vector<2x32xf32>
    %73 = arith.mulf %68, %72 : vector<2x32xf32>
    %c2 = arith.constant 2 : index
    %c0_18 = arith.constant 0 : index
    %74 = vector.load %arg5[%c2, %c0_18] : memref<16x64xf32, #tpu.memory_space<vmem>>, vector<2x32xf32>
    tpu.vector_store %arg5[%c2, %c0_18], %73 {strides = array<i32>} : memref<16x64xf32, #tpu.memory_space<vmem>>, vector<2x32xf32>,
    %75 = vector.extract_strided_slice %5 {offsets = [12, 128], sizes = [2, 128], strides = [1, 1]} : vector<16x256xf32> to vector<2x128xf32>
    %cst_19 = arith.constant dense<0.000000e+00> : vector<2x128xf32>
    %76 = tpu.matmul %53, %7, %cst_19 {dimension_numbers = #tpu.dot_dimension_numbers<[1], [0], [0], [1], [0, 0, 1, 1], [], []>} : vector<2x32xf32>, vector<32x128xf32>, vector<2x128xf32> -> vector<2x128xf32>
    %77 = arith.addf %75, %76 : vector<2x128xf32>
    %78 = math.tanh %77 : vector<2x128xf32>
    %79 = arith.negf %77 : vector<2x128xf32>
    %80 = math.exp %79 : vector<2x128xf32>
    %cst_20 = arith.constant 1.000000e+00 : f32
    %81 = vector.broadcast %cst_20 : f32 to vector<2x128xf32>
    %82 = arith.addf %81, %80 : vector<2x128xf32>
    %83 = arith.divf %81, %82 : vector<2x128xf32>
    %84 = arith.select %13, %78, %83 : vector<2x128xi1>, vector<2x128xf32>
    %85 = vector.extract_strided_slice %84 {offsets = [0, 0], sizes = [2, 32], strides = [1, 1]} : vector<2x128xf32> to vector<2x32xf32>
    %86 = vector.extract_strided_slice %84 {offsets = [0, 32], sizes = [2, 32], strides = [1, 1]} : vector<2x128xf32> to vector<2x32xf32>
    %87 = vector.extract_strided_slice %84 {offsets = [0, 64], sizes = [2, 32], strides = [1, 1]} : vector<2x128xf32> to vector<2x32xf32>
    %88 = vector.extract_strided_slice %84 {offsets = [0, 96], sizes = [2, 32], strides = [1, 1]} : vector<2x128xf32> to vector<2x32xf32>
    %89 = arith.mulf %86, %51 : vector<2x32xf32>
    %90 = arith.mulf %85, %87 : vector<2x32xf32>
    %91 = arith.addf %89, %90 : vector<2x32xf32>
    %92 = math.tanh %91 : vector<2x32xf32>
    %93 = arith.mulf %88, %92 : vector<2x32xf32>
    %c12 = arith.constant 12 : index
    %c32_21 = arith.constant 32 : index
    %94 = vector.load %arg5[%c12, %c32_21] : memref<16x64xf32, #tpu.memory_space<vmem>>, vector<2x32xf32>
    tpu.vector_store %arg5[%c12, %c32_21], %93 {strides = array<i32>} : memref<16x64xf32, #tpu.memory_space<vmem>>, vector<2x32xf32>,
    %95 = vector.extract_strided_slice %5 {offsets = [4, 0], sizes = [2, 128], strides = [1, 1]} : vector<16x256xf32> to vector<2x128xf32>
    %cst_22 = arith.constant dense<0.000000e+00> : vector<2x128xf32>
    %96 = tpu.matmul %73, %6, %cst_22 {dimension_numbers = #tpu.dot_dimension_numbers<[1], [0], [0], [1], [0, 0, 1, 1], [], []>} : vector<2x32xf32>, vector<32x128xf32>, vector<2x128xf32> -> vector<2x128xf32>
    %97 = arith.addf %95, %96 : vector<2x128xf32>
    %98 = math.tanh %97 : vector<2x128xf32>
    %99 = arith.negf %97 : vector<2x128xf32>
    %100 = math.exp %99 : vector<2x128xf32>
    %cst_23 = arith.constant 1.000000e+00 : f32
    %101 = vector.broadcast %cst_23 : f32 to vector<2x128xf32>
    %102 = arith.addf %101, %100 : vector<2x128xf32>
    %103 = arith.divf %101, %102 : vector<2x128xf32>
    %104 = arith.select %13, %98, %103 : vector<2x128xi1>, vector<2x128xf32>
    %105 = vector.extract_strided_slice %104 {offsets = [0, 0], sizes = [2, 32], strides = [1, 1]} : vector<2x128xf32> to vector<2x32xf32>
    %106 = vector.extract_strided_slice %104 {offsets = [0, 32], sizes = [2, 32], strides = [1, 1]} : vector<2x128xf32> to vector<2x32xf32>
    %107 = vector.extract_strided_slice %104 {offsets = [0, 64], sizes = [2, 32], strides = [1, 1]} : vector<2x128xf32> to vector<2x32xf32>
    %108 = vector.extract_strided_slice %104 {offsets = [0, 96], sizes = [2, 32], strides = [1, 1]} : vector<2x128xf32> to vector<2x32xf32>
    %109 = arith.mulf %106, %71 : vector<2x32xf32>
    %110 = arith.mulf %105, %107 : vector<2x32xf32>
    %111 = arith.addf %109, %110 : vector<2x32xf32>
    %112 = math.tanh %111 : vector<2x32xf32>
    %113 = arith.mulf %108, %112 : vector<2x32xf32>
    %c4 = arith.constant 4 : index
    %c0_24 = arith.constant 0 : index
    %114 = vector.load %arg5[%c4, %c0_24] : memref<16x64xf32, #tpu.memory_space<vmem>>, vector<2x32xf32>
    tpu.vector_store %arg5[%c4, %c0_24], %113 {strides = array<i32>} : memref<16x64xf32, #tpu.memory_space<vmem>>, vector<2x32xf32>,
    %115 = vector.extract_strided_slice %5 {offsets = [10, 128], sizes = [2, 128], strides = [1, 1]} : vector<16x256xf32> to vector<2x128xf32>
    %cst_25 = arith.constant dense<0.000000e+00> : vector<2x128xf32>
    %116 = tpu.matmul %93, %7, %cst_25 {dimension_numbers = #tpu.dot_dimension_numbers<[1], [0], [0], [1], [0, 0, 1, 1], [], []>} : vector<2x32xf32>, vector<32x128xf32>, vector<2x128xf32> -> vector<2x128xf32>
    %117 = arith.addf %115, %116 : vector<2x128xf32>
    %118 = math.tanh %117 : vector<2x128xf32>
    %119 = arith.negf %117 : vector<2x128xf32>
    %120 = math.exp %119 : vector<2x128xf32>
    %cst_26 = arith.constant 1.000000e+00 : f32
    %121 = vector.broadcast %cst_26 : f32 to vector<2x128xf32>
    %122 = arith.addf %121, %120 : vector<2x128xf32>
    %123 = arith.divf %121, %122 : vector<2x128xf32>
    %124 = arith.select %13, %118, %123 : vector<2x128xi1>, vector<2x128xf32>
    %125 = vector.extract_strided_slice %124 {offsets = [0, 0], sizes = [2, 32], strides = [1, 1]} : vector<2x128xf32> to vector<2x32xf32>
    %126 = vector.extract_strided_slice %124 {offsets = [0, 32], sizes = [2, 32], strides = [1, 1]} : vector<2x128xf32> to vector<2x32xf32>
    %127 = vector.extract_strided_slice %124 {offsets = [0, 64], sizes = [2, 32], strides = [1, 1]} : vector<2x128xf32> to vector<2x32xf32>
    %128 = vector.extract_strided_slice %124 {offsets = [0, 96], sizes = [2, 32], strides = [1, 1]} : vector<2x128xf32> to vector<2x32xf32>
    %129 = arith.mulf %126, %91 : vector<2x32xf32>
    %130 = arith.mulf %125, %127 : vector<2x32xf32>
    %131 = arith.addf %129, %130 : vector<2x32xf32>
    %132 = math.tanh %131 : vector<2x32xf32>
    %133 = arith.mulf %128, %132 : vector<2x32xf32>
    %c10 = arith.constant 10 : index
    %c32_27 = arith.constant 32 : index
    %134 = vector.load %arg5[%c10, %c32_27] : memref<16x64xf32, #tpu.memory_space<vmem>>, vector<2x32xf32>
    tpu.vector_store %arg5[%c10, %c32_27], %133 {strides = array<i32>} : memref<16x64xf32, #tpu.memory_space<vmem>>, vector<2x32xf32>,
    %135 = vector.extract_strided_slice %5 {offsets = [6, 0], sizes = [2, 128], strides = [1, 1]} : vector<16x256xf32> to vector<2x128xf32>
    %cst_28 = arith.constant dense<0.000000e+00> : vector<2x128xf32>
    %136 = tpu.matmul %113, %6, %cst_28 {dimension_numbers = #tpu.dot_dimension_numbers<[1], [0], [0], [1], [0, 0, 1, 1], [], []>} : vector<2x32xf32>, vector<32x128xf32>, vector<2x128xf32> -> vector<2x128xf32>
    %137 = arith.addf %135, %136 : vector<2x128xf32>
    %138 = math.tanh %137 : vector<2x128xf32>
    %139 = arith.negf %137 : vector<2x128xf32>
    %140 = math.exp %139 : vector<2x128xf32>
    %cst_29 = arith.constant 1.000000e+00 : f32
    %141 = vector.broadcast %cst_29 : f32 to vector<2x128xf32>
    %142 = arith.addf %141, %140 : vector<2x128xf32>
    %143 = arith.divf %141, %142 : vector<2x128xf32>
    %144 = arith.select %13, %138, %143 : vector<2x128xi1>, vector<2x128xf32>
    %145 = vector.extract_strided_slice %144 {offsets = [0, 0], sizes = [2, 32], strides = [1, 1]} : vector<2x128xf32> to vector<2x32xf32>
    %146 = vector.extract_strided_slice %144 {offsets = [0, 32], sizes = [2, 32], strides = [1, 1]} : vector<2x128xf32> to vector<2x32xf32>
    %147 = vector.extract_strided_slice %144 {offsets = [0, 64], sizes = [2, 32], strides = [1, 1]} : vector<2x128xf32> to vector<2x32xf32>
    %148 = vector.extract_strided_slice %144 {offsets = [0, 96], sizes = [2, 32], strides = [1, 1]} : vector<2x128xf32> to vector<2x32xf32>
    %149 = arith.mulf %146, %111 : vector<2x32xf32>
    %150 = arith.mulf %145, %147 : vector<2x32xf32>
    %151 = arith.addf %149, %150 : vector<2x32xf32>
    %152 = math.tanh %151 : vector<2x32xf32>
    %153 = arith.mulf %148, %152 : vector<2x32xf32>
    %c6 = arith.constant 6 : index
    %c0_30 = arith.constant 0 : index
    %154 = vector.load %arg5[%c6, %c0_30] : memref<16x64xf32, #tpu.memory_space<vmem>>, vector<2x32xf32>
    tpu.vector_store %arg5[%c6, %c0_30], %153 {strides = array<i32>} : memref<16x64xf32, #tpu.memory_space<vmem>>, vector<2x32xf32>,
    %155 = vector.extract_strided_slice %5 {offsets = [8, 128], sizes = [2, 128], strides = [1, 1]} : vector<16x256xf32> to vector<2x128xf32>
    %cst_31 = arith.constant dense<0.000000e+00> : vector<2x128xf32>
    %156 = tpu.matmul %133, %7, %cst_31 {dimension_numbers = #tpu.dot_dimension_numbers<[1], [0], [0], [1], [0, 0, 1, 1], [], []>} : vector<2x32xf32>, vector<32x128xf32>, vector<2x128xf32> -> vector<2x128xf32>
    %157 = arith.addf %155, %156 : vector<2x128xf32>
    %158 = math.tanh %157 : vector<2x128xf32>
    %159 = arith.negf %157 : vector<2x128xf32>
    %160 = math.exp %159 : vector<2x128xf32>
    %cst_32 = arith.constant 1.000000e+00 : f32
    %161 = vector.broadcast %cst_32 : f32 to vector<2x128xf32>
    %162 = arith.addf %161, %160 : vector<2x128xf32>
    %163 = arith.divf %161, %162 : vector<2x128xf32>
    %164 = arith.select %13, %158, %163 : vector<2x128xi1>, vector<2x128xf32>
    %165 = vector.extract_strided_slice %164 {offsets = [0, 0], sizes = [2, 32], strides = [1, 1]} : vector<2x128xf32> to vector<2x32xf32>
    %166 = vector.extract_strided_slice %164 {offsets = [0, 32], sizes = [2, 32], strides = [1, 1]} : vector<2x128xf32> to vector<2x32xf32>
    %167 = vector.extract_strided_slice %164 {offsets = [0, 64], sizes = [2, 32], strides = [1, 1]} : vector<2x128xf32> to vector<2x32xf32>
    %168 = vector.extract_strided_slice %164 {offsets = [0, 96], sizes = [2, 32], strides = [1, 1]} : vector<2x128xf32> to vector<2x32xf32>
    %169 = arith.mulf %166, %131 : vector<2x32xf32>
    %170 = arith.mulf %165, %167 : vector<2x32xf32>
    %171 = arith.addf %169, %170 : vector<2x32xf32>
    %172 = math.tanh %171 : vector<2x32xf32>
    %173 = arith.mulf %168, %172 : vector<2x32xf32>
    %c8 = arith.constant 8 : index
    %c32_33 = arith.constant 32 : index
    %174 = vector.load %arg5[%c8, %c32_33] : memref<16x64xf32, #tpu.memory_space<vmem>>, vector<2x32xf32>
    tpu.vector_store %arg5[%c8, %c32_33], %173 {strides = array<i32>} : memref<16x64xf32, #tpu.memory_space<vmem>>, vector<2x32xf32>,
    %175 = vector.extract_strided_slice %5 {offsets = [8, 0], sizes = [2, 128], strides = [1, 1]} : vector<16x256xf32> to vector<2x128xf32>
    %cst_34 = arith.constant dense<0.000000e+00> : vector<2x128xf32>
    %176 = tpu.matmul %153, %6, %cst_34 {dimension_numbers = #tpu.dot_dimension_numbers<[1], [0], [0], [1], [0, 0, 1, 1], [], []>} : vector<2x32xf32>, vector<32x128xf32>, vector<2x128xf32> -> vector<2x128xf32>
    %177 = arith.addf %175, %176 : vector<2x128xf32>
    %178 = math.tanh %177 : vector<2x128xf32>
    %179 = arith.negf %177 : vector<2x128xf32>
    %180 = math.exp %179 : vector<2x128xf32>
    %cst_35 = arith.constant 1.000000e+00 : f32
    %181 = vector.broadcast %cst_35 : f32 to vector<2x128xf32>
    %182 = arith.addf %181, %180 : vector<2x128xf32>
    %183 = arith.divf %181, %182 : vector<2x128xf32>
    %184 = arith.select %13, %178, %183 : vector<2x128xi1>, vector<2x128xf32>
    %185 = vector.extract_strided_slice %184 {offsets = [0, 0], sizes = [2, 32], strides = [1, 1]} : vector<2x128xf32> to vector<2x32xf32>
    %186 = vector.extract_strided_slice %184 {offsets = [0, 32], sizes = [2, 32], strides = [1, 1]} : vector<2x128xf32> to vector<2x32xf32>
    %187 = vector.extract_strided_slice %184 {offsets = [0, 64], sizes = [2, 32], strides = [1, 1]} : vector<2x128xf32> to vector<2x32xf32>
    %188 = vector.extract_strided_slice %184 {offsets = [0, 96], sizes = [2, 32], strides = [1, 1]} : vector<2x128xf32> to vector<2x32xf32>
    %189 = arith.mulf %186, %151 : vector<2x32xf32>
    %190 = arith.mulf %185, %187 : vector<2x32xf32>
    %191 = arith.addf %189, %190 : vector<2x32xf32>
    %192 = math.tanh %191 : vector<2x32xf32>
    %193 = arith.mulf %188, %192 : vector<2x32xf32>
    %c8_36 = arith.constant 8 : index
    %c0_37 = arith.constant 0 : index
    %194 = vector.load %arg5[%c8_36, %c0_37] : memref<16x64xf32, #tpu.memory_space<vmem>>, vector<2x32xf32>
    tpu.vector_store %arg5[%c8_36, %c0_37], %193 {strides = array<i32>} : memref<16x64xf32, #tpu.memory_space<vmem>>, vector<2x32xf32>,
    %195 = vector.extract_strided_slice %5 {offsets = [6, 128], sizes = [2, 128], strides = [1, 1]} : vector<16x256xf32> to vector<2x128xf32>
    %cst_38 = arith.constant dense<0.000000e+00> : vector<2x128xf32>
    %196 = tpu.matmul %173, %7, %cst_38 {dimension_numbers = #tpu.dot_dimension_numbers<[1], [0], [0], [1], [0, 0, 1, 1], [], []>} : vector<2x32xf32>, vector<32x128xf32>, vector<2x128xf32> -> vector<2x128xf32>
    %197 = arith.addf %195, %196 : vector<2x128xf32>
    %198 = math.tanh %197 : vector<2x128xf32>
    %199 = arith.negf %197 : vector<2x128xf32>
    %200 = math.exp %199 : vector<2x128xf32>
    %cst_39 = arith.constant 1.000000e+00 : f32
    %201 = vector.broadcast %cst_39 : f32 to vector<2x128xf32>
    %202 = arith.addf %201, %200 : vector<2x128xf32>
    %203 = arith.divf %201, %202 : vector<2x128xf32>
    %204 = arith.select %13, %198, %203 : vector<2x128xi1>, vector<2x128xf32>
    %205 = vector.extract_strided_slice %204 {offsets = [0, 0], sizes = [2, 32], strides = [1, 1]} : vector<2x128xf32> to vector<2x32xf32>
    %206 = vector.extract_strided_slice %204 {offsets = [0, 32], sizes = [2, 32], strides = [1, 1]} : vector<2x128xf32> to vector<2x32xf32>
    %207 = vector.extract_strided_slice %204 {offsets = [0, 64], sizes = [2, 32], strides = [1, 1]} : vector<2x128xf32> to vector<2x32xf32>
    %208 = vector.extract_strided_slice %204 {offsets = [0, 96], sizes = [2, 32], strides = [1, 1]} : vector<2x128xf32> to vector<2x32xf32>
    %209 = arith.mulf %206, %171 : vector<2x32xf32>
    %210 = arith.mulf %205, %207 : vector<2x32xf32>
    %211 = arith.addf %209, %210 : vector<2x32xf32>
    %212 = math.tanh %211 : vector<2x32xf32>
    %213 = arith.mulf %208, %212 : vector<2x32xf32>
    %c6_40 = arith.constant 6 : index
    %c32_41 = arith.constant 32 : index
    %214 = vector.load %arg5[%c6_40, %c32_41] : memref<16x64xf32, #tpu.memory_space<vmem>>, vector<2x32xf32>
    tpu.vector_store %arg5[%c6_40, %c32_41], %213 {strides = array<i32>} : memref<16x64xf32, #tpu.memory_space<vmem>>, vector<2x32xf32>,
    %215 = vector.extract_strided_slice %5 {offsets = [10, 0], sizes = [2, 128], strides = [1, 1]} : vector<16x256xf32> to vector<2x128xf32>
    %cst_42 = arith.constant dense<0.000000e+00> : vector<2x128xf32>
    %216 = tpu.matmul %193, %6, %cst_42 {dimension_numbers = #tpu.dot_dimension_numbers<[1], [0], [0], [1], [0, 0, 1, 1], [], []>} : vector<2x32xf32>, vector<32x128xf32>, vector<2x128xf32> -> vector<2x128xf32>
    %217 = arith.addf %215, %216 : vector<2x128xf32>
    %218 = math.tanh %217 : vector<2x128xf32>
    %219 = arith.negf %217 : vector<2x128xf32>
    %220 = math.exp %219 : vector<2x128xf32>
    %cst_43 = arith.constant 1.000000e+00 : f32
    %221 = vector.broadcast %cst_43 : f32 to vector<2x128xf32>
    %222 = arith.addf %221, %220 : vector<2x128xf32>
    %223 = arith.divf %221, %222 : vector<2x128xf32>
    %224 = arith.select %13, %218, %223 : vector<2x128xi1>, vector<2x128xf32>
    %225 = vector.extract_strided_slice %224 {offsets = [0, 0], sizes = [2, 32], strides = [1, 1]} : vector<2x128xf32> to vector<2x32xf32>
    %226 = vector.extract_strided_slice %224 {offsets = [0, 32], sizes = [2, 32], strides = [1, 1]} : vector<2x128xf32> to vector<2x32xf32>
    %227 = vector.extract_strided_slice %224 {offsets = [0, 64], sizes = [2, 32], strides = [1, 1]} : vector<2x128xf32> to vector<2x32xf32>
    %228 = vector.extract_strided_slice %224 {offsets = [0, 96], sizes = [2, 32], strides = [1, 1]} : vector<2x128xf32> to vector<2x32xf32>
    %229 = arith.mulf %226, %191 : vector<2x32xf32>
    %230 = arith.mulf %225, %227 : vector<2x32xf32>
    %231 = arith.addf %229, %230 : vector<2x32xf32>
    %232 = math.tanh %231 : vector<2x32xf32>
    %233 = arith.mulf %228, %232 : vector<2x32xf32>
    %c10_44 = arith.constant 10 : index
    %c0_45 = arith.constant 0 : index
    %234 = vector.load %arg5[%c10_44, %c0_45] : memref<16x64xf32, #tpu.memory_space<vmem>>, vector<2x32xf32>
    tpu.vector_store %arg5[%c10_44, %c0_45], %233 {strides = array<i32>} : memref<16x64xf32, #tpu.memory_space<vmem>>, vector<2x32xf32>,
    %235 = vector.extract_strided_slice %5 {offsets = [4, 128], sizes = [2, 128], strides = [1, 1]} : vector<16x256xf32> to vector<2x128xf32>
    %cst_46 = arith.constant dense<0.000000e+00> : vector<2x128xf32>
    %236 = tpu.matmul %213, %7, %cst_46 {dimension_numbers = #tpu.dot_dimension_numbers<[1], [0], [0], [1], [0, 0, 1, 1], [], []>} : vector<2x32xf32>, vector<32x128xf32>, vector<2x128xf32> -> vector<2x128xf32>
    %237 = arith.addf %235, %236 : vector<2x128xf32>
    %238 = math.tanh %237 : vector<2x128xf32>
    %239 = arith.negf %237 : vector<2x128xf32>
    %240 = math.exp %239 : vector<2x128xf32>
    %cst_47 = arith.constant 1.000000e+00 : f32
    %241 = vector.broadcast %cst_47 : f32 to vector<2x128xf32>
    %242 = arith.addf %241, %240 : vector<2x128xf32>
    %243 = arith.divf %241, %242 : vector<2x128xf32>
    %244 = arith.select %13, %238, %243 : vector<2x128xi1>, vector<2x128xf32>
    %245 = vector.extract_strided_slice %244 {offsets = [0, 0], sizes = [2, 32], strides = [1, 1]} : vector<2x128xf32> to vector<2x32xf32>
    %246 = vector.extract_strided_slice %244 {offsets = [0, 32], sizes = [2, 32], strides = [1, 1]} : vector<2x128xf32> to vector<2x32xf32>
    %247 = vector.extract_strided_slice %244 {offsets = [0, 64], sizes = [2, 32], strides = [1, 1]} : vector<2x128xf32> to vector<2x32xf32>
    %248 = vector.extract_strided_slice %244 {offsets = [0, 96], sizes = [2, 32], strides = [1, 1]} : vector<2x128xf32> to vector<2x32xf32>
    %249 = arith.mulf %246, %211 : vector<2x32xf32>
    %250 = arith.mulf %245, %247 : vector<2x32xf32>
    %251 = arith.addf %249, %250 : vector<2x32xf32>
    %252 = math.tanh %251 : vector<2x32xf32>
    %253 = arith.mulf %248, %252 : vector<2x32xf32>
    %c4_48 = arith.constant 4 : index
    %c32_49 = arith.constant 32 : index
    %254 = vector.load %arg5[%c4_48, %c32_49] : memref<16x64xf32, #tpu.memory_space<vmem>>, vector<2x32xf32>
    tpu.vector_store %arg5[%c4_48, %c32_49], %253 {strides = array<i32>} : memref<16x64xf32, #tpu.memory_space<vmem>>, vector<2x32xf32>,
    %255 = vector.extract_strided_slice %5 {offsets = [12, 0], sizes = [2, 128], strides = [1, 1]} : vector<16x256xf32> to vector<2x128xf32>
    %cst_50 = arith.constant dense<0.000000e+00> : vector<2x128xf32>
    %256 = tpu.matmul %233, %6, %cst_50 {dimension_numbers = #tpu.dot_dimension_numbers<[1], [0], [0], [1], [0, 0, 1, 1], [], []>} : vector<2x32xf32>, vector<32x128xf32>, vector<2x128xf32> -> vector<2x128xf32>
    %257 = arith.addf %255, %256 : vector<2x128xf32>
    %258 = math.tanh %257 : vector<2x128xf32>
    %259 = arith.negf %257 : vector<2x128xf32>
    %260 = math.exp %259 : vector<2x128xf32>
    %cst_51 = arith.constant 1.000000e+00 : f32
    %261 = vector.broadcast %cst_51 : f32 to vector<2x128xf32>
    %262 = arith.addf %261, %260 : vector<2x128xf32>
    %263 = arith.divf %261, %262 : vector<2x128xf32>
    %264 = arith.select %13, %258, %263 : vector<2x128xi1>, vector<2x128xf32>
    %265 = vector.extract_strided_slice %264 {offsets = [0, 0], sizes = [2, 32], strides = [1, 1]} : vector<2x128xf32> to vector<2x32xf32>
    %266 = vector.extract_strided_slice %264 {offsets = [0, 32], sizes = [2, 32], strides = [1, 1]} : vector<2x128xf32> to vector<2x32xf32>
    %267 = vector.extract_strided_slice %264 {offsets = [0, 64], sizes = [2, 32], strides = [1, 1]} : vector<2x128xf32> to vector<2x32xf32>
    %268 = vector.extract_strided_slice %264 {offsets = [0, 96], sizes = [2, 32], strides = [1, 1]} : vector<2x128xf32> to vector<2x32xf32>
    %269 = arith.mulf %266, %231 : vector<2x32xf32>
    %270 = arith.mulf %265, %267 : vector<2x32xf32>
    %271 = arith.addf %269, %270 : vector<2x32xf32>
    %272 = math.tanh %271 : vector<2x32xf32>
    %273 = arith.mulf %268, %272 : vector<2x32xf32>
    %c12_52 = arith.constant 12 : index
    %c0_53 = arith.constant 0 : index
    %274 = vector.load %arg5[%c12_52, %c0_53] : memref<16x64xf32, #tpu.memory_space<vmem>>, vector<2x32xf32>
    tpu.vector_store %arg5[%c12_52, %c0_53], %273 {strides = array<i32>} : memref<16x64xf32, #tpu.memory_space<vmem>>, vector<2x32xf32>,
    %275 = vector.extract_strided_slice %5 {offsets = [2, 128], sizes = [2, 128], strides = [1, 1]} : vector<16x256xf32> to vector<2x128xf32>
    %cst_54 = arith.constant dense<0.000000e+00> : vector<2x128xf32>
    %276 = tpu.matmul %253, %7, %cst_54 {dimension_numbers = #tpu.dot_dimension_numbers<[1], [0], [0], [1], [0, 0, 1, 1], [], []>} : vector<2x32xf32>, vector<32x128xf32>, vector<2x128xf32> -> vector<2x128xf32>
    %277 = arith.addf %275, %276 : vector<2x128xf32>
    %278 = math.tanh %277 : vector<2x128xf32>
    %279 = arith.negf %277 : vector<2x128xf32>
    %280 = math.exp %279 : vector<2x128xf32>
    %cst_55 = arith.constant 1.000000e+00 : f32
    %281 = vector.broadcast %cst_55 : f32 to vector<2x128xf32>
    %282 = arith.addf %281, %280 : vector<2x128xf32>
    %283 = arith.divf %281, %282 : vector<2x128xf32>
    %284 = arith.select %13, %278, %283 : vector<2x128xi1>, vector<2x128xf32>
    %285 = vector.extract_strided_slice %284 {offsets = [0, 0], sizes = [2, 32], strides = [1, 1]} : vector<2x128xf32> to vector<2x32xf32>
    %286 = vector.extract_strided_slice %284 {offsets = [0, 32], sizes = [2, 32], strides = [1, 1]} : vector<2x128xf32> to vector<2x32xf32>
    %287 = vector.extract_strided_slice %284 {offsets = [0, 64], sizes = [2, 32], strides = [1, 1]} : vector<2x128xf32> to vector<2x32xf32>
    %288 = vector.extract_strided_slice %284 {offsets = [0, 96], sizes = [2, 32], strides = [1, 1]} : vector<2x128xf32> to vector<2x32xf32>
    %289 = arith.mulf %286, %251 : vector<2x32xf32>
    %290 = arith.mulf %285, %287 : vector<2x32xf32>
    %291 = arith.addf %289, %290 : vector<2x32xf32>
    %292 = math.tanh %291 : vector<2x32xf32>
    %293 = arith.mulf %288, %292 : vector<2x32xf32>
    %c2_56 = arith.constant 2 : index
    %c32_57 = arith.constant 32 : index
    %294 = vector.load %arg5[%c2_56, %c32_57] : memref<16x64xf32, #tpu.memory_space<vmem>>, vector<2x32xf32>
    tpu.vector_store %arg5[%c2_56, %c32_57], %293 {strides = array<i32>} : memref<16x64xf32, #tpu.memory_space<vmem>>, vector<2x32xf32>,
    %295 = vector.extract_strided_slice %5 {offsets = [14, 0], sizes = [2, 128], strides = [1, 1]} : vector<16x256xf32> to vector<2x128xf32>
    %cst_58 = arith.constant dense<0.000000e+00> : vector<2x128xf32>
    %296 = tpu.matmul %273, %6, %cst_58 {dimension_numbers = #tpu.dot_dimension_numbers<[1], [0], [0], [1], [0, 0, 1, 1], [], []>} : vector<2x32xf32>, vector<32x128xf32>, vector<2x128xf32> -> vector<2x128xf32>
    %297 = arith.addf %295, %296 : vector<2x128xf32>
    %298 = math.tanh %297 : vector<2x128xf32>
    %299 = arith.negf %297 : vector<2x128xf32>
    %300 = math.exp %299 : vector<2x128xf32>
    %cst_59 = arith.constant 1.000000e+00 : f32
    %301 = vector.broadcast %cst_59 : f32 to vector<2x128xf32>
    %302 = arith.addf %301, %300 : vector<2x128xf32>
    %303 = arith.divf %301, %302 : vector<2x128xf32>
    %304 = arith.select %13, %298, %303 : vector<2x128xi1>, vector<2x128xf32>
    %305 = vector.extract_strided_slice %304 {offsets = [0, 0], sizes = [2, 32], strides = [1, 1]} : vector<2x128xf32> to vector<2x32xf32>
    %306 = vector.extract_strided_slice %304 {offsets = [0, 32], sizes = [2, 32], strides = [1, 1]} : vector<2x128xf32> to vector<2x32xf32>
    %307 = vector.extract_strided_slice %304 {offsets = [0, 64], sizes = [2, 32], strides = [1, 1]} : vector<2x128xf32> to vector<2x32xf32>
    %308 = vector.extract_strided_slice %304 {offsets = [0, 96], sizes = [2, 32], strides = [1, 1]} : vector<2x128xf32> to vector<2x32xf32>
    %309 = arith.mulf %306, %271 : vector<2x32xf32>
    %310 = arith.mulf %305, %307 : vector<2x32xf32>
    %311 = arith.addf %309, %310 : vector<2x32xf32>
    %312 = math.tanh %311 : vector<2x32xf32>
    %313 = arith.mulf %308, %312 : vector<2x32xf32>
    %c14_60 = arith.constant 14 : index
    %c0_61 = arith.constant 0 : index
    %314 = vector.load %arg5[%c14_60, %c0_61] : memref<16x64xf32, #tpu.memory_space<vmem>>, vector<2x32xf32>
    tpu.vector_store %arg5[%c14_60, %c0_61], %313 {strides = array<i32>} : memref<16x64xf32, #tpu.memory_space<vmem>>, vector<2x32xf32>,
    %315 = vector.extract_strided_slice %5 {offsets = [0, 128], sizes = [2, 128], strides = [1, 1]} : vector<16x256xf32> to vector<2x128xf32>
    %cst_62 = arith.constant dense<0.000000e+00> : vector<2x128xf32>
    %316 = tpu.matmul %293, %7, %cst_62 {dimension_numbers = #tpu.dot_dimension_numbers<[1], [0], [0], [1], [0, 0, 1, 1], [], []>} : vector<2x32xf32>, vector<32x128xf32>, vector<2x128xf32> -> vector<2x128xf32>
    %317 = arith.addf %315, %316 : vector<2x128xf32>
    %318 = math.tanh %317 : vector<2x128xf32>
    %319 = arith.negf %317 : vector<2x128xf32>
    %320 = math.exp %319 : vector<2x128xf32>
    %cst_63 = arith.constant 1.000000e+00 : f32
    %321 = vector.broadcast %cst_63 : f32 to vector<2x128xf32>
    %322 = arith.addf %321, %320 : vector<2x128xf32>
    %323 = arith.divf %321, %322 : vector<2x128xf32>
    %324 = arith.select %13, %318, %323 : vector<2x128xi1>, vector<2x128xf32>
    %325 = vector.extract_strided_slice %324 {offsets = [0, 0], sizes = [2, 32], strides = [1, 1]} : vector<2x128xf32> to vector<2x32xf32>
    %326 = vector.extract_strided_slice %324 {offsets = [0, 32], sizes = [2, 32], strides = [1, 1]} : vector<2x128xf32> to vector<2x32xf32>
    %327 = vector.extract_strided_slice %324 {offsets = [0, 64], sizes = [2, 32], strides = [1, 1]} : vector<2x128xf32> to vector<2x32xf32>
    %328 = vector.extract_strided_slice %324 {offsets = [0, 96], sizes = [2, 32], strides = [1, 1]} : vector<2x128xf32> to vector<2x32xf32>
    %329 = arith.mulf %326, %291 : vector<2x32xf32>
    %330 = arith.mulf %325, %327 : vector<2x32xf32>
    %331 = arith.addf %329, %330 : vector<2x32xf32>
    %332 = math.tanh %331 : vector<2x32xf32>
    %333 = arith.mulf %328, %332 : vector<2x32xf32>
    %c0_64 = arith.constant 0 : index
    %c32_65 = arith.constant 32 : index
    %334 = vector.load %arg5[%c0_64, %c32_65] : memref<16x64xf32, #tpu.memory_space<vmem>>, vector<2x32xf32>
    tpu.vector_store %arg5[%c0_64, %c32_65], %333 {strides = array<i32>} : memref<16x64xf32, #tpu.memory_space<vmem>>, vector<2x32xf32>,
    %c0_66 = arith.constant 0 : index
    %c0_67 = arith.constant 0 : index
    %c0_68 = arith.constant 0 : index
    %335 = vector.load %arg6[%c0_66, %c0_67, %c0_68] : memref<2x2x32xf32, #tpu.memory_space<vmem>>, vector<1x2x32xf32>
    %336 = vector.shape_cast %335 : vector<1x2x32xf32> to vector<2x32xf32>
    %337 = vector.shape_cast %313 : vector<2x32xf32> to vector<1x2x32xf32>
    tpu.vector_store %arg6[%c0_66, %c0_67, %c0_68], %337 {strides = array<i32>} : memref<2x2x32xf32, #tpu.memory_space<vmem>>, vector<1x2x32xf32>,
    %c1 = arith.constant 1 : index
    %c0_69 = arith.constant 0 : index
    %c0_70 = arith.constant 0 : index
    %338 = vector.load %arg6[%c1, %c0_69, %c0_70] : memref<2x2x32xf32, #tpu.memory_space<vmem>>, vector<1x2x32xf32>
    %339 = vector.shape_cast %338 : vector<1x2x32xf32> to vector<2x32xf32>
    %340 = vector.shape_cast %333 : vector<2x32xf32> to vector<1x2x32xf32>
    tpu.vector_store %arg6[%c1, %c0_69, %c0_70], %340 {strides = array<i32>} : memref<2x2x32xf32, #tpu.memory_space<vmem>>, vector<1x2x32xf32>,
    %c0_71 = arith.constant 0 : index
    %c0_72 = arith.constant 0 : index
    %c0_73 = arith.constant 0 : index
    %341 = vector.load %arg7[%c0_71, %c0_72, %c0_73] : memref<2x2x32xf32, #tpu.memory_space<vmem>>, vector<1x2x32xf32>
    %342 = vector.shape_cast %341 : vector<1x2x32xf32> to vector<2x32xf32>
    %343 = vector.shape_cast %311 : vector<2x32xf32> to vector<1x2x32xf32>
    tpu.vector_store %arg7[%c0_71, %c0_72, %c0_73], %343 {strides = array<i32>} : memref<2x2x32xf32, #tpu.memory_space<vmem>>, vector<1x2x32xf32>,
    %c1_74 = arith.constant 1 : index
    %c0_75 = arith.constant 0 : index
    %c0_76 = arith.constant 0 : index
    %344 = vector.load %arg7[%c1_74, %c0_75, %c0_76] : memref<2x2x32xf32, #tpu.memory_space<vmem>>, vector<1x2x32xf32>
    %345 = vector.shape_cast %344 : vector<1x2x32xf32> to vector<2x32xf32>
    %346 = vector.shape_cast %331 : vector<2x32xf32> to vector<1x2x32xf32>
    tpu.vector_store %arg7[%c1_74, %c0_75, %c0_76], %346 {strides = array<i32>} : memref<2x2x32xf32, #tpu.memory_space<vmem>>, vector<1x2x32xf32>,
    return
  }
}

</mosaic_0001>

<bundles_post_ra>
// kernel: encoder_forward.2
= control target key start
LH: loop header
LB: loop body
LE: loop exit
PB: predicated region body
PF: predicated region fallthrough
CT: control target
= control target key end

     0   :  { %v2505_v5 = vmov 0.0|0.0   ;;  %v2506_v8 = vmov 0.0   ;;  %vm2507_vm0 = vmmov 0   ;;  %s3059_s0 = inlined_call_operand.vmem [shape: f32[16,32], index: 0, kind: input, shape index: {}]   ;;  %s3060_s1 = inlined_call_operand.vmem [shape: f32[32,256], index: 1, kind: input, shape index: {}]   ;;  %s3061_s2 = inlined_call_operand.vmem [shape: f32[32,128], index: 2, kind: input, shape index: {}]   ;;  %s3062_s3 = inlined_call_operand.vmem [shape: f32[32,128], index: 3, kind: input, shape index: {}]   ;;  %s3063_s4 = inlined_call_operand.vmem [shape: f32[1,256], index: 4, kind: input, shape index: {}]   ;;  %s3064_s5 = inlined_call_operand.vmem [shape: f32[16,64], index: 5, kind: output, shape index: {0}]   ;;  %s3065_s6 = inlined_call_operand.hbm [shape: f32[2,2,32], index: 6, kind: output, shape index: {1}]   ;;  %s3066_s7 = inlined_call_operand.vmem [shape: f32[2,2,32], index: 7, kind: output, shape index: {2}]  }
   0x1   :  { %v27_v0 = vld [vmem:[%s3060_s1 + $0x8] sm:$0xff]  ;;  %v29_v1 = vld [vmem:[%s3060_s1 + $0x18] sm:$0xff]  ;;  %v26_v2 = vld [vmem:[%s3060_s1] sm:$0xff]  ;;  %2249 = vmatprep.subr.bf16.mxu1 %v2505_v5  ;;  %117 = vmatprep.mubr.f32.mxu0 %v2506_v8 }
   0x2   :  { %v2241_v3 = vpack.c.bf16 %v29_v1, %v27_v0  ;;  %v28_v4 = vld [vmem:[%s3060_s1 + $0x10] sm:$0xff]  ;;  %v130_v6 = vld [vmem:[%s3061_s2] sm:$0xff]  ;;  %v131_v7 = vld [vmem:[%s3061_s2 + $0x8] sm:$0xff]  ;;  %2073 = vmatprep.mubr.msk.f32.mxu1 %vm2507_vm0, %v2506_v8 }
   0x3   :  { %v2243_v9 = vpack.c.bf16 %v28_v4, %v26_v2  ;;  %v2573_v10 = vpack.c.bf16 %v131_v7, %v130_v6  ;;  %v31_v11 = vld [vmem:[%s3060_s1 + $0x28] sm:$0xff]  ;;  %v33_v12 = vld [vmem:[%s3060_s1 + $0x38] sm:$0xff]  ;;  %v30_v13 = vld [vmem:[%s3060_s1 + $0x20] sm:$0xff] }
   0x4   :  { %2242 = vmatprep.subr.bf16.mxu0 %v2241_v3  ;;  %v2245_v14 = vpack.c.bf16 %v33_v12, %v31_v11  ;;  %v32_v15 = vld [vmem:[%s3060_s1 + $0x30] sm:$0xff]  ;;  %v133_v17 = vld [vmem:[%s3061_s2 + $0x18] sm:$0xff]  ;;  %v134_v20 = vld [vmem:[%s3062_s3] sm:$0xff] }
   0x5   :  { %v132_v16 = vld [vmem:[%s3061_s2 + $0x10] sm:$0xff]  ;;  %2244 = vmatpush1.bf16.msra.mxu0 %v2243_v9  ;;  %2251 = vmatpush3.bf16.msra.mxu1 %v2573_v10  ;;  %v2247_v18 = vpack.c.bf16 %v32_v15, %v30_v13  ;;  %v135_v21 = vld [vmem:[%s3062_s3 + $0x8] sm:$0xff] }
   0x6   :  { %v2596_v19 = vpack.c.bf16 %v133_v17, %v132_v16  ;;  %2246 = vmatprep.subr.bf16.mxu0 %v2245_v14  ;;  %2252 = vmatprep.subr.bf16.mxu1 %v2505_v5 }
   0x7   :  { %13 = vsyncpa [#allocation3], 0  ;;  %v24_v22 = vld [vmem:[%s3059_s0] sm:$0xff]  ;;  %vm46_vm1 = vcmask 261120   ;;  %v2609_v23 = vpack.c.bf16 %v135_v21, %v134_v20  ;;  %v136_v24 = vld [vmem:[%s3062_s3 + $0x10] sm:$0xff]  ;;  %v36_v28 = vlaneseq  ;;  %s2509_s12 = smov 32  }
   0x8   :  { %v137_v25 = vld [vmem:[%s3062_s3 + $0x18] sm:$0xff]  ;;  %v25_v26 = vld [vmem:[%s3059_s0 + $0x8] sm:$0xff]  ;;  %v34_v31 = vld [vmem:[%s3063_s4] sm:$0x3]  ;;  %s2508_s4 = smov 64   ;;  %vm246_vm5 = vcmask 254976  }
   0x9   :  { %2248 = vmatpush1.bf16.msra.mxu0 %v2247_v18  ;;  %2254 = vmatpush3.bf16.msra.mxu1 %v2596_v19  ;;  %v2626_v27 = vpack.c.bf16 %v137_v25, %v136_v24  ;;  %v37_v29 = vshrl.u32 %v36_v28, 7  ;;  %v139_v54 = vand.u32 127, %v36_v28  ;;  %vm351_vm6 = vcmask 523526   ;;  %s2510_s17 = smov 96  }
   0xa   :  { %2255 = vmatprep.subr.bf16.mxu0 %v2505_v5  ;;  %2261 = vmatprep.subr.bf16.mxu1 %v2505_v5  ;;  %vm574_vm7 = vcmask 521476   ;;  %vm461_vm8 = vcmask 257026   ;;  %vm800_vm9 = vcmask 519426   ;;  %vm687_vm10 = vcmask 259076  }
   0xb   :  { %v38_v30 = vsub.s32 0, %v37_v29  ;;  %v42_v32 = vsub.s32 1, %v37_v29  ;;  %vm140_vm2 = vcmp.ge.s32.totalorder %v139_v54, 64  ;;  %vm141_vm3 = vcmp.lt.s32.totalorder %v139_v54, 96 }
   0xc   :  { %1952 = vmatmul.mubr.msk.f32.vlgmr.msra.gmra.mrb[0].mxu0 %vm46_vm1, %v24_v22  ;;  %2074 = vmatmul.mubr.f32.vlgmr.msra.gmra.mrb[0].mxu1 %v2506_v8  ;;  %vm2660_vm4 = vmand %vm140_vm2, %vm141_vm3  ;;  %vm1023_vm11 = vcmask 517376   ;;  %vm913_vm12 = vcmask 261126  }
   0xd   :  { %2257 = vmatpush3.bf16.msra.mxu0 %v2609_v23  ;;  %123 = vmatprep.mubr.f32.mxu0 %v2506_v8  ;;  %v39_v33 = vrot.slane %v34_v31, %v38_v30  ;;  %v43_v34 = vrot.slane %v34_v31, %v42_v32 }
   0xe   :  { %2258 = vmatprep.subr.bf16.mxu0 %v2505_v5  ;;  %2263 = vmatpush3.bf16.msra.mxu1 %v2573_v10 }
   0xf   :  { %2264 = vmatprep.subr.bf16.mxu1 %v2505_v5  ;;  %2095 = vmatprep.mubr.msk.f32.mxu1 %vm2507_vm0, %v2506_v8 }
  0x10   :  { %1953 = vmatmul.mubr.msk.f32.gmra.mrb[2].mxu0 %vm46_vm1, %v25_v26 }
  0x11   :  { %2260 = vmatpush3.bf16.msra.mxu0 %v2626_v27  ;;  %2084 = vmatprep.mubr.msk.f32.mxu0 %vm2507_vm0, %v2506_v8 }
  0x12   :  { %2266 = vmatpush3.bf16.msra.mxu1 %v2596_v19  ;;  %2267 = vmatprep.subr.bf16.mxu0 %v2505_v5 }
  0x13   :  { %2273 = vmatprep.subr.bf16.mxu1 %v2505_v5 }
  0x14   :  { %2085 = vmatmul.mubr.f32.vlgmr.msra.gmra.mrb[4].mxu0 %v2506_v8 }
  0x15   :  { %2269 = vmatpush3.bf16.msra.mxu0 %v2609_v23  ;;  %2106 = vmatprep.mubr.msk.f32.mxu0 %vm2507_vm0, %v2506_v8 }
  0x16   :  { %2270 = vmatprep.subr.bf16.mxu0 %v2505_v5 }
  0x19   :  { %2272 = vmatpush3.bf16.msra.mxu0 %v2626_v27 }
  0x1a   :  { %2279 = vmatprep.subr.bf16.mxu0 %v2505_v5 }
  0xdf   :  { %v119_v35 = vpop.f32.mrb[0].mxu0  ;;  %v212_v36 = vpop.f32.mrb[0].mxu1 }
  0xe0   :  { %v2650_v37 = vadd.f32 %v119_v35, %v39_v33  ;;  %v121_v38 = vpop.f32.mrb[1].mxu0  ;;  %v2075_v39 = vpop.f32.mrb[1].mxu1 }
  0xe1   :  { %v2652_v40 = vadd.f32 %v121_v38, %v43_v34 }
  0xe2   :  { %v216_v41 = vadd.f32 %v212_v36, %v2650_v37 }
  0xe3   :  { %v125_v42 = vpop.f32.mrb[2].mxu0 }
  0xe4   :  { %v1954_v43 = vmul.f32 -1.442695, %v216_v41  ;;  %v2655_v44 = vadd.f32 %v125_v42, %v39_v33  ;;  %v127_v45 = vpop.f32.mrb[3].mxu0 }
  0xe5   :  { %v2657_v47 = vadd.f32 %v127_v45, %v43_v34 }
  0xe6   :  { %2353 = vpow2.f32 %v1954_v43 }
  0xe7   :  { %v314_v46 = vpop.f32.mrb[4].mxu0 }
  0xe8   :  { %v319_v48 = vrot.slane %v314_v46, 2  ;;  %v2086_v49 = vpop.f32.mrb[5].mxu0 }
  0xea   :  { %v321_v50 = vadd.f32 %v319_v48, %v2657_v47 }
  0xec   :  { %v1955_v51 = vmul.f32 -1.442695, %v321_v50 }
  0xee   :  { %2355 = vpow2.f32 %v1955_v51 }
  0xef   :  { %2357 = vtanh.f32 %v216_v41 }
  0xf0   :  { %v2354_v52 = vpop.eup %2353 }
  0xf1   :  { %v221_v53 = vadd.f32 1.0, %v2354_v52 }
  0xf3   :  { %2359 = vrcp.f32 %v221_v53 }
  0xf4   :  { %2361 = vtanh.f32 %v321_v50 }
  0xf8   :  { %v2356_v55 = vpop.eup %2355 }
  0xf9   :  { %v326_v56 = vadd.f32 1.0, %v2356_v55  ;;  %v2358_v58 = vpop.eup %2357 }
  0xfb   :  { %2363 = vrcp.f32 %v326_v56 }
  0xfd   :  { %v2360_v59 = vpop.eup %2359 }
  0xfe   :  { %v224_v60 = vsel %vm2660_vm4, %v2358_v58, %v2360_v59  ;;  %v2362_v61 = vpop.eup %2361 }
  0xff   :  { %227 = vrot.lane.b32.xlu0 %v224_v60, %s2508_s4  ;;  %v225_v4 = vmul.f32 0.0, %v224_v60 }
 0x105   :  { %v2364_v62 = vpop.eup %2363 }
 0x106   :  { %v329_v63 = vsel %vm2660_vm4, %v2362_v61, %v2364_v62 }
 0x107   :  { %332 = vrot.lane.b32.xlu0 %v329_v63, %s2508_s4  ;;  %v330_v9 = vmul.f32 0.0, %v329_v63 }
 0x171   :  { %v228_v0 = vpop.permute.xlu0 %227 }
 0x172   :  { %v230_v1 = vmul.f32 %v228_v0, %v224_v60 }
 0x174   :  { %232 = vrot.lane.b32.xlu1 %v230_v1, %s2509_s12 }
 0x179   :  { %v333_v2 = vpop.permute.xlu0 %332 }
 0x17a   :  { %v335_v3 = vmul.f32 %v333_v2, %v329_v63 }
 0x17c   :  { %337 = vrot.lane.b32.xlu1 %v335_v3, %s2509_s12 }
 0x1e6   :  { %v233_v6 = vpop.permute.xlu1 %232 }
 0x1e7   :  { %v2672_v7 = vadd.f32 %v233_v6, %v225_v4 }
 0x1e9   :  { %2365 = vtanh.f32 %v2672_v7  ;;  %v438_v53 = vrot.slane %v2672_v7, 6 }
 0x1ee   :  { %v338_v11 = vpop.permute.xlu1 %337 }
 0x1ef   :  { %v2675_v12 = vadd.f32 %v338_v11, %v330_v9 }
 0x1f1   :  { %2367 = vtanh.f32 %v2675_v12  ;;  %v551_v58 = vrot.slane %v2675_v12, 2 }
 0x1f3   :  { %v2366_v13 = vpop.eup %2365 }
 0x1f4   :  { %238 = vrot.lane.b32.xlu0 %v2366_v13, %s2508_s4 }
 0x1fb   :  { %v2368_v14 = vpop.eup %2367 }
 0x1fc   :  { %343 = vrot.lane.b32.xlu1 %v2368_v14, %s2508_s4 }
 0x266   :  { %v239_v15 = vpop.permute.xlu0 %238 }
 0x267   :  { %v241_v16 = vmul.f32 %v239_v15, %v224_v60 }
 0x269   :  { %243 = vrot.lane.b32.xlu0 %v241_v16, %s2509_s12 }
 0x26e   :  { %v344_v17 = vpop.permute.xlu1 %343 }
 0x26f   :  { %v2681_v18 = vmul.f32 %v344_v17, %v329_v63 }
 0x271   :  { %v463_v20 = vrot.slane %v2681_v18, 6 }
 0x273   :  { %464 = vrot.lane.b32.xlu1 %v463_v20, %s2509_s12 }
 0x2db   :  { %v244_v21 = vpop.permute.xlu0 %243 }
 0x2dc   :  { %247 = vst.msk [vmem:[%s3064_s5] sm:$0x3] %vm246_vm5, %v244_v21  ;;  %2096 = vmatmul.mubr.msk.f32.vlgmr.msra.gmra.mrb[2].mxu1 %vm46_vm1, %v244_v21 }
 0x2dd   :  { %2275 = vmatpush3.bf16.msra.mxu1 %v2573_v10  ;;  %2117 = vmatprep.mubr.msk.f32.mxu1 %vm2507_vm0, %v2506_v8 }
 0x2de   :  { %2276 = vmatprep.subr.bf16.mxu1 %v2505_v5 }
 0x2e1   :  { %2278 = vmatpush3.bf16.msra.mxu1 %v2596_v19 }
 0x2e2   :  { %2285 = vmatprep.subr.bf16.mxu1 %v2505_v5 }
 0x2e5   :  { %v465_v22 = vpop.permute.xlu1 %464 }
 0x2e6   :  { %2107 = vmatmul.mubr.msk.f32.vlgmr.msra.gmra.mrb[6].mxu0 %vm46_vm1, %v465_v22 }
 0x2e7   :  { %2281 = vmatpush3.bf16.msra.mxu0 %v2609_v23  ;;  %2128 = vmatprep.mubr.msk.f32.mxu0 %vm2507_vm0, %v2506_v8 }
 0x2e8   :  { %2282 = vmatprep.subr.bf16.mxu0 %v2505_v5 }
 0x2eb   :  { %2284 = vmatpush3.bf16.msra.mxu0 %v2626_v27 }
 0x2ec   :  { %2291 = vmatprep.subr.bf16.mxu0 %v2505_v5 }
 0x3af   :  { %v421_v24 = vpop.f32.mrb[2].mxu1 }
 0x3b0   :  { %v426_v25 = vrot.slane %v421_v24, 6  ;;  %v2097_v26 = vpop.f32.mrb[3].mxu1 }
 0x3b2   :  { %v428_v28 = vadd.f32 %v426_v25, %v2650_v37 }
 0x3b4   :  { %v1957_v29 = vmul.f32 -1.442695, %v428_v28 }
 0x3b6   :  { %2369 = vpow2.f32 %v1957_v29 }
 0x3b9   :  { %v534_v30 = vpop.f32.mrb[6].mxu0 }
 0x3ba   :  { %v539_v31 = vrot.slane %v534_v30, 4  ;;  %v2108_v32 = vpop.f32.mrb[7].mxu0 }
 0x3bc   :  { %v541_v33 = vadd.f32 %v539_v31, %v2657_v47 }
 0x3be   :  { %v1959_v34 = vmul.f32 -1.442695, %v541_v33 }
 0x3c0   :  { %v2370_v35 = vpop.eup %2369  ;;  %2371 = vpow2.f32 %v1959_v34 }
 0x3c1   :  { %v433_v36 = vadd.f32 1.0, %v2370_v35  ;;  %2373 = vtanh.f32 %v428_v28 }
 0x3c3   :  { %2375 = vrcp.f32 %v433_v36 }
 0x3c4   :  { %2377 = vtanh.f32 %v541_v33 }
 0x3ca   :  { %v2372_v38 = vpop.eup %2371 }
 0x3cb   :  { %v546_v39 = vadd.f32 1.0, %v2372_v38  ;;  %v2374_v41 = vpop.eup %2373 }
 0x3cd   :  { %v2376_v42 = vpop.eup %2375  ;;  %2379 = vrcp.f32 %v546_v39 }
 0x3ce   :  { %v436_v43 = vsel %vm2660_vm4, %v2374_v41, %v2376_v42  ;;  %v2378_v45 = vpop.eup %2377 }
 0x3cf   :  { %442 = vrot.lane.b32.xlu0 %v436_v43, %s2508_s4  ;;  %v440_v54 = vmul.f32 %v438_v53, %v436_v43 }
 0x3d7   :  { %v2380_v46 = vpop.eup %2379 }
 0x3d8   :  { %v549_v48 = vsel %vm2660_vm4, %v2378_v45, %v2380_v46 }
 0x3d9   :  { %555 = vrot.lane.b32.xlu1 %v549_v48, %s2508_s4  ;;  %v553_v59 = vmul.f32 %v551_v58, %v549_v48 }
 0x441   :  { %v443_v49 = vpop.permute.xlu0 %442 }
 0x442   :  { %v445_v50 = vmul.f32 %v443_v49, %v436_v43 }
 0x444   :  { %447 = vrot.lane.b32.xlu0 %v445_v50, %s2509_s12 }
 0x44b   :  { %v556_v51 = vpop.permute.xlu1 %555 }
 0x44c   :  { %v558_v52 = vmul.f32 %v556_v51, %v549_v48 }
 0x44e   :  { %560 = vrot.lane.b32.xlu1 %v558_v52, %s2509_s12 }
 0x4b6   :  { %v448_v55 = vpop.permute.xlu0 %447 }
 0x4b7   :  { %v2714_v56 = vadd.f32 %v448_v55, %v440_v54 }
 0x4b9   :  { %2381 = vtanh.f32 %v2714_v56  ;;  %v664_v41 = vrot.slane %v2714_v56, 6 }
 0x4c0   :  { %v561_v60 = vpop.permute.xlu1 %560 }
 0x4c1   :  { %v2718_v61 = vadd.f32 %v561_v60, %v553_v59 }
 0x4c3   :  { %v2382_v62 = vpop.eup %2381  ;;  %2383 = vtanh.f32 %v2718_v61  ;;  %v777_v46 = vrot.slane %v2718_v61, 2 }
 0x4c4   :  { %453 = vrot.lane.b32.xlu0 %v2382_v62, %s2508_s4 }
 0x4cd   :  { %v2384_v63 = vpop.eup %2383 }
 0x4ce   :  { %566 = vrot.lane.b32.xlu1 %v2384_v63, %s2508_s4 }
 0x536   :  { %v454_v0 = vpop.permute.xlu0 %453 }
 0x537   :  { %v2723_v1 = vmul.f32 %v454_v0, %v436_v43 }
 0x539   :  { %v576_v2 = vrot.slane %v2723_v1, 2 }
 0x53b   :  { %577 = vrot.lane.b32.xlu0 %v576_v2, %s2509_s12 }
 0x540   :  { %v567_v3 = vpop.permute.xlu1 %566 }
 0x541   :  { %v2727_v4 = vmul.f32 %v567_v3, %v549_v48 }
 0x543   :  { %v689_v6 = vrot.slane %v2727_v4, 4 }
 0x545   :  { %690 = vrot.lane.b32.xlu1 %v689_v6, %s2509_s12 }
 0x5ad   :  { %v578_v7 = vpop.permute.xlu0 %577 }
 0x5ae   :  { %2118 = vmatmul.mubr.msk.f32.vlgmr.msra.gmra.mrb[4].mxu1 %vm46_vm1, %v578_v7 }
 0x5af   :  { %2287 = vmatpush3.bf16.msra.mxu1 %v2573_v10  ;;  %2139 = vmatprep.mubr.msk.f32.mxu1 %vm2507_vm0, %v2506_v8 }
 0x5b0   :  { %2288 = vmatprep.subr.bf16.mxu1 %v2505_v5 }
 0x5b3   :  { %2290 = vmatpush3.bf16.msra.mxu1 %v2596_v19 }
 0x5b4   :  { %2297 = vmatprep.subr.bf16.mxu1 %v2505_v5 }
 0x5b7   :  { %v691_v9 = vpop.permute.xlu1 %690 }
 0x5b8   :  { %2129 = vmatmul.mubr.msk.f32.vlgmr.msra.gmra.mrb[8].mxu0 %vm46_vm1, %v691_v9 }
 0x5b9   :  { %2293 = vmatpush3.bf16.msra.mxu0 %v2609_v23  ;;  %2150 = vmatprep.mubr.msk.f32.mxu0 %vm2507_vm0, %v2506_v8 }
 0x5ba   :  { %2294 = vmatprep.subr.bf16.mxu0 %v2505_v5 }
 0x5bd   :  { %2296 = vmatpush3.bf16.msra.mxu0 %v2626_v27 }
 0x5be   :  { %2303 = vmatprep.subr.bf16.mxu0 %v2505_v5 }
 0x681   :  { %v647_v11 = vpop.f32.mrb[4].mxu1 }
 0x682   :  { %v652_v12 = vrot.slane %v647_v11, 4  ;;  %v2119_v13 = vpop.f32.mrb[5].mxu1 }
 0x684   :  { %v654_v14 = vadd.f32 %v652_v12, %v2650_v37 }
 0x686   :  { %v1961_v15 = vmul.f32 -1.442695, %v654_v14 }
 0x688   :  { %2385 = vpow2.f32 %v1961_v15 }
 0x68b   :  { %v760_v16 = vpop.f32.mrb[8].mxu0 }
 0x68c   :  { %v765_v17 = vrot.slane %v760_v16, 6  ;;  %v2130_v20 = vpop.f32.mrb[9].mxu0 }
 0x68e   :  { %v767_v21 = vadd.f32 %v765_v17, %v2657_v47 }
 0x690   :  { %v1963_v22 = vmul.f32 -1.442695, %v767_v21 }
 0x692   :  { %v2386_v24 = vpop.eup %2385  ;;  %2387 = vpow2.f32 %v1963_v22 }
 0x693   :  { %v659_v25 = vadd.f32 1.0, %v2386_v24  ;;  %2389 = vtanh.f32 %v654_v14 }
 0x695   :  { %2391 = vrcp.f32 %v659_v25 }
 0x696   :  { %2393 = vtanh.f32 %v767_v21 }
 0x69c   :  { %v2388_v26 = vpop.eup %2387 }
 0x69d   :  { %v772_v28 = vadd.f32 1.0, %v2388_v26  ;;  %v2390_v29 = vpop.eup %2389 }
 0x69f   :  { %v2392_v30 = vpop.eup %2391  ;;  %2395 = vrcp.f32 %v772_v28 }
 0x6a0   :  { %v662_v31 = vsel %vm2660_vm4, %v2390_v29, %v2392_v30  ;;  %v2394_v32 = vpop.eup %2393 }
 0x6a1   :  { %668 = vrot.lane.b32.xlu0 %v662_v31, %s2508_s4  ;;  %v666_v42 = vmul.f32 %v664_v41, %v662_v31 }
 0x6a9   :  { %v2396_v33 = vpop.eup %2395 }
 0x6aa   :  { %v775_v34 = vsel %vm2660_vm4, %v2394_v32, %v2396_v33 }
 0x6ab   :  { %781 = vrot.lane.b32.xlu1 %v775_v34, %s2508_s4  ;;  %v779_v48 = vmul.f32 %v777_v46, %v775_v34 }
 0x713   :  { %v669_v35 = vpop.permute.xlu0 %668 }
 0x714   :  { %v671_v36 = vmul.f32 %v669_v35, %v662_v31 }
 0x716   :  { %673 = vrot.lane.b32.xlu0 %v671_v36, %s2509_s12 }
 0x71d   :  { %v782_v38 = vpop.permute.xlu1 %781 }
 0x71e   :  { %v784_v39 = vmul.f32 %v782_v38, %v775_v34 }
 0x720   :  { %786 = vrot.lane.b32.xlu1 %v784_v39, %s2509_s12 }
 0x788   :  { %v674_v43 = vpop.permute.xlu0 %673 }
 0x789   :  { %v2756_v45 = vadd.f32 %v674_v43, %v666_v42 }
 0x78b   :  { %2397 = vtanh.f32 %v2756_v45  ;;  %v890_v28 = vrot.slane %v2756_v45, 6 }
 0x792   :  { %v787_v49 = vpop.permute.xlu1 %786 }
 0x793   :  { %v2760_v50 = vadd.f32 %v787_v49, %v779_v48 }
 0x795   :  { %v2398_v51 = vpop.eup %2397  ;;  %2399 = vtanh.f32 %v2760_v50  ;;  %v1000_v32 = vrot.slane %v2760_v50, 2 }
 0x796   :  { %679 = vrot.lane.b32.xlu0 %v2398_v51, %s2508_s4 }
 0x79f   :  { %v2400_v52 = vpop.eup %2399 }
 0x7a0   :  { %792 = vrot.lane.b32.xlu1 %v2400_v52, %s2508_s4 }
 0x808   :  { %v680_v53 = vpop.permute.xlu0 %679 }
 0x809   :  { %v2765_v54 = vmul.f32 %v680_v53, %v662_v31 }
 0x80b   :  { %v802_v55 = vrot.slane %v2765_v54, 4 }
 0x80d   :  { %803 = vrot.lane.b32.xlu0 %v802_v55, %s2509_s12 }
 0x812   :  { %v793_v56 = vpop.permute.xlu1 %792 }
 0x813   :  { %v2769_v58 = vmul.f32 %v793_v56, %v775_v34 }
 0x815   :  { %v915_v59 = vrot.slane %v2769_v58, 2 }
 0x817   :  { %916 = vrot.lane.b32.xlu1 %v915_v59, %s2509_s12 }
 0x87f   :  { %v804_v60 = vpop.permute.xlu0 %803 }
 0x880   :  { %2140 = vmatmul.mubr.msk.f32.vlgmr.msra.gmra.mrb[6].mxu1 %vm46_vm1, %v804_v60 }
 0x881   :  { %2299 = vmatpush3.bf16.msra.mxu1 %v2573_v10  ;;  %2161 = vmatprep.mubr.msk.f32.mxu1 %vm2507_vm0, %v2506_v8 }
 0x882   :  { %2300 = vmatprep.subr.bf16.mxu1 %v2505_v5 }
 0x885   :  { %2302 = vmatpush3.bf16.msra.mxu1 %v2596_v19 }
 0x886   :  { %2309 = vmatprep.subr.bf16.mxu1 %v2505_v5 }
 0x889   :  { %v917_v61 = vpop.permute.xlu1 %916 }
 0x88a   :  { %2151 = vmatmul.mubr.msk.f32.vlgmr.msra.gmra.mrb[10].mxu0 %vm46_vm1, %v917_v61 }
 0x88b   :  { %2305 = vmatpush3.bf16.msra.mxu0 %v2609_v23  ;;  %2172 = vmatprep.mubr.msk.f32.mxu0 %vm2507_vm0, %v2506_v8 }
 0x88c   :  { %2306 = vmatprep.subr.bf16.mxu0 %v2505_v5 }
 0x88f   :  { %2308 = vmatpush3.bf16.msra.mxu0 %v2626_v27 }
 0x890   :  { %2315 = vmatprep.subr.bf16.mxu0 %v2505_v5 }
 0x953   :  { %v873_v62 = vpop.f32.mrb[6].mxu1 }
 0x954   :  { %v878_v63 = vrot.slane %v873_v62, 2  ;;  %v2141_v0 = vpop.f32.mrb[7].mxu1 }
 0x956   :  { %v880_v2 = vadd.f32 %v878_v63, %v2650_v37 }
 0x958   :  { %v1965_v3 = vmul.f32 -1.442695, %v880_v2 }
 0x95a   :  { %2401 = vpow2.f32 %v1965_v3 }
 0x95d   :  { %v986_v6 = vpop.f32.mrb[10].mxu0 }
 0x95e   :  { %v990_v7 = vadd.f32 %v986_v6, %v2657_v47  ;;  %v2152_v9 = vpop.f32.mrb[11].mxu0 }
 0x960   :  { %v1967_v11 = vmul.f32 -1.442695, %v990_v7 }
 0x962   :  { %2403 = vpow2.f32 %v1967_v11 }
 0x963   :  { %2405 = vtanh.f32 %v880_v2 }
 0x964   :  { %v2402_v12 = vpop.eup %2401 }
 0x965   :  { %v885_v13 = vadd.f32 1.0, %v2402_v12 }
 0x967   :  { %2407 = vrcp.f32 %v885_v13 }
 0x968   :  { %2409 = vtanh.f32 %v990_v7 }
 0x96c   :  { %v2404_v14 = vpop.eup %2403 }
 0x96d   :  { %v995_v15 = vadd.f32 1.0, %v2404_v14  ;;  %v2406_v16 = vpop.eup %2405 }
 0x96f   :  { %2411 = vrcp.f32 %v995_v15 }
 0x971   :  { %v2408_v17 = vpop.eup %2407 }
 0x972   :  { %v888_v37 = vsel %vm2660_vm4, %v2406_v16, %v2408_v17  ;;  %v2410_v20 = vpop.eup %2409 }
 0x973   :  { %894 = vrot.lane.b32.xlu0 %v888_v37, %s2508_s4  ;;  %v892_v29 = vmul.f32 %v890_v28, %v888_v37 }
 0x979   :  { %v2412_v47 = vpop.eup %2411 }
 0x97a   :  { %v998_v21 = vsel %vm2660_vm4, %v2410_v20, %v2412_v47 }
 0x97b   :  { %1004 = vrot.lane.b32.xlu1 %v998_v21, %s2508_s4  ;;  %v1002_v33 = vmul.f32 %v1000_v32, %v998_v21 }
 0x9e5   :  { %v895_v22 = vpop.permute.xlu0 %894 }
 0x9e6   :  { %v897_v24 = vmul.f32 %v895_v22, %v888_v37 }
 0x9e8   :  { %899 = vrot.lane.b32.xlu0 %v897_v24, %s2509_s12 }
 0x9ed   :  { %v1005_v25 = vpop.permute.xlu1 %1004 }
 0x9ee   :  { %v1007_v26 = vmul.f32 %v1005_v25, %v998_v21 }
 0x9f0   :  { %1009 = vrot.lane.b32.xlu1 %v1007_v26, %s2509_s12 }
 0xa5a   :  { %v900_v30 = vpop.permute.xlu0 %899 }
 0xa5b   :  { %v2798_v31 = vadd.f32 %v900_v30, %v892_v29 }
 0xa5d   :  { %2413 = vtanh.f32 %v2798_v31  ;;  %v1110_v16 = vrot.slane %v2798_v31, 6 }
 0xa62   :  { %v1010_v34 = vpop.permute.xlu1 %1009 }
 0xa63   :  { %v2802_v35 = vadd.f32 %v1010_v34, %v1002_v33 }
 0xa65   :  { %2415 = vtanh.f32 %v2802_v35  ;;  %v1221_v47 = vrot.slane %v2802_v35, 2 }
 0xa67   :  { %v2414_v36 = vpop.eup %2413 }
 0xa68   :  { %905 = vrot.lane.b32.xlu0 %v2414_v36, %s2508_s4 }
 0xa6f   :  { %v2416_v38 = vpop.eup %2415 }
 0xa70   :  { %1015 = vrot.lane.b32.xlu1 %v2416_v38, %s2508_s4 }
 0xada   :  { %v906_v39 = vpop.permute.xlu0 %905 }
 0xadb   :  { %v2807_v41 = vmul.f32 %v906_v39, %v888_v37 }
 0xadd   :  { %v1025_v42 = vrot.slane %v2807_v41, 6 }
 0xadf   :  { %1026 = vrot.lane.b32.xlu1 %v1025_v42, %s2509_s12 }
 0xae2   :  { %v1016_v43 = vpop.permute.xlu1 %1015 }
 0xae3   :  { %v2811_v45 = vmul.f32 %v1016_v43, %v998_v21 }
 0xae5   :  { %1134 = vrot.lane.b32.xlu0 %v2811_v45, %s2509_s12 }
 0xb51   :  { %v1027_v46 = vpop.permute.xlu1 %1026 }
 0xb52   :  { %2162 = vmatmul.mubr.msk.f32.vlgmr.msra.gmra.mrb[8].mxu1 %vm46_vm1, %v1027_v46 }
 0xb53   :  { %2311 = vmatpush3.bf16.msra.mxu1 %v2573_v10  ;;  %2183 = vmatprep.mubr.msk.f32.mxu1 %vm2507_vm0, %v2506_v8 }
 0xb54   :  { %2312 = vmatprep.subr.bf16.mxu1 %v2505_v5 }
 0xb57   :  { %v1135_v48 = vpop.permute.xlu0 %1134  ;;  %2314 = vmatpush3.bf16.msra.mxu1 %v2596_v19 }
 0xb58   :  { %2173 = vmatmul.mubr.msk.f32.vlgmr.msra.gmra.mrb[12].mxu0 %vm46_vm1, %v1135_v48  ;;  %2321 = vmatprep.subr.bf16.mxu1 %v2505_v5 }
 0xb59   :  { %2317 = vmatpush3.bf16.msra.mxu0 %v2609_v23  ;;  %2194 = vmatprep.mubr.msk.f32.mxu0 %vm2507_vm0, %v2506_v8 }
 0xb5a   :  { %2318 = vmatprep.subr.bf16.mxu0 %v2505_v5 }
 0xb5d   :  { %2320 = vmatpush3.bf16.msra.mxu0 %v2626_v27 }
 0xb5e   :  { %2327 = vmatprep.subr.bf16.mxu0 %v2505_v5 }
 0xc25   :  { %v1096_v49 = vpop.f32.mrb[8].mxu1 }
 0xc26   :  { %v1100_v50 = vadd.f32 %v1096_v49, %v2655_v44  ;;  %v2163_v51 = vpop.f32.mrb[9].mxu1 }
 0xc28   :  { %v1969_v52 = vmul.f32 -1.442695, %v1100_v50 }
 0xc2a   :  { %2417 = vpow2.f32 %v1969_v52 }
 0xc2b   :  { %v1204_v53 = vpop.f32.mrb[12].mxu0 }
 0xc2c   :  { %v1209_v55 = vrot.slane %v1204_v53, 2  ;;  %v2174_v56 = vpop.f32.mrb[13].mxu0 }
 0xc2e   :  { %v1211_v59 = vadd.f32 %v1209_v55, %v2652_v40 }
 0xc30   :  { %v1971_v60 = vmul.f32 -1.442695, %v1211_v59 }
 0xc32   :  { %2419 = vpow2.f32 %v1971_v60 }
 0xc33   :  { %2421 = vtanh.f32 %v1100_v50 }
 0xc34   :  { %v2418_v61 = vpop.eup %2417 }
 0xc35   :  { %v1105_v62 = vadd.f32 1.0, %v2418_v61 }
 0xc37   :  { %2423 = vrcp.f32 %v1105_v62 }
 0xc38   :  { %2425 = vtanh.f32 %v1211_v59 }
 0xc3c   :  { %v2420_v63 = vpop.eup %2419 }
 0xc3d   :  { %v1216_v0 = vadd.f32 1.0, %v2420_v63  ;;  %v2422_v2 = vpop.eup %2421 }
 0xc3f   :  { %2427 = vrcp.f32 %v1216_v0 }
 0xc41   :  { %v2424_v3 = vpop.eup %2423 }
 0xc42   :  { %v1108_v6 = vsel %vm2660_vm4, %v2422_v2, %v2424_v3  ;;  %v2426_v7 = vpop.eup %2425 }
 0xc43   :  { %1114 = vrot.lane.b32.xlu0 %v1108_v6, %s2508_s4  ;;  %v1112_v17 = vmul.f32 %v1110_v16, %v1108_v6 }
 0xc49   :  { %v2428_v9 = vpop.eup %2427 }
 0xc4a   :  { %v1219_v11 = vsel %vm2660_vm4, %v2426_v7, %v2428_v9 }
 0xc4b   :  { %1225 = vrot.lane.b32.xlu1 %v1219_v11, %s2508_s4  ;;  %v1223_v21 = vmul.f32 %v1221_v47, %v1219_v11 }
 0xcb5   :  { %v1115_v12 = vpop.permute.xlu0 %1114 }
 0xcb6   :  { %v1117_v13 = vmul.f32 %v1115_v12, %v1108_v6 }
 0xcb8   :  { %1119 = vrot.lane.b32.xlu0 %v1117_v13, %s2509_s12 }
 0xcbd   :  { %v1226_v14 = vpop.permute.xlu1 %1225 }
 0xcbe   :  { %v1228_v15 = vmul.f32 %v1226_v14, %v1219_v11 }
 0xcc0   :  { %1230 = vrot.lane.b32.xlu1 %v1228_v15, %s2509_s12 }
 0xd2a   :  { %v1120_v37 = vpop.permute.xlu0 %1119 }
 0xd2b   :  { %v2840_v20 = vadd.f32 %v1120_v37, %v1112_v17 }
 0xd2d   :  { %2429 = vtanh.f32 %v2840_v20  ;;  %v1330_v7 = vrot.slane %v2840_v20, 6 }
 0xd32   :  { %v1231_v22 = vpop.permute.xlu1 %1230 }
 0xd33   :  { %v2844_v24 = vadd.f32 %v1231_v22, %v1223_v21 }
 0xd35   :  { %2431 = vtanh.f32 %v2844_v24  ;;  %v1442_v13 = vrot.slane %v2844_v24, 2 }
 0xd37   :  { %v2430_v25 = vpop.eup %2429 }
 0xd38   :  { %1125 = vrot.lane.b32.xlu0 %v2430_v25, %s2508_s4 }
 0xd3f   :  { %v2432_v26 = vpop.eup %2431 }
 0xd40   :  { %1236 = vrot.lane.b32.xlu1 %v2432_v26, %s2508_s4 }
 0xdaa   :  { %v1126_v28 = vpop.permute.xlu0 %1125 }
 0xdab   :  { %v1128_v29 = vmul.f32 %v1126_v28, %v1108_v6 }
 0xdad   :  { %1130 = vrot.lane.b32.xlu0 %v1128_v29, %s2509_s12 }
 0xdb2   :  { %v1237_v30 = vpop.permute.xlu1 %1236 }
 0xdb3   :  { %v2850_v31 = vmul.f32 %v1237_v30, %v1219_v11 }
 0xdb5   :  { %v1354_v32 = vrot.slane %v2850_v31, 6 }
 0xdb7   :  { %1355 = vrot.lane.b32.xlu1 %v1354_v32, %s2509_s12 }
 0xe1f   :  { %v2854_v33 = vpop.permute.xlu0 %1130 }
 0xe20   :  { %2184 = vmatmul.mubr.msk.f32.vlgmr.msra.gmra.mrb[10].mxu1 %vm46_vm1, %v2854_v33 }
 0xe21   :  { %2323 = vmatpush3.bf16.msra.mxu1 %v2573_v10  ;;  %2205 = vmatprep.mubr.msk.f32.mxu1 %vm2507_vm0, %v2506_v8 }
 0xe22   :  { %2324 = vmatprep.subr.bf16.mxu1 %v2505_v5 }
 0xe25   :  { %2326 = vmatpush3.bf16.msra.mxu1 %v2596_v19 }
 0xe26   :  { %2333 = vmatprep.subr.bf16.mxu1 %v2505_v5 }
 0xe29   :  { %v1356_v34 = vpop.permute.xlu1 %1355 }
 0xe2a   :  { %2195 = vmatmul.mubr.msk.f32.vlgmr.msra.gmra.mrb[14].mxu0 %vm46_vm1, %v1356_v34 }
 0xe2b   :  { %2329 = vmatpush3.bf16.msra.mxu0 %v2609_v23  ;;  %2216 = vmatprep.mubr.msk.f32.mxu0 %vm2507_vm0, %v2506_v8 }
 0xe2c   :  { %2330 = vmatprep.subr.bf16.mxu0 %v2505_v5 }
 0xe2f   :  { %2332 = vmatpush3.bf16.msra.mxu0 %v2626_v27 }
 0xe30   :  { %2339 = vmatprep.subr.bf16.mxu0 %v2505_v5 }
 0xef3   :  { %v1313_v35 = vpop.f32.mrb[10].mxu1 }
 0xef4   :  { %v1318_v36 = vrot.slane %v1313_v35, 6  ;;  %v2185_v38 = vpop.f32.mrb[11].mxu1 }
 0xef6   :  { %v1320_v39 = vadd.f32 %v1318_v36, %v2655_v44 }
 0xef8   :  { %v1973_v42 = vmul.f32 -1.442695, %v1320_v39 }
 0xefa   :  { %2433 = vpow2.f32 %v1973_v42 }
 0xefd   :  { %v1425_v43 = vpop.f32.mrb[14].mxu0 }
 0xefe   :  { %v1430_v46 = vrot.slane %v1425_v43, 4  ;;  %v2196_v48 = vpop.f32.mrb[15].mxu0 }
 0xf00   :  { %v1432_v49 = vadd.f32 %v1430_v46, %v2652_v40 }
 0xf02   :  { %v1975_v50 = vmul.f32 -1.442695, %v1432_v49 }
 0xf04   :  { %v2434_v51 = vpop.eup %2433  ;;  %2435 = vpow2.f32 %v1975_v50 }
 0xf05   :  { %v1325_v52 = vadd.f32 1.0, %v2434_v51  ;;  %2437 = vtanh.f32 %v1320_v39 }
 0xf07   :  { %2439 = vrcp.f32 %v1325_v52 }
 0xf08   :  { %2441 = vtanh.f32 %v1432_v49 }
 0xf0e   :  { %v2436_v53 = vpop.eup %2435 }
 0xf0f   :  { %v1437_v55 = vadd.f32 1.0, %v2436_v53  ;;  %v2438_v56 = vpop.eup %2437 }
 0xf11   :  { %v2440_v59 = vpop.eup %2439  ;;  %2443 = vrcp.f32 %v1437_v55 }
 0xf12   :  { %v1328_v60 = vsel %vm2660_vm4, %v2438_v56, %v2440_v59  ;;  %v2442_v61 = vpop.eup %2441 }
 0xf13   :  { %1334 = vrot.lane.b32.xlu0 %v1328_v60, %s2508_s4  ;;  %v1332_v9 = vmul.f32 %v1330_v7, %v1328_v60 }
 0xf1b   :  { %v2444_v62 = vpop.eup %2443 }
 0xf1c   :  { %v1440_v63 = vsel %vm2660_vm4, %v2442_v61, %v2444_v62 }
 0xf1d   :  { %1446 = vrot.lane.b32.xlu1 %v1440_v63, %s2508_s4  ;;  %v1444_v14 = vmul.f32 %v1442_v13, %v1440_v63 }
 0xf85   :  { %v1335_v0 = vpop.permute.xlu0 %1334 }
 0xf86   :  { %v1337_v2 = vmul.f32 %v1335_v0, %v1328_v60 }
 0xf88   :  { %1339 = vrot.lane.b32.xlu0 %v1337_v2, %s2509_s12 }
 0xf8f   :  { %v1447_v3 = vpop.permute.xlu1 %1446 }
 0xf90   :  { %v1449_v6 = vmul.f32 %v1447_v3, %v1440_v63 }
 0xf92   :  { %1451 = vrot.lane.b32.xlu1 %v1449_v6, %s2509_s12 }
 0xffa   :  { %v1340_v11 = vpop.permute.xlu0 %1339 }
 0xffb   :  { %v2882_v12 = vadd.f32 %v1340_v11, %v1332_v9 }
 0xffd   :  { %2445 = vtanh.f32 %v2882_v12  ;;  %v1554_v56 = vrot.slane %v2882_v12, 6 }
0x1004   :  { %v1452_v15 = vpop.permute.xlu1 %1451 }
0x1005   :  { %v2886_v16 = vadd.f32 %v1452_v15, %v1444_v14 }
0x1007   :  { %v2446_v17 = vpop.eup %2445  ;;  %2447 = vtanh.f32 %v2886_v16  ;;  %v1666_v62 = vrot.slane %v2886_v16, 2 }
0x1008   :  { %1345 = vrot.lane.b32.xlu0 %v2446_v17, %s2508_s4 }
0x1011   :  { %v2448_v37 = vpop.eup %2447 }
0x1012   :  { %1457 = vrot.lane.b32.xlu1 %v2448_v37, %s2508_s4 }
0x107a   :  { %v1346_v20 = vpop.permute.xlu0 %1345 }
0x107b   :  { %v2891_v47 = vmul.f32 %v1346_v20, %v1328_v60 }
0x107d   :  { %v1466_v21 = vrot.slane %v2891_v47, 2 }
0x107f   :  { %1467 = vrot.lane.b32.xlu0 %v1466_v21, %s2509_s12 }
0x1084   :  { %v1458_v22 = vpop.permute.xlu1 %1457 }
0x1085   :  { %v2895_v24 = vmul.f32 %v1458_v22, %v1440_v63 }
0x1087   :  { %v1578_v25 = vrot.slane %v2895_v24, 4 }
0x1089   :  { %1579 = vrot.lane.b32.xlu1 %v1578_v25, %s2509_s12 }
0x10f1   :  { %v1468_v26 = vpop.permute.xlu0 %1467 }
0x10f2   :  { %2206 = vmatmul.mubr.msk.f32.vlgmr.msra.gmra.mrb[12].mxu1 %vm46_vm1, %v1468_v26 }
0x10f3   :  { %2335 = vmatpush3.bf16.msra.mxu1 %v2573_v10  ;;  %2227 = vmatprep.mubr.msk.f32.mxu1 %vm2507_vm0, %v2506_v8 }
0x10f4   :  { %2336 = vmatprep.subr.bf16.mxu1 %v2505_v5 }
0x10f7   :  { %2338 = vmatpush3.bf16.msra.mxu1 %v2596_v19 }
0x10fb   :  { %v1580_v28 = vpop.permute.xlu1 %1579 }
0x10fc   :  { %2217 = vmatmul.mubr.msk.f32.vlgmr.msra.gmra.mrb[16].mxu0 %vm46_vm1, %v1580_v28 }
0x10fd   :  { %2341 = vmatpush3.bf16.msra.mxu0 %v2609_v23  ;;  %2238 = vmatprep.mubr.msk.f32.mxu0 %vm2507_vm0, %v2506_v8 }
0x10fe   :  { %2342 = vmatprep.subr.bf16.mxu0 %v2505_v5 }
0x1101   :  { %2344 = vmatpush3.bf16.msra.mxu0 %v2626_v27 }
0x11c5   :  { %v1537_v10 = vpop.f32.mrb[12].mxu1 }
0x11c6   :  { %v1542_v29 = vrot.slane %v1537_v10, 4  ;;  %v2207_v30 = vpop.f32.mrb[13].mxu1 }
0x11c8   :  { %v1544_v32 = vadd.f32 %v1542_v29, %v2655_v44 }
0x11ca   :  { %v1977_v34 = vmul.f32 -1.442695, %v1544_v32 }
0x11cc   :  { %2449 = vpow2.f32 %v1977_v34 }
0x11cf   :  { %v1649_v19 = vpop.f32.mrb[16].mxu0 }
0x11d0   :  { %v1654_v35 = vrot.slane %v1649_v19, 6  ;;  %v2218_v36 = vpop.f32.mrb[17].mxu0 }
0x11d2   :  { %v1656_v38 = vadd.f32 %v1654_v35, %v2652_v40 }
0x11d4   :  { %v1979_v23 = vmul.f32 -1.442695, %v1656_v38 }
0x11d6   :  { %v2450_v39 = vpop.eup %2449  ;;  %2451 = vpow2.f32 %v1979_v23 }
0x11d7   :  { %v1549_v8 = vadd.f32 1.0, %v2450_v39  ;;  %2453 = vtanh.f32 %v1544_v32 }
0x11d9   :  { %2455 = vrcp.f32 %v1549_v8 }
0x11da   :  { %2457 = vtanh.f32 %v1656_v38 }
0x11e0   :  { %v2452_v5 = vpop.eup %2451 }
0x11e1   :  { %v1661_v27 = vadd.f32 1.0, %v2452_v5  ;;  %v2454_v42 = vpop.eup %2453 }
0x11e3   :  { %v2456_v43 = vpop.eup %2455  ;;  %2459 = vrcp.f32 %v1661_v27 }
0x11e4   :  { %v1552_v46 = vsel %vm2660_vm4, %v2454_v42, %v2456_v43  ;;  %v2458_v48 = vpop.eup %2457 }
0x11e5   :  { %1558 = vrot.lane.b32.xlu0 %v1552_v46, %s2508_s4  ;;  %v1556_v59 = vmul.f32 %v1554_v56, %v1552_v46 }
0x11ed   :  { %v2460_v49 = vpop.eup %2459 }
0x11ee   :  { %v1664_v50 = vsel %vm2660_vm4, %v2458_v48, %v2460_v49 }
0x11ef   :  { %1670 = vrot.lane.b32.xlu1 %v1664_v50, %s2508_s4  ;;  %v1668_v63 = vmul.f32 %v1666_v62, %v1664_v50 }
0x1257   :  { %v1559_v51 = vpop.permute.xlu0 %1558 }
0x1258   :  { %v1561_v52 = vmul.f32 %v1559_v51, %v1552_v46 }
0x125a   :  { %1563 = vrot.lane.b32.xlu0 %v1561_v52, %s2509_s12 }
0x1261   :  { %v1671_v53 = vpop.permute.xlu1 %1670 }
0x1262   :  { %v1673_v55 = vmul.f32 %v1671_v53, %v1664_v50 }
0x1264   :  { %1675 = vrot.lane.b32.xlu1 %v1673_v55, %s2509_s12 }
0x12cc   :  { %v1564_v60 = vpop.permute.xlu0 %1563 }
0x12cd   :  { %v1566_v61 = vadd.f32 %v1564_v60, %v1556_v59 }
0x12cf   :  { %2461 = vtanh.f32 %v1566_v61  ;;  %v1778_v27 = vrot.slane %v1566_v61, 6 }
0x12d6   :  { %v1676_v0 = vpop.permute.xlu1 %1675 }
0x12d7   :  { %v1678_v2 = vadd.f32 %v1676_v0, %v1668_v63 }
0x12d9   :  { %v2462_v3 = vpop.eup %2461  ;;  %2463 = vtanh.f32 %v1678_v2  ;;  %v1887_v48 = vrot.slane %v1678_v2, 2 }
0x12da   :  { %1569 = vrot.lane.b32.xlu0 %v2462_v3, %s2508_s4 }
0x12e3   :  { %v2464_v6 = vpop.eup %2463 }
0x12e4   :  { %1681 = vrot.lane.b32.xlu1 %v2464_v6, %s2508_s4 }
0x134c   :  { %v1570_v7 = vpop.permute.xlu0 %1569 }
0x134d   :  { %v2925_v9 = vmul.f32 %v1570_v7, %v1552_v46 }
0x134f   :  { %v1690_v11 = vrot.slane %v2925_v9, 4 }
0x1351   :  { %1691 = vrot.lane.b32.xlu0 %v1690_v11, %s2509_s12 }
0x1356   :  { %v1682_v12 = vpop.permute.xlu1 %1681 }
0x1357   :  { %v2929_v13 = vmul.f32 %v1682_v12, %v1664_v50 }
0x1359   :  { %v1802_v14 = vrot.slane %v2929_v13, 2 }
0x135b   :  { %1803 = vrot.lane.b32.xlu1 %v1802_v14, %s2509_s12 }
0x13c3   :  { %v1692_v15 = vpop.permute.xlu0 %1691 }
0x13c4   :  { %2228 = vmatmul.mubr.msk.f32.vlgmr.msra.gmra.mrb[14].mxu1 %vm46_vm1, %v1692_v15 }
0x13cd   :  { %v1804_v16 = vpop.permute.xlu1 %1803 }
0x13ce   :  { %2239 = vmatmul.mubr.msk.f32.vlgmr.msra.gmra.mrb[18].mxu0 %vm46_vm1, %v1804_v16 }
0x1497   :  { %v1761_v17 = vpop.f32.mrb[14].mxu1 }
0x1498   :  { %v1766_v37 = vrot.slane %v1761_v17, 2  ;;  %v2229_v20 = vpop.f32.mrb[15].mxu1 }
0x149a   :  { %v1768_v21 = vadd.f32 %v1766_v37, %v2655_v44 }
0x149c   :  { %v1981_v22 = vmul.f32 -1.442695, %v1768_v21 }
0x149e   :  { %2465 = vpow2.f32 %v1981_v22 }
0x14a1   :  { %v1873_v25 = vpop.f32.mrb[18].mxu0 }
0x14a2   :  { %v1877_v26 = vadd.f32 %v1873_v25, %v2652_v40  ;;  %v2240_v28 = vpop.f32.mrb[19].mxu0 }
0x14a4   :  { %v1983_v10 = vmul.f32 -1.442695, %v1877_v26 }
0x14a6   :  { %2467 = vpow2.f32 %v1983_v10 }
0x14a7   :  { %2469 = vtanh.f32 %v1768_v21 }
0x14a8   :  { %v2466_v29 = vpop.eup %2465 }
0x14a9   :  { %v1773_v30 = vadd.f32 1.0, %v2466_v29 }
0x14ab   :  { %2471 = vrcp.f32 %v1773_v30 }
0x14ac   :  { %2473 = vtanh.f32 %v1877_v26 }
0x14b0   :  { %v2468_v32 = vpop.eup %2467 }
0x14b1   :  { %v1882_v34 = vadd.f32 1.0, %v2468_v32  ;;  %v2470_v19 = vpop.eup %2469 }
0x14b3   :  { %2475 = vrcp.f32 %v1882_v34 }
0x14b5   :  { %v2472_v35 = vpop.eup %2471 }
0x14b6   :  { %v1776_v44 = vsel %vm2660_vm4, %v2470_v19, %v2472_v35  ;;  %v2474_v36 = vpop.eup %2473 }
0x14b7   :  { %1782 = vrot.lane.b32.xlu0 %v1776_v44, %s2508_s4  ;;  %v1780_v42 = vmul.f32 %v1778_v27, %v1776_v44 }
0x14bd   :  { %v2476_v40 = vpop.eup %2475 }
0x14be   :  { %v1885_v38 = vsel %vm2660_vm4, %v2474_v36, %v2476_v40 }
0x14bf   :  { %1891 = vrot.lane.b32.xlu1 %v1885_v38, %s2508_s4  ;;  %v1889_v49 = vmul.f32 %v1887_v48, %v1885_v38 }
0x1529   :  { %v1783_v23 = vpop.permute.xlu0 %1782 }
0x152a   :  { %v1785_v39 = vmul.f32 %v1783_v23, %v1776_v44 }
0x152c   :  { %1787 = vrot.lane.b32.xlu0 %v1785_v39, %s2509_s12 }
0x1531   :  { %v1892_v8 = vpop.permute.xlu1 %1891 }
0x1532   :  { %v1894_v5 = vmul.f32 %v1892_v8, %v1885_v38 }
0x1534   :  { %1896 = vrot.lane.b32.xlu1 %v1894_v5, %s2509_s12 }
0x159e   :  { %v1788_v43 = vpop.permute.xlu0 %1787 }
0x159f   :  { %v1790_v46 = vadd.f32 %v1788_v43, %v1780_v42 }
0x15a1   :  { %2477 = vtanh.f32 %v1790_v46 }
0x15a6   :  { %v1897_v50 = vpop.permute.xlu1 %1896 }
0x15a7   :  { %v1899_v57 = vadd.f32 %v1897_v50, %v1889_v49 }
0x15a9   :  { %2479 = vtanh.f32 %v1899_v57 }
0x15ab   :  { %v2478_v51 = vpop.eup %2477 }
0x15ac   :  { %1793 = vrot.lane.b32.xlu0 %v2478_v51, %s2508_s4 }
0x15b0   :  { %348 = vrot.lane.b32.xlu0 %v2681_v18, %s2508_s4 }
0x15b3   :  { %v2480_v52 = vpop.eup %2479 }
0x15b4   :  { %1902 = vrot.lane.b32.xlu1 %v2480_v52, %s2508_s4  ;;  %571 = vrot.lane.b32.xlu0 %v2727_v4, %s2508_s4 }
0x15b8   :  { %458 = vrot.lane.b32.xlu1 %v2723_v1, %s2509_s12  ;;  %797 = vrot.lane.b32.xlu0 %v2769_v58, %s2508_s4 }
0x15bc   :  { %684 = vrot.lane.b32.xlu1 %v2765_v54, %s2509_s12  ;;  %1020 = vrot.lane.b32.xlu0 %v2811_v45, %s2508_s4 }
0x15c0   :  { %910 = vrot.lane.b32.xlu1 %v2807_v41, %s2509_s12  ;;  %1350 = vrot.lane.b32.xlu0 %v2891_v47, %s2509_s12 }
0x15c4   :  { %1241 = vrot.lane.b32.xlu1 %v2850_v31, %s2508_s4  ;;  %1574 = vrot.lane.b32.xlu0 %v2925_v9, %s2509_s12 }
0x15c8   :  { %1462 = vrot.lane.b32.xlu1 %v2895_v24, %s2508_s4 }
0x15cc   :  { %1686 = vrot.lane.b32.xlu1 %v2929_v13, %s2508_s4 }
0x161e   :  { %v1794_v18 = vpop.permute.xlu0 %1793 }
0x161f   :  { %v1796_v1 = vmul.f32 %v1794_v18, %v1776_v44 }
0x1621   :  { %1798 = vrot.lane.b32.xlu1 %v1796_v1, %s2509_s12 }
0x1622   :  { %v349_v4 = vpop.permute.xlu0 %348 }
0x1623   :  { %352 = vst.msk [vmem:[%s3064_s5 + $0x8] sm:$0xc0] %vm351_vm6, %v349_v4 }
0x1625   :  { %1918 = vrot.lane.b32.xlu1 %v1790_v46, %s2510_s17 }
0x1626   :  { %v1903_v54 = vpop.permute.xlu1 %1902  ;;  %v572_v58 = vpop.permute.xlu0 %571 }
0x1627   :  { %v1905_v41 = vmul.f32 %v1903_v54, %v1885_v38  ;;  %575 = vst.msk [vmem:[%s3064_s5 + $0x8] sm:$0x30] %vm574_vm7, %v572_v58 }
0x1629   :  { %1912 = vrot.lane.b32.xlu0 %v1905_v41, %s2509_s12 }
0x162a   :  { %v459_v45 = vpop.permute.xlu1 %458  ;;  %v798_v31 = vpop.permute.xlu0 %797 }
0x162b   :  { %462 = vst.msk [vmem:[%s3064_s5] sm:$0xc] %vm461_vm8, %v459_v45 }
0x162c   :  { %801 = vst.msk [vmem:[%s3064_s5 + $0x8] sm:$0xc] %vm800_vm9, %v798_v31 }
0x162d   :  { %1907 = vrot.lane.b32.xlu0 %v1905_v41, %s2508_s4 }
0x162e   :  { %v685_v47 = vpop.permute.xlu1 %684  ;;  %v1021_v24 = vpop.permute.xlu0 %1020 }
0x162f   :  { %688 = vst.msk [vmem:[%s3064_s5] sm:$0x30] %vm687_vm10, %v685_v47 }
0x1630   :  { %1024 = vst.msk [vmem:[%s3064_s5 + $0x8] sm:$0x3] %vm1023_vm11, %v1021_v24 }
0x1631   :  { %1133 = vst.msk [vmem:[%s3064_s5 + $0x8] sm:$0x3] %vm246_vm5, %v2854_v33  ;;  %1923 = vrot.lane.b32.xlu0 %v1899_v57, %s2510_s17  ;;  %s2511_s17 = smov [#allocation2]  }
0x1632   :  { %v911_v53 = vpop.permute.xlu1 %910  ;;  %v1351_v55 = vpop.permute.xlu0 %1350  ;;  %s1935_s18 = sshll.u32 %s2511_s17, 4  ;;  %s1936_s18 = int_to_ptr.vmem [resolvable:$true] %s1935_s18 }
0x1633   :  { %914 = vst.msk [vmem:[%s3064_s5] sm:$0xc0] %vm913_vm12, %v911_v53  ;;  %s2481_s21 = scalar_lea.vmem %s1936_s18, 64  ;;  %p2486_p1 = scmp.lt.s32.totalorder %s1936_s18, %s1936_s18 }
0x1634   :  { %1353 = vst.msk [vmem:[%s3064_s5 + $0x8] sm:$0xc] %vm461_vm8, %v1351_v55  ;;  %p2482_p0 = scmp.ne.s32.totalorder %s1936_s18, %s2481_s21  ;;  %p2487_p2 = scmp.lt.s32.totalorder %s2481_s21, %s2481_s21 }
0x1636   :  { %v1242_v56 = vpop.permute.xlu1 %1241  ;;  %v1575_v59 = vpop.permute.xlu0 %1574  ;;  %p2488_p3 = por %p2487_p2, %p2486_p1 }
0x1637   :  { %1244 = vst.msk [vmem:[%s3064_s5] sm:$0xc0] %vm351_vm6, %v1242_v56 }
0x1638   :  { %1577 = vst.msk [vmem:[%s3064_s5 + $0x8] sm:$0x30] %vm687_vm10, %v1575_v59  ;;  %p2489_p4 = pnand %p2488_p3, %p2482_p0 }
0x163a   :  { %v1463_v33 = vpop.permute.xlu1 %1462 }
0x163b   :  { %1465 = vst.msk [vmem:[%s3064_s5] sm:$0x30] %vm574_vm7, %v1463_v33 }
0x163e   :  { %v1687_v60 = vpop.permute.xlu1 %1686 }
0x163f   :  { %1689 = vst.msk [vmem:[%s3064_s5] sm:$0xc] %vm800_vm9, %v1687_v60 }
0x1693   :  { %v1799_v61 = vpop.permute.xlu1 %1798 }
0x1694   :  { %1801 = vst.msk [vmem:[%s3064_s5 + $0x8] sm:$0xc0] %vm913_vm12, %v1799_v61  ;;  %1911 = vst.msk [vmem:[#allocation2 - $0x6] sm:$0xc0] %vm913_vm12, %v1799_v61 }
0x1697   :  { %v1919_v62 = vpop.permute.xlu1 %1918 }
0x1698   :  { %1921 = vst.msk [vmem:[%s3066_s7 - $0x6] sm:$0xc0] %vm913_vm12, %v1919_v62 }
0x169b   :  { %v1913_v63 = vpop.permute.xlu0 %1912 }
0x169c   :  { %1916 = vst.msk [vmem:[#allocation2 + $0x2] sm:$0x3] %vm246_vm5, %v1913_v63 }
0x169d   :  { %2492 = shalt.err (!%p2489_p4)
}
0x169e   :  { %s2493_s24 = scalar_lea.hbm %s3065_s6, 64 }
0x169f   :  { %p2494_p5 = scmp.ne.s32.totalorder %s3065_s6, %s2493_s24  ;;  %p2497_p6 = scmp.lt.u32.totalorder %s2493_s24, %s3065_s6 }
0x16a1   :  { %p2499_p7 = pnand %p2497_p6, %p2494_p5 }
0x16a3   :  { %2502 = shalt.err (!%p2499_p7)
}
0x16a4   :  { %s2512_s2 = smov 2   ;;  %v1908_v0 = vpop.permute.xlu0 %1907 }
0x16a5   :  { %1941 = dma.vmem_to_hbm [thread:$0]  %s1936_s18, 64, %s3065_s6, [#allocation3], %s2509_s12, %s2509_s12, %s2512_s2  }
0x16a6   :  { %1910 = vst.msk [vmem:[%s3064_s5] sm:$0x3] %vm1023_vm11, %v1908_v0 }
0x16a8   :  { %v1924_v2 = vpop.permute.xlu0 %1923 }
0x16a9   :  { %1984 = vst.msk [vmem:[%s3066_s7 + $0x2] sm:$0x3] %vm246_vm5, %v1924_v2 }
0x16aa   :  { %2503 = dma.done.wait [#allocation3], 64  }
0x16ab   :  { %2504 = vsyncadd [#allocation3], 4294967232 }
0x16ac   :  { %1951 = vsyncpa [#allocation3], 1 }

// kernel: encoder_forward.3
= control target key start
LH: loop header
LB: loop body
LE: loop exit
PB: predicated region body
PF: predicated region fallthrough
CT: control target
= control target key end

     0   :  { %16 = vsyncpa [#allocation3], 0  ;;  %v2816_v7 = vmov 0.0|0.0   ;;  %vm2817_vm0 = vmmov 0   ;;  %v2818_v8 = vmov 0.0   ;;  %s3424_s0 = inlined_call_operand.vmem [shape: f32[16,64], index: 0, kind: input, shape index: {}]   ;;  %s3425_s1 = inlined_call_operand.vmem [shape: f32[64,256], index: 1, kind: input, shape index: {}]   ;;  %s3426_s2 = inlined_call_operand.vmem [shape: f32[32,128], index: 2, kind: input, shape index: {}]   ;;  %s3427_s3 = inlined_call_operand.vmem [shape: f32[32,128], index: 3, kind: input, shape index: {}]   ;;  %s3428_s4 = inlined_call_operand.vmem [shape: f32[1,256], index: 4, kind: input, shape index: {}]   ;;  %s3429_s5 = inlined_call_operand.vmem [shape: f32[64,32], index: 5, kind: input, shape index: {}]   ;;  %s3430_s6 = inlined_call_operand.vmem [shape: f32[1,32], index: 6, kind: input, shape index: {}]   ;;  %s3431_s7 = inlined_call_operand.hbm [shape: f32[16,64], index: 7, kind: output, shape index: {0}]   ;;  %s3432_s8 = inlined_call_operand.hbm [shape: f32[2,2,32], index: 8, kind: output, shape index: {1}]   ;;  %s3433_s9 = inlined_call_operand.vmem [shape: f32[2,2,32], index: 9, kind: output, shape index: {2}]   ;;  %s3434_s10 = inlined_call_operand.hbm [shape: f32[2,32], index: 10, kind: output, shape index: {3}]  }
   0x1   :  { %v35_v0 = vld [vmem:[%s3425_s1 + $0x8] sm:$0xff]  ;;  %v37_v1 = vld [vmem:[%s3425_s1 + $0x18] sm:$0xff]  ;;  %v34_v2 = vld [vmem:[%s3425_s1] sm:$0xff]  ;;  %2498 = vmatprep.subr.bf16.mxu1 %v2816_v7  ;;  %2292 = vmatprep.mubr.msk.f32.mxu1 %vm2817_vm0, %v2818_v8 }
   0x2   :  { %v2482_v3 = vpack.c.bf16 %v37_v1, %v35_v0  ;;  %v36_v4 = vld [vmem:[%s3425_s1 + $0x10] sm:$0xff]  ;;  %v39_v5 = vld [vmem:[%s3425_s1 + $0x28] sm:$0xff]  ;;  %v41_v6 = vld [vmem:[%s3425_s1 + $0x38] sm:$0xff]  ;;  %133 = vmatprep.mubr.f32.mxu0 %v2818_v8 }
   0x3   :  { %v2484_v9 = vpack.c.bf16 %v36_v4, %v34_v2  ;;  %v2486_v10 = vpack.c.bf16 %v41_v6, %v39_v5  ;;  %v38_v11 = vld [vmem:[%s3425_s1 + $0x20] sm:$0xff]  ;;  %v40_v12 = vld [vmem:[%s3425_s1 + $0x30] sm:$0xff]  ;;  %v147_v14 = vld [vmem:[%s3426_s2 + $0x8] sm:$0xff] }
   0x4   :  { %v146_v13 = vld [vmem:[%s3426_s2] sm:$0xff]  ;;  %2483 = vmatprep.subr.bf16.mxu0 %v2482_v3  ;;  %v43_v15 = vld [vmem:[%s3425_s1 + $0x48] sm:$0xff]  ;;  %v45_v16 = vld [vmem:[%s3425_s1 + $0x58] sm:$0xff]  ;;  %v2488_v17 = vpack.c.bf16 %v40_v12, %v38_v11 }
   0x5   :  { %2485 = vmatpush1.bf16.msra.mxu0 %v2484_v9  ;;  %v2923_v18 = vpack.c.bf16 %v147_v14, %v146_v13  ;;  %v148_v19 = vld [vmem:[%s3426_s2 + $0x10] sm:$0xff]  ;;  %v2490_v20 = vpack.c.bf16 %v45_v16, %v43_v15  ;;  %v42_v21 = vld [vmem:[%s3425_s1 + $0x40] sm:$0xff]  ;;  %v149_v23 = vld [vmem:[%s3426_s2 + $0x18] sm:$0xff] }
   0x6   :  { %2487 = vmatprep.subr.bf16.mxu0 %v2486_v10  ;;  %v44_v22 = vld [vmem:[%s3425_s1 + $0x50] sm:$0xff]  ;;  %v2938_v24 = vpack.c.bf16 %v149_v23, %v148_v19  ;;  %v47_v25 = vld [vmem:[%s3425_s1 + $0x68] sm:$0xff]  ;;  %v49_v26 = vld [vmem:[%s3425_s1 + $0x78] sm:$0xff] }
   0x7   :  { %2500 = vmatpush3.bf16.msra.mxu1 %v2923_v18  ;;  %v150_v27 = vld [vmem:[%s3427_s3] sm:$0xff]  ;;  %v151_v28 = vld [vmem:[%s3427_s3 + $0x8] sm:$0xff]  ;;  %v2492_v29 = vpack.c.bf16 %v44_v22, %v42_v21 }
   0x8   :  { %2501 = vmatprep.subr.bf16.mxu1 %v2816_v7 }
   0x9   :  { %2489 = vmatpush1.bf16.msra.mxu0 %v2488_v17 }
   0xa   :  { %17 = vsyncpa [#allocation5], 0  ;;  %2491 = vmatprep.subr.bf16.mxu0 %v2490_v20  ;;  %v2494_v30 = vpack.c.bf16 %v49_v26, %v47_v25  ;;  %v46_v31 = vld [vmem:[%s3425_s1 + $0x60] sm:$0xff]  ;;  %v48_v32 = vld [vmem:[%s3425_s1 + $0x70] sm:$0xff]  ;;  %v2960_v33 = vpack.c.bf16 %v151_v28, %v150_v27  ;;  %vm62_vm1 = vcmask 523264   ;;  %v52_v40 = vlaneseq  ;;  %s2820_s23 = smov 32  }
   0xb   :  { %2503 = vmatpush3.bf16.msra.mxu1 %v2938_v24  ;;  %v152_v34 = vld [vmem:[%s3427_s3 + $0x10] sm:$0xff]  ;;  %v153_v35 = vld [vmem:[%s3427_s3 + $0x18] sm:$0xff]  ;;  %v2496_v36 = vpack.c.bf16 %v48_v32, %v46_v31  ;;  %v32_v38 = vld [vmem:[%s3424_s0] sm:$0xff]  ;;  %vm263_vm5 = vcmask 254976   ;;  %vm159_vm6 = vcmask 261120   ;;  %vm478_vm7 = vcmask 257026  }
   0xc   :  { %2504 = vmatprep.subr.bf16.mxu1 %v2816_v7  ;;  %v2971_v37 = vpack.c.bf16 %v153_v35, %v152_v34  ;;  %v33_v39 = vld [vmem:[%s3424_s0 + $0x8] sm:$0xff]  ;;  %v53_v41 = vshrl.u32 %v52_v40, 7  ;;  %v50_v44 = vld [vmem:[%s3428_s4] sm:$0x3]  ;;  %v155_v2 = vand.u32 127, %v52_v40  ;;  %s2819_s4 = smov 64  }
   0xd   :  { %2493 = vmatpush1.bf16.msra.mxu0 %v2492_v29  ;;  %vm368_vm8 = vcmask 523526   ;;  %vm704_vm9 = vcmask 259076   ;;  %vm591_vm10 = vcmask 521476   ;;  %vm930_vm11 = vcmask 261126   ;;  %s2822_s21 = smov [#allocation4]  }
   0xe   :  { %2495 = vmatprep.subr.bf16.mxu0 %v2494_v30  ;;  %2293 = vmatmul.mubr.f32.vlgmr.msra.gmra.mrb[0].mxu1 %v2818_v8  ;;  %v54_v42 = vsub.s32 0, %v53_v41  ;;  %v58_v45 = vsub.s32 1, %v53_v41  ;;  %vm156_vm2 = vcmp.ge.s32.totalorder %v155_v2, 64  ;;  %vm157_vm3 = vcmp.lt.s32.totalorder %v155_v2, 96  ;;  %s2126_s0 = sshll.u32 %s2822_s21, 4  ;;  %s2127_s0 = int_to_ptr.vmem [resolvable:$true] %s2126_s0 }
   0xf   :  { %2506 = vmatpush3.bf16.msra.mxu1 %v2960_v33  ;;  %2303 = vmatprep.mubr.msk.f32.mxu1 %vm2817_vm0, %v2818_v8  ;;  %vm3012_vm4 = vmand %vm156_vm2, %vm157_vm3  ;;  %vm817_vm12 = vcmask 519426   ;;  %vm1040_vm13 = vcmask 517376   ;;  %s2746_s22 = scalar_lea.vmem %s2127_s0, 64  ;;  %p2751_p1 = scmp.lt.s32.totalorder %s2127_s0, %s2127_s0 }
  0x10   :  { %2507 = vmatprep.subr.bf16.mxu1 %v2816_v7  ;;  %v55_v47 = vrot.slane %v50_v44, %v54_v42  ;;  %v59_v48 = vrot.slane %v50_v44, %v58_v45  ;;  %p2747_p0 = scmp.ne.s32.totalorder %s2127_s0, %s2746_s22  ;;  %p2752_p2 = scmp.lt.s32.totalorder %s2746_s22, %s2746_s22 }
  0x11   :  { %2497 = vmatpush1.bf16.msra.mxu0 %v2496_v36 }
  0x12   :  { %2510 = vmatprep.subr.bf16.mxu0 %v2816_v7  ;;  %p2753_p3 = por %p2752_p2, %p2751_p1 }
  0x13   :  { %2509 = vmatpush3.bf16.msra.mxu1 %v2971_v37 }
  0x14   :  { %2158 = vmatmul.mubr.msk.f32.vlgmr.msra.gmra.mrb[0].mxu0 %vm62_vm1, %v32_v38  ;;  %2516 = vmatprep.subr.bf16.mxu1 %v2816_v7  ;;  %p2754_p4 = pnand %p2753_p3, %p2747_p0 }
  0x15   :  { %139 = vmatprep.mubr.f32.mxu0 %v2818_v8  ;;  %2512 = vmatpush3.bf16.msra.mxu0 %v2923_v18 }
  0x16   :  { %2304 = vmatmul.mubr.f32.vlgmr.msra.gmra.mrb[2].mxu1 %v2818_v8  ;;  %2513 = vmatprep.subr.bf16.mxu0 %v2816_v7 }
  0x17   :  { %2518 = vmatpush3.bf16.msra.mxu1 %v2960_v33  ;;  %2325 = vmatprep.mubr.msk.f32.mxu1 %vm2817_vm0, %v2818_v8 }
  0x18   :  { %2159 = vmatmul.mubr.msk.f32.gmra.mrb[2].mxu0 %vm62_vm1, %v33_v39  ;;  %2519 = vmatprep.subr.bf16.mxu1 %v2816_v7 }
  0x19   :  { %2515 = vmatpush3.bf16.msra.mxu0 %v2938_v24  ;;  %2314 = vmatprep.mubr.msk.f32.mxu0 %vm2817_vm0, %v2818_v8 }
  0x1a   :  { %2522 = vmatprep.subr.bf16.mxu0 %v2816_v7 }
  0x1b   :  { %2521 = vmatpush3.bf16.msra.mxu1 %v2971_v37 }
  0x1c   :  { %2528 = vmatprep.subr.bf16.mxu1 %v2816_v7 }
  0xe1   :  { %v229_v43 = vpop.f32.mrb[0].mxu1 }
  0xe2   :  { %v2294_v46 = vpop.f32.mrb[1].mxu1 }
  0xe7   :  { %v135_v49 = vpop.f32.mrb[0].mxu0 }
  0xe8   :  { %v3002_v50 = vadd.f32 %v135_v49, %v55_v47  ;;  %v137_v51 = vpop.f32.mrb[1].mxu0 }
  0xe9   :  { %v3004_v52 = vadd.f32 %v137_v51, %v59_v48  ;;  %v331_v53 = vpop.f32.mrb[2].mxu1 }
  0xea   :  { %v233_v54 = vadd.f32 %v229_v43, %v3002_v50  ;;  %v2305_v55 = vpop.f32.mrb[3].mxu1  ;;  %v336_v57 = vrot.slane %v331_v53, 2 }
  0xeb   :  { %v141_v56 = vpop.f32.mrb[2].mxu0 }
  0xec   :  { %v2160_v58 = vmul.f32 -1.442695, %v233_v54  ;;  %v3007_v59 = vadd.f32 %v141_v56, %v55_v47  ;;  %v143_v60 = vpop.f32.mrb[3].mxu0 }
  0xed   :  { %v3009_v61 = vadd.f32 %v143_v60, %v59_v48 }
  0xee   :  { %2618 = vpow2.f32 %v2160_v58 }
  0xef   :  { %v338_v62 = vadd.f32 %v336_v57, %v3009_v61 }
  0xf1   :  { %v2161_v63 = vmul.f32 -1.442695, %v338_v62 }
  0xf3   :  { %2620 = vpow2.f32 %v2161_v63 }
  0xf4   :  { %2622 = vtanh.f32 %v233_v54 }
  0xf8   :  { %v2619_v0 = vpop.eup %2618 }
  0xf9   :  { %v238_v1 = vadd.f32 1.0, %v2619_v0 }
  0xfb   :  { %2624 = vrcp.f32 %v238_v1 }
  0xfc   :  { %2626 = vtanh.f32 %v338_v62 }
  0xfd   :  { %v2621_v3 = vpop.eup %2620 }
  0xfe   :  { %v343_v4 = vadd.f32 1.0, %v2621_v3  ;;  %v2623_v6 = vpop.eup %2622 }
 0x100   :  { %2628 = vrcp.f32 %v343_v4 }
 0x105   :  { %v2625_v9 = vpop.eup %2624 }
 0x106   :  { %v241_v10 = vsel %vm3012_vm4, %v2623_v6, %v2625_v9  ;;  %v2627_v11 = vpop.eup %2626 }
 0x107   :  { %244 = vrot.lane.b32.xlu0 %v241_v10, %s2819_s4  ;;  %v242_v19 = vmul.f32 0.0, %v241_v10 }
 0x10a   :  { %v2629_v12 = vpop.eup %2628 }
 0x10b   :  { %v346_v13 = vsel %vm3012_vm4, %v2627_v11, %v2629_v12 }
 0x10c   :  { %349 = vrot.lane.b32.xlu0 %v346_v13, %s2819_s4  ;;  %v347_v22 = vmul.f32 0.0, %v346_v13 }
 0x179   :  { %v245_v14 = vpop.permute.xlu0 %244 }
 0x17a   :  { %v247_v15 = vmul.f32 %v245_v14, %v241_v10 }
 0x17c   :  { %249 = vrot.lane.b32.xlu1 %v247_v15, %s2820_s23 }
 0x17e   :  { %v350_v16 = vpop.permute.xlu0 %349 }
 0x17f   :  { %v352_v17 = vmul.f32 %v350_v16, %v346_v13 }
 0x181   :  { %354 = vrot.lane.b32.xlu1 %v352_v17, %s2820_s23 }
 0x1ee   :  { %v250_v20 = vpop.permute.xlu1 %249 }
 0x1ef   :  { %v3024_v21 = vadd.f32 %v250_v20, %v242_v19 }
 0x1f1   :  { %2630 = vtanh.f32 %v3024_v21  ;;  %v455_v1 = vrot.slane %v3024_v21, 6 }
 0x1f3   :  { %v355_v23 = vpop.permute.xlu1 %354 }
 0x1f4   :  { %v3027_v25 = vadd.f32 %v355_v23, %v347_v22 }
 0x1f6   :  { %2632 = vtanh.f32 %v3027_v25  ;;  %v568_v6 = vrot.slane %v3027_v25, 2 }
 0x1fb   :  { %v2631_v26 = vpop.eup %2630 }
 0x1fc   :  { %255 = vrot.lane.b32.xlu0 %v2631_v26, %s2819_s4 }
 0x200   :  { %v2633_v27 = vpop.eup %2632 }
 0x201   :  { %360 = vrot.lane.b32.xlu1 %v2633_v27, %s2819_s4 }
 0x26e   :  { %v256_v28 = vpop.permute.xlu0 %255 }
 0x26f   :  { %v258_v29 = vmul.f32 %v256_v28, %v241_v10 }
 0x271   :  { %260 = vrot.lane.b32.xlu0 %v258_v29, %s2820_s23 }
 0x273   :  { %v361_v30 = vpop.permute.xlu1 %360 }
 0x274   :  { %v3033_v31 = vmul.f32 %v361_v30, %v346_v13 }
 0x276   :  { %v480_v32 = vrot.slane %v3033_v31, 6 }
 0x278   :  { %481 = vrot.lane.b32.xlu1 %v480_v32, %s2820_s23 }
 0x2e3   :  { %v261_v34 = vpop.permute.xlu0 %260 }
 0x2e4   :  { %264 = vst.msk [vmem:[#allocation2] sm:$0x3] %vm263_vm5, %v261_v34  ;;  %2315 = vmatmul.mubr.msk.f32.vlgmr.msra.gmra.mrb[4].mxu0 %vm159_vm6, %v261_v34 }
 0x2e5   :  { %2524 = vmatpush3.bf16.msra.mxu0 %v2923_v18  ;;  %2336 = vmatprep.mubr.msk.f32.mxu0 %vm2817_vm0, %v2818_v8 }
 0x2e6   :  { %2525 = vmatprep.subr.bf16.mxu0 %v2816_v7 }
 0x2e9   :  { %2527 = vmatpush3.bf16.msra.mxu0 %v2938_v24 }
 0x2ea   :  { %v482_v35 = vpop.permute.xlu1 %481  ;;  %2534 = vmatprep.subr.bf16.mxu0 %v2816_v7 }
 0x2eb   :  { %2326 = vmatmul.mubr.msk.f32.vlgmr.msra.gmra.mrb[4].mxu1 %vm159_vm6, %v482_v35 }
 0x2ec   :  { %2530 = vmatpush3.bf16.msra.mxu1 %v2960_v33  ;;  %2347 = vmatprep.mubr.msk.f32.mxu1 %vm2817_vm0, %v2818_v8 }
 0x2ed   :  { %2531 = vmatprep.subr.bf16.mxu1 %v2816_v7 }
 0x2f0   :  { %2533 = vmatpush3.bf16.msra.mxu1 %v2971_v37 }
 0x2f1   :  { %2540 = vmatprep.subr.bf16.mxu1 %v2816_v7 }
 0x3b7   :  { %v438_v36 = vpop.f32.mrb[4].mxu0 }
 0x3b8   :  { %v443_v38 = vrot.slane %v438_v36, 6  ;;  %v2316_v39 = vpop.f32.mrb[5].mxu0 }
 0x3ba   :  { %v445_v40 = vadd.f32 %v443_v38, %v3002_v50 }
 0x3bc   :  { %v2163_v41 = vmul.f32 -1.442695, %v445_v40 }
 0x3be   :  { %2634 = vpow2.f32 %v2163_v41  ;;  %v551_v42 = vpop.f32.mrb[4].mxu1 }
 0x3bf   :  { %v556_v43 = vrot.slane %v551_v42, 4  ;;  %v2327_v44 = vpop.f32.mrb[5].mxu1 }
 0x3c1   :  { %v558_v45 = vadd.f32 %v556_v43, %v3009_v61 }
 0x3c3   :  { %v2165_v46 = vmul.f32 -1.442695, %v558_v45 }
 0x3c5   :  { %2636 = vpow2.f32 %v2165_v46 }
 0x3c6   :  { %2638 = vtanh.f32 %v445_v40 }
 0x3c8   :  { %v2635_v47 = vpop.eup %2634 }
 0x3c9   :  { %v450_v48 = vadd.f32 1.0, %v2635_v47 }
 0x3cb   :  { %2640 = vrcp.f32 %v450_v48 }
 0x3cc   :  { %2642 = vtanh.f32 %v558_v45 }
 0x3cf   :  { %v2637_v49 = vpop.eup %2636 }
 0x3d0   :  { %v563_v51 = vadd.f32 1.0, %v2637_v49  ;;  %v2639_v53 = vpop.eup %2638 }
 0x3d2   :  { %2644 = vrcp.f32 %v563_v51 }
 0x3d5   :  { %v2641_v54 = vpop.eup %2640 }
 0x3d6   :  { %v453_v55 = vsel %vm3012_vm4, %v2639_v53, %v2641_v54  ;;  %v2643_v56 = vpop.eup %2642 }
 0x3d7   :  { %459 = vrot.lane.b32.xlu0 %v453_v55, %s2819_s4  ;;  %v457_v2 = vmul.f32 %v455_v1, %v453_v55 }
 0x3dc   :  { %v2645_v57 = vpop.eup %2644 }
 0x3dd   :  { %v566_v58 = vsel %vm3012_vm4, %v2643_v56, %v2645_v57 }
 0x3de   :  { %572 = vrot.lane.b32.xlu1 %v566_v58, %s2819_s4  ;;  %v570_v9 = vmul.f32 %v568_v6, %v566_v58 }
 0x449   :  { %v460_v60 = vpop.permute.xlu0 %459 }
 0x44a   :  { %v462_v62 = vmul.f32 %v460_v60, %v453_v55 }
 0x44c   :  { %464 = vrot.lane.b32.xlu0 %v462_v62, %s2820_s23 }
 0x450   :  { %v573_v63 = vpop.permute.xlu1 %572 }
 0x451   :  { %v575_v0 = vmul.f32 %v573_v63, %v566_v58 }
 0x453   :  { %577 = vrot.lane.b32.xlu1 %v575_v0, %s2820_s23 }
 0x4be   :  { %v465_v3 = vpop.permute.xlu0 %464 }
 0x4bf   :  { %v3063_v4 = vadd.f32 %v465_v3, %v457_v2 }
 0x4c1   :  { %2646 = vtanh.f32 %v3063_v4  ;;  %v681_v53 = vrot.slane %v3063_v4, 6 }
 0x4c5   :  { %v578_v10 = vpop.permute.xlu1 %577 }
 0x4c6   :  { %v3067_v11 = vadd.f32 %v578_v10, %v570_v9 }
 0x4c8   :  { %2648 = vtanh.f32 %v3067_v11  ;;  %v794_v57 = vrot.slane %v3067_v11, 2 }
 0x4cb   :  { %v2647_v12 = vpop.eup %2646 }
 0x4cc   :  { %470 = vrot.lane.b32.xlu0 %v2647_v12, %s2819_s4 }
 0x4d2   :  { %v2649_v13 = vpop.eup %2648 }
 0x4d3   :  { %583 = vrot.lane.b32.xlu1 %v2649_v13, %s2819_s4 }
 0x53e   :  { %v471_v14 = vpop.permute.xlu0 %470 }
 0x53f   :  { %v3072_v15 = vmul.f32 %v471_v14, %v453_v55 }
 0x541   :  { %v593_v16 = vrot.slane %v3072_v15, 2 }
 0x543   :  { %594 = vrot.lane.b32.xlu0 %v593_v16, %s2820_s23 }
 0x545   :  { %v584_v17 = vpop.permute.xlu1 %583 }
 0x546   :  { %v3076_v19 = vmul.f32 %v584_v17, %v566_v58 }
 0x548   :  { %v706_v20 = vrot.slane %v3076_v19, 4 }
 0x54a   :  { %707 = vrot.lane.b32.xlu1 %v706_v20, %s2820_s23 }
 0x5b5   :  { %v595_v21 = vpop.permute.xlu0 %594 }
 0x5b6   :  { %2337 = vmatmul.mubr.msk.f32.vlgmr.msra.gmra.mrb[6].mxu0 %vm159_vm6, %v595_v21 }
 0x5b7   :  { %2536 = vmatpush3.bf16.msra.mxu0 %v2923_v18  ;;  %2358 = vmatprep.mubr.msk.f32.mxu0 %vm2817_vm0, %v2818_v8 }
 0x5b8   :  { %2537 = vmatprep.subr.bf16.mxu0 %v2816_v7 }
 0x5bb   :  { %2539 = vmatpush3.bf16.msra.mxu0 %v2938_v24 }
 0x5bc   :  { %v708_v22 = vpop.permute.xlu1 %707  ;;  %2546 = vmatprep.subr.bf16.mxu0 %v2816_v7 }
 0x5bd   :  { %2348 = vmatmul.mubr.msk.f32.vlgmr.msra.gmra.mrb[6].mxu1 %vm159_vm6, %v708_v22 }
 0x5be   :  { %2542 = vmatpush3.bf16.msra.mxu1 %v2960_v33  ;;  %2369 = vmatprep.mubr.msk.f32.mxu1 %vm2817_vm0, %v2818_v8 }
 0x5bf   :  { %2543 = vmatprep.subr.bf16.mxu1 %v2816_v7 }
 0x5c2   :  { %2545 = vmatpush3.bf16.msra.mxu1 %v2971_v37 }
 0x5c3   :  { %2552 = vmatprep.subr.bf16.mxu1 %v2816_v7 }
 0x689   :  { %v664_v23 = vpop.f32.mrb[6].mxu0 }
 0x68a   :  { %v669_v25 = vrot.slane %v664_v23, 4  ;;  %v2338_v26 = vpop.f32.mrb[7].mxu0 }
 0x68c   :  { %v671_v27 = vadd.f32 %v669_v25, %v3002_v50 }
 0x68e   :  { %v2167_v28 = vmul.f32 -1.442695, %v671_v27 }
 0x690   :  { %2650 = vpow2.f32 %v2167_v28  ;;  %v777_v29 = vpop.f32.mrb[6].mxu1 }
 0x691   :  { %v782_v30 = vrot.slane %v777_v29, 6  ;;  %v2349_v32 = vpop.f32.mrb[7].mxu1 }
 0x693   :  { %v784_v34 = vadd.f32 %v782_v30, %v3009_v61 }
 0x695   :  { %v2169_v35 = vmul.f32 -1.442695, %v784_v34 }
 0x697   :  { %2652 = vpow2.f32 %v2169_v35 }
 0x698   :  { %2654 = vtanh.f32 %v671_v27 }
 0x69a   :  { %v2651_v36 = vpop.eup %2650 }
 0x69b   :  { %v676_v38 = vadd.f32 1.0, %v2651_v36 }
 0x69d   :  { %2656 = vrcp.f32 %v676_v38 }
 0x69e   :  { %2658 = vtanh.f32 %v784_v34 }
 0x6a1   :  { %v2653_v39 = vpop.eup %2652 }
 0x6a2   :  { %v789_v40 = vadd.f32 1.0, %v2653_v39  ;;  %v2655_v41 = vpop.eup %2654 }
 0x6a4   :  { %2660 = vrcp.f32 %v789_v40 }
 0x6a7   :  { %v2657_v42 = vpop.eup %2656 }
 0x6a8   :  { %v679_v43 = vsel %vm3012_vm4, %v2655_v41, %v2657_v42  ;;  %v2659_v44 = vpop.eup %2658 }
 0x6a9   :  { %685 = vrot.lane.b32.xlu0 %v679_v43, %s2819_s4  ;;  %v683_v54 = vmul.f32 %v681_v53, %v679_v43 }
 0x6ae   :  { %v2661_v45 = vpop.eup %2660 }
 0x6af   :  { %v792_v46 = vsel %vm3012_vm4, %v2659_v44, %v2661_v45 }
 0x6b0   :  { %798 = vrot.lane.b32.xlu1 %v792_v46, %s2819_s4  ;;  %v796_v58 = vmul.f32 %v794_v57, %v792_v46 }
 0x71b   :  { %v686_v47 = vpop.permute.xlu0 %685 }
 0x71c   :  { %v688_v48 = vmul.f32 %v686_v47, %v679_v43 }
 0x71e   :  { %690 = vrot.lane.b32.xlu0 %v688_v48, %s2820_s23 }
 0x722   :  { %v799_v49 = vpop.permute.xlu1 %798 }
 0x723   :  { %v801_v51 = vmul.f32 %v799_v49, %v792_v46 }
 0x725   :  { %803 = vrot.lane.b32.xlu1 %v801_v51, %s2820_s23 }
 0x790   :  { %v691_v55 = vpop.permute.xlu0 %690 }
 0x791   :  { %v3105_v56 = vadd.f32 %v691_v55, %v683_v54 }
 0x793   :  { %2662 = vtanh.f32 %v3105_v56  ;;  %v907_v40 = vrot.slane %v3105_v56, 6 }
 0x797   :  { %v804_v60 = vpop.permute.xlu1 %803 }
 0x798   :  { %v3109_v62 = vadd.f32 %v804_v60, %v796_v58 }
 0x79a   :  { %2664 = vtanh.f32 %v3109_v62  ;;  %v1017_v44 = vrot.slane %v3109_v62, 2 }
 0x79d   :  { %v2663_v63 = vpop.eup %2662 }
 0x79e   :  { %696 = vrot.lane.b32.xlu0 %v2663_v63, %s2819_s4 }
 0x7a4   :  { %v2665_v0 = vpop.eup %2664 }
 0x7a5   :  { %809 = vrot.lane.b32.xlu1 %v2665_v0, %s2819_s4 }
 0x810   :  { %v697_v1 = vpop.permute.xlu0 %696 }
 0x811   :  { %v3114_v2 = vmul.f32 %v697_v1, %v679_v43 }
 0x813   :  { %v819_v3 = vrot.slane %v3114_v2, 4 }
 0x815   :  { %820 = vrot.lane.b32.xlu0 %v819_v3, %s2820_s23 }
 0x817   :  { %v810_v4 = vpop.permute.xlu1 %809 }
 0x818   :  { %v3118_v6 = vmul.f32 %v810_v4, %v792_v46 }
 0x81a   :  { %v932_v9 = vrot.slane %v3118_v6, 2 }
 0x81c   :  { %933 = vrot.lane.b32.xlu1 %v932_v9, %s2820_s23 }
 0x887   :  { %v821_v10 = vpop.permute.xlu0 %820 }
 0x888   :  { %2359 = vmatmul.mubr.msk.f32.vlgmr.msra.gmra.mrb[8].mxu0 %vm159_vm6, %v821_v10 }
 0x889   :  { %2548 = vmatpush3.bf16.msra.mxu0 %v2923_v18  ;;  %2380 = vmatprep.mubr.msk.f32.mxu0 %vm2817_vm0, %v2818_v8 }
 0x88a   :  { %2549 = vmatprep.subr.bf16.mxu0 %v2816_v7 }
 0x88d   :  { %2551 = vmatpush3.bf16.msra.mxu0 %v2938_v24 }
 0x88e   :  { %v934_v11 = vpop.permute.xlu1 %933  ;;  %2558 = vmatprep.subr.bf16.mxu0 %v2816_v7 }
 0x88f   :  { %2370 = vmatmul.mubr.msk.f32.vlgmr.msra.gmra.mrb[8].mxu1 %vm159_vm6, %v934_v11 }
 0x890   :  { %2554 = vmatpush3.bf16.msra.mxu1 %v2960_v33  ;;  %2391 = vmatprep.mubr.msk.f32.mxu1 %vm2817_vm0, %v2818_v8 }
 0x891   :  { %2555 = vmatprep.subr.bf16.mxu1 %v2816_v7 }
 0x894   :  { %2557 = vmatpush3.bf16.msra.mxu1 %v2971_v37 }
 0x895   :  { %2564 = vmatprep.subr.bf16.mxu1 %v2816_v7 }
 0x95b   :  { %v890_v12 = vpop.f32.mrb[8].mxu0 }
 0x95c   :  { %v895_v13 = vrot.slane %v890_v12, 2  ;;  %v2360_v14 = vpop.f32.mrb[9].mxu0 }
 0x95e   :  { %v897_v16 = vadd.f32 %v895_v13, %v3002_v50 }
 0x960   :  { %v2171_v17 = vmul.f32 -1.442695, %v897_v16 }
 0x962   :  { %2666 = vpow2.f32 %v2171_v17  ;;  %v1003_v20 = vpop.f32.mrb[8].mxu1 }
 0x963   :  { %v1007_v21 = vadd.f32 %v1003_v20, %v3009_v61  ;;  %v2371_v22 = vpop.f32.mrb[9].mxu1 }
 0x965   :  { %v2173_v23 = vmul.f32 -1.442695, %v1007_v21 }
 0x967   :  { %2668 = vpow2.f32 %v2173_v23 }
 0x968   :  { %2670 = vtanh.f32 %v897_v16 }
 0x96c   :  { %v2667_v25 = vpop.eup %2666 }
 0x96d   :  { %v902_v26 = vadd.f32 1.0, %v2667_v25 }
 0x96f   :  { %2672 = vrcp.f32 %v902_v26 }
 0x970   :  { %2674 = vtanh.f32 %v1007_v21 }
 0x971   :  { %v2669_v27 = vpop.eup %2668 }
 0x972   :  { %v1012_v28 = vadd.f32 1.0, %v2669_v27  ;;  %v2671_v29 = vpop.eup %2670 }
 0x974   :  { %2676 = vrcp.f32 %v1012_v28 }
 0x979   :  { %v2673_v30 = vpop.eup %2672 }
 0x97a   :  { %v905_v50 = vsel %vm3012_vm4, %v2671_v29, %v2673_v30  ;;  %v2675_v32 = vpop.eup %2674 }
 0x97b   :  { %911 = vrot.lane.b32.xlu0 %v905_v50, %s2819_s4  ;;  %v909_v41 = vmul.f32 %v907_v40, %v905_v50 }
 0x97e   :  { %v2677_v61 = vpop.eup %2676 }
 0x97f   :  { %v1015_v34 = vsel %vm3012_vm4, %v2675_v32, %v2677_v61 }
 0x980   :  { %1021 = vrot.lane.b32.xlu1 %v1015_v34, %s2819_s4  ;;  %v1019_v45 = vmul.f32 %v1017_v44, %v1015_v34 }
 0x9ed   :  { %v912_v35 = vpop.permute.xlu0 %911 }
 0x9ee   :  { %v914_v36 = vmul.f32 %v912_v35, %v905_v50 }
 0x9f0   :  { %916 = vrot.lane.b32.xlu0 %v914_v36, %s2820_s23 }
 0x9f2   :  { %v1022_v38 = vpop.permute.xlu1 %1021 }
 0x9f3   :  { %v1024_v39 = vmul.f32 %v1022_v38, %v1015_v34 }
 0x9f5   :  { %1026 = vrot.lane.b32.xlu1 %v1024_v39, %s2820_s23 }
 0xa62   :  { %v917_v42 = vpop.permute.xlu0 %916 }
 0xa63   :  { %v3147_v43 = vadd.f32 %v917_v42, %v909_v41 }
 0xa65   :  { %2678 = vtanh.f32 %v3147_v43  ;;  %v1127_v29 = vrot.slane %v3147_v43, 6 }
 0xa67   :  { %v1027_v46 = vpop.permute.xlu1 %1026 }
 0xa68   :  { %v3151_v47 = vadd.f32 %v1027_v46, %v1019_v45 }
 0xa6a   :  { %2680 = vtanh.f32 %v3151_v47  ;;  %v1238_v61 = vrot.slane %v3151_v47, 2 }
 0xa6f   :  { %v2679_v48 = vpop.eup %2678 }
 0xa70   :  { %922 = vrot.lane.b32.xlu0 %v2679_v48, %s2819_s4 }
 0xa74   :  { %v2681_v49 = vpop.eup %2680 }
 0xa75   :  { %1032 = vrot.lane.b32.xlu1 %v2681_v49, %s2819_s4 }
 0xae2   :  { %v923_v51 = vpop.permute.xlu0 %922 }
 0xae3   :  { %v3156_v53 = vmul.f32 %v923_v51, %v905_v50 }
 0xae5   :  { %v1042_v54 = vrot.slane %v3156_v53, 6 }
 0xae7   :  { %v1033_v55 = vpop.permute.xlu1 %1032  ;;  %1043 = vrot.lane.b32.xlu0 %v1042_v54, %s2820_s23 }
 0xae8   :  { %v3160_v56 = vmul.f32 %v1033_v55, %v1015_v34 }
 0xaea   :  { %1151 = vrot.lane.b32.xlu1 %v3160_v56, %s2820_s23 }
 0xb59   :  { %v1044_v57 = vpop.permute.xlu0 %1043 }
 0xb5a   :  { %2381 = vmatmul.mubr.msk.f32.vlgmr.msra.gmra.mrb[10].mxu0 %vm159_vm6, %v1044_v57 }
 0xb5b   :  { %2560 = vmatpush3.bf16.msra.mxu0 %v2923_v18  ;;  %2402 = vmatprep.mubr.msk.f32.mxu0 %vm2817_vm0, %v2818_v8 }
 0xb5c   :  { %v1152_v58 = vpop.permute.xlu1 %1151  ;;  %2561 = vmatprep.subr.bf16.mxu0 %v2816_v7 }
 0xb5d   :  { %2392 = vmatmul.mubr.msk.f32.vlgmr.msra.gmra.mrb[10].mxu1 %vm159_vm6, %v1152_v58 }
 0xb5e   :  { %2566 = vmatpush3.bf16.msra.mxu1 %v2960_v33  ;;  %2413 = vmatprep.mubr.msk.f32.mxu1 %vm2817_vm0, %v2818_v8 }
 0xb5f   :  { %2563 = vmatpush3.bf16.msra.mxu0 %v2938_v24  ;;  %2567 = vmatprep.subr.bf16.mxu1 %v2816_v7 }
 0xb60   :  { %2570 = vmatprep.subr.bf16.mxu0 %v2816_v7 }
 0xb62   :  { %2569 = vmatpush3.bf16.msra.mxu1 %v2971_v37 }
 0xb63   :  { %2576 = vmatprep.subr.bf16.mxu1 %v2816_v7 }
 0xc2d   :  { %v1113_v60 = vpop.f32.mrb[10].mxu0 }
 0xc2e   :  { %v1117_v62 = vadd.f32 %v1113_v60, %v3007_v59  ;;  %v2382_v63 = vpop.f32.mrb[11].mxu0 }
 0xc30   :  { %v2175_v0 = vmul.f32 -1.442695, %v1117_v62  ;;  %v1221_v1 = vpop.f32.mrb[10].mxu1 }
 0xc31   :  { %v1226_v3 = vrot.slane %v1221_v1, 2  ;;  %v2393_v4 = vpop.f32.mrb[11].mxu1 }
 0xc32   :  { %2682 = vpow2.f32 %v2175_v0 }
 0xc33   :  { %v1228_v9 = vadd.f32 %v1226_v3, %v3004_v52 }
 0xc35   :  { %v2177_v10 = vmul.f32 -1.442695, %v1228_v9 }
 0xc37   :  { %2684 = vpow2.f32 %v2177_v10 }
 0xc38   :  { %2686 = vtanh.f32 %v1117_v62 }
 0xc3c   :  { %v2683_v11 = vpop.eup %2682 }
 0xc3d   :  { %v1122_v12 = vadd.f32 1.0, %v2683_v11 }
 0xc3f   :  { %2688 = vrcp.f32 %v1122_v12 }
 0xc40   :  { %2690 = vtanh.f32 %v1228_v9 }
 0xc41   :  { %v2685_v13 = vpop.eup %2684 }
 0xc42   :  { %v1233_v14 = vadd.f32 1.0, %v2685_v13  ;;  %v2687_v16 = vpop.eup %2686 }
 0xc44   :  { %2692 = vrcp.f32 %v1233_v14 }
 0xc49   :  { %v2689_v17 = vpop.eup %2688 }
 0xc4a   :  { %v1125_v20 = vsel %vm3012_vm4, %v2687_v16, %v2689_v17  ;;  %v2691_v21 = vpop.eup %2690 }
 0xc4b   :  { %1131 = vrot.lane.b32.xlu0 %v1125_v20, %s2819_s4  ;;  %v1129_v30 = vmul.f32 %v1127_v29, %v1125_v20 }
 0xc4e   :  { %v2693_v22 = vpop.eup %2692 }
 0xc4f   :  { %v1236_v23 = vsel %vm3012_vm4, %v2691_v21, %v2693_v22 }
 0xc50   :  { %1242 = vrot.lane.b32.xlu1 %v1236_v23, %s2819_s4  ;;  %v1240_v34 = vmul.f32 %v1238_v61, %v1236_v23 }
 0xcbd   :  { %v1132_v25 = vpop.permute.xlu0 %1131 }
 0xcbe   :  { %v1134_v26 = vmul.f32 %v1132_v25, %v1125_v20 }
 0xcc0   :  { %1136 = vrot.lane.b32.xlu0 %v1134_v26, %s2820_s23 }
 0xcc2   :  { %v1243_v27 = vpop.permute.xlu1 %1242 }
 0xcc3   :  { %v1245_v28 = vmul.f32 %v1243_v27, %v1236_v23 }
 0xcc5   :  { %1247 = vrot.lane.b32.xlu1 %v1245_v28, %s2820_s23 }
 0xd32   :  { %v1137_v50 = vpop.permute.xlu0 %1136 }
 0xd33   :  { %v3189_v32 = vadd.f32 %v1137_v50, %v1129_v30 }
 0xd35   :  { %2694 = vtanh.f32 %v3189_v32  ;;  %v1347_v21 = vrot.slane %v3189_v32, 6 }
 0xd37   :  { %v1248_v35 = vpop.permute.xlu1 %1247 }
 0xd38   :  { %v3193_v36 = vadd.f32 %v1248_v35, %v1240_v34 }
 0xd3a   :  { %2696 = vtanh.f32 %v3193_v36  ;;  %v1459_v26 = vrot.slane %v3193_v36, 2 }
 0xd3f   :  { %v2695_v38 = vpop.eup %2694 }
 0xd40   :  { %1142 = vrot.lane.b32.xlu0 %v2695_v38, %s2819_s4 }
 0xd44   :  { %v2697_v39 = vpop.eup %2696 }
 0xd45   :  { %1253 = vrot.lane.b32.xlu1 %v2697_v39, %s2819_s4 }
 0xdb2   :  { %v1143_v40 = vpop.permute.xlu0 %1142 }
 0xdb3   :  { %v1145_v41 = vmul.f32 %v1143_v40, %v1125_v20 }
 0xdb5   :  { %1147 = vrot.lane.b32.xlu0 %v1145_v41, %s2820_s23 }
 0xdb7   :  { %v1254_v42 = vpop.permute.xlu1 %1253 }
 0xdb8   :  { %v3199_v43 = vmul.f32 %v1254_v42, %v1236_v23 }
 0xdba   :  { %v1371_v44 = vrot.slane %v3199_v43, 6 }
 0xdbc   :  { %1372 = vrot.lane.b32.xlu1 %v1371_v44, %s2820_s23 }
 0xe27   :  { %v3203_v45 = vpop.permute.xlu0 %1147 }
 0xe28   :  { %2403 = vmatmul.mubr.msk.f32.vlgmr.msra.gmra.mrb[12].mxu0 %vm159_vm6, %v3203_v45 }
 0xe29   :  { %2572 = vmatpush3.bf16.msra.mxu0 %v2923_v18  ;;  %2424 = vmatprep.mubr.msk.f32.mxu0 %vm2817_vm0, %v2818_v8 }
 0xe2a   :  { %2573 = vmatprep.subr.bf16.mxu0 %v2816_v7 }
 0xe2d   :  { %2575 = vmatpush3.bf16.msra.mxu0 %v2938_v24 }
 0xe2e   :  { %v1373_v46 = vpop.permute.xlu1 %1372  ;;  %2582 = vmatprep.subr.bf16.mxu0 %v2816_v7 }
 0xe2f   :  { %2414 = vmatmul.mubr.msk.f32.vlgmr.msra.gmra.mrb[12].mxu1 %vm159_vm6, %v1373_v46 }
 0xe30   :  { %2578 = vmatpush3.bf16.msra.mxu1 %v2960_v33  ;;  %2435 = vmatprep.mubr.msk.f32.mxu1 %vm2817_vm0, %v2818_v8 }
 0xe31   :  { %2579 = vmatprep.subr.bf16.mxu1 %v2816_v7 }
 0xe34   :  { %2581 = vmatpush3.bf16.msra.mxu1 %v2971_v37 }
 0xe35   :  { %2588 = vmatprep.subr.bf16.mxu1 %v2816_v7 }
 0xefb   :  { %v1330_v47 = vpop.f32.mrb[12].mxu0 }
 0xefc   :  { %v1335_v48 = vrot.slane %v1330_v47, 6  ;;  %v2404_v49 = vpop.f32.mrb[13].mxu0 }
 0xefe   :  { %v1337_v51 = vadd.f32 %v1335_v48, %v3007_v59 }
 0xf00   :  { %v2179_v54 = vmul.f32 -1.442695, %v1337_v51 }
 0xf02   :  { %2698 = vpow2.f32 %v2179_v54  ;;  %v1442_v55 = vpop.f32.mrb[12].mxu1 }
 0xf03   :  { %v1447_v57 = vrot.slane %v1442_v55, 4  ;;  %v2415_v58 = vpop.f32.mrb[13].mxu1 }
 0xf05   :  { %v1449_v60 = vadd.f32 %v1447_v57, %v3004_v52 }
 0xf07   :  { %v2181_v62 = vmul.f32 -1.442695, %v1449_v60 }
 0xf09   :  { %2700 = vpow2.f32 %v2181_v62 }
 0xf0a   :  { %2702 = vtanh.f32 %v1337_v51 }
 0xf0c   :  { %v2699_v63 = vpop.eup %2698 }
 0xf0d   :  { %v1342_v0 = vadd.f32 1.0, %v2699_v63 }
 0xf0f   :  { %2704 = vrcp.f32 %v1342_v0 }
 0xf10   :  { %2706 = vtanh.f32 %v1449_v60 }
 0xf13   :  { %v2701_v1 = vpop.eup %2700 }
 0xf14   :  { %v1454_v3 = vadd.f32 1.0, %v2701_v1  ;;  %v2703_v4 = vpop.eup %2702 }
 0xf16   :  { %2708 = vrcp.f32 %v1454_v3 }
 0xf19   :  { %v2705_v9 = vpop.eup %2704 }
 0xf1a   :  { %v1345_v10 = vsel %vm3012_vm4, %v2703_v4, %v2705_v9  ;;  %v2707_v11 = vpop.eup %2706 }
 0xf1b   :  { %1351 = vrot.lane.b32.xlu0 %v1345_v10, %s2819_s4  ;;  %v1349_v22 = vmul.f32 %v1347_v21, %v1345_v10 }
 0xf20   :  { %v2709_v12 = vpop.eup %2708 }
 0xf21   :  { %v1457_v13 = vsel %vm3012_vm4, %v2707_v11, %v2709_v12 }
 0xf22   :  { %1463 = vrot.lane.b32.xlu1 %v1457_v13, %s2819_s4  ;;  %v1461_v27 = vmul.f32 %v1459_v26, %v1457_v13 }
 0xf8d   :  { %v1352_v14 = vpop.permute.xlu0 %1351 }
 0xf8e   :  { %v1354_v16 = vmul.f32 %v1352_v14, %v1345_v10 }
 0xf90   :  { %1356 = vrot.lane.b32.xlu0 %v1354_v16, %s2820_s23 }
 0xf94   :  { %v1464_v17 = vpop.permute.xlu1 %1463 }
 0xf95   :  { %v1466_v20 = vmul.f32 %v1464_v17, %v1457_v13 }
 0xf97   :  { %1468 = vrot.lane.b32.xlu1 %v1466_v20, %s2820_s23 }
0x1002   :  { %v1357_v23 = vpop.permute.xlu0 %1356 }
0x1003   :  { %v3231_v25 = vadd.f32 %v1357_v23, %v1349_v22 }
0x1005   :  { %2710 = vtanh.f32 %v3231_v25 }
0x1009   :  { %v1469_v28 = vpop.permute.xlu1 %1468 }
0x100a   :  { %v3235_v29 = vadd.f32 %v1469_v28, %v1461_v27 }
0x100c   :  { %2712 = vtanh.f32 %v3235_v29  ;;  %v1683_v14 = vrot.slane %v3235_v29, 2 }
0x100f   :  { %v2711_v30 = vpop.eup %2710 }
0x1010   :  { %1362 = vrot.lane.b32.xlu0 %v2711_v30, %s2819_s4 }
0x1016   :  { %v2713_v50 = vpop.eup %2712 }
0x1017   :  { %1474 = vrot.lane.b32.xlu1 %v2713_v50, %s2819_s4 }
0x1082   :  { %v1363_v32 = vpop.permute.xlu0 %1362 }
0x1083   :  { %v3240_v61 = vmul.f32 %v1363_v32, %v1345_v10  ;;  %v1571_v10 = vrot.slane %v3231_v25, 6 }
0x1085   :  { %v1483_v34 = vrot.slane %v3240_v61, 2 }
0x1087   :  { %1484 = vrot.lane.b32.xlu0 %v1483_v34, %s2820_s23 }
0x1089   :  { %v1475_v35 = vpop.permute.xlu1 %1474 }
0x108a   :  { %v3244_v36 = vmul.f32 %v1475_v35, %v1457_v13 }
0x108c   :  { %v1595_v38 = vrot.slane %v3244_v36, 4 }
0x108e   :  { %1596 = vrot.lane.b32.xlu1 %v1595_v38, %s2820_s23 }
0x10f9   :  { %v1485_v39 = vpop.permute.xlu0 %1484 }
0x10fa   :  { %2425 = vmatmul.mubr.msk.f32.vlgmr.msra.gmra.mrb[14].mxu0 %vm159_vm6, %v1485_v39 }
0x10fb   :  { %2584 = vmatpush3.bf16.msra.mxu0 %v2923_v18  ;;  %2446 = vmatprep.mubr.msk.f32.mxu0 %vm2817_vm0, %v2818_v8 }
0x10fc   :  { %2585 = vmatprep.subr.bf16.mxu0 %v2816_v7 }
0x10ff   :  { %2587 = vmatpush3.bf16.msra.mxu0 %v2938_v24 }
0x1100   :  { %v1597_v40 = vpop.permute.xlu1 %1596  ;;  %2594 = vmatprep.subr.bf16.mxu0 %v2816_v7 }
0x1101   :  { %2436 = vmatmul.mubr.msk.f32.vlgmr.msra.gmra.mrb[14].mxu1 %vm159_vm6, %v1597_v40 }
0x1102   :  { %2590 = vmatpush3.bf16.msra.mxu1 %v2960_v33  ;;  %2457 = vmatprep.mubr.msk.f32.mxu1 %vm2817_vm0, %v2818_v8 }
0x1103   :  { %2591 = vmatprep.subr.bf16.mxu1 %v2816_v7 }
0x1106   :  { %2593 = vmatpush3.bf16.msra.mxu1 %v2971_v37 }
0x1107   :  { %2600 = vmatprep.subr.bf16.mxu1 %v2816_v7 }
0x11cd   :  { %v1554_v18 = vpop.f32.mrb[14].mxu0 }
0x11ce   :  { %v1559_v41 = vrot.slane %v1554_v18, 4  ;;  %v2426_v42 = vpop.f32.mrb[15].mxu0 }
0x11d0   :  { %v1561_v24 = vadd.f32 %v1559_v41, %v3007_v59 }
0x11d2   :  { %v2183_v44 = vmul.f32 -1.442695, %v1561_v24 }
0x11d4   :  { %2714 = vpow2.f32 %v2183_v44  ;;  %v1666_v46 = vpop.f32.mrb[14].mxu1 }
0x11d5   :  { %v1671_v47 = vrot.slane %v1666_v46, 6  ;;  %v2437_v48 = vpop.f32.mrb[15].mxu1 }
0x11d7   :  { %v1673_v33 = vadd.f32 %v1671_v47, %v3004_v52 }
0x11d9   :  { %v2185_v49 = vmul.f32 -1.442695, %v1673_v33 }
0x11db   :  { %2716 = vpow2.f32 %v2185_v49 }
0x11dc   :  { %2718 = vtanh.f32 %v1561_v24 }
0x11de   :  { %v2715_v51 = vpop.eup %2714 }
0x11df   :  { %v1566_v54 = vadd.f32 1.0, %v2715_v51 }
0x11e1   :  { %2720 = vrcp.f32 %v1566_v54 }
0x11e2   :  { %2722 = vtanh.f32 %v1673_v33 }
0x11e5   :  { %v2717_v37 = vpop.eup %2716 }
0x11e6   :  { %v1678_v55 = vadd.f32 1.0, %v2717_v37  ;;  %v2719_v57 = vpop.eup %2718 }
0x11e8   :  { %2724 = vrcp.f32 %v1678_v55 }
0x11eb   :  { %v2721_v58 = vpop.eup %2720 }
0x11ec   :  { %v1569_v60 = vsel %vm3012_vm4, %v2719_v57, %v2721_v58  ;;  %v2723_v62 = vpop.eup %2722 }
0x11ed   :  { %1575 = vrot.lane.b32.xlu0 %v1569_v60, %s2819_s4  ;;  %v1573_v11 = vmul.f32 %v1571_v10, %v1569_v60  ;;  %v1946_v10 = vld [vmem:[%s3429_s5 + $0x8] sm:$0xff] }
0x11f2   :  { %v2725_v63 = vpop.eup %2724 }
0x11f3   :  { %v1681_v0 = vsel %vm3012_vm4, %v2723_v62, %v2725_v63 }
0x11f4   :  { %1687 = vrot.lane.b32.xlu1 %v1681_v0, %s2819_s4  ;;  %v1685_v16 = vmul.f32 %v1683_v14, %v1681_v0  ;;  %v1947_v14 = vld [vmem:[%s3429_s5 + $0x10] sm:$0xff] }
0x125f   :  { %v1576_v1 = vpop.permute.xlu0 %1575 }
0x1260   :  { %v1578_v3 = vmul.f32 %v1576_v1, %v1569_v60 }
0x1262   :  { %1580 = vrot.lane.b32.xlu0 %v1578_v3, %s2820_s23 }
0x1266   :  { %v1688_v4 = vpop.permute.xlu1 %1687 }
0x1267   :  { %v1690_v9 = vmul.f32 %v1688_v4, %v1681_v0 }
0x1269   :  { %1692 = vrot.lane.b32.xlu1 %v1690_v9, %s2820_s23  ;;  %v1945_v9 = vld [vmem:[%s3429_s5] sm:$0xff] }
0x12d4   :  { %v1581_v12 = vpop.permute.xlu0 %1580 }
0x12d5   :  { %v1583_v13 = vadd.f32 %v1581_v12, %v1573_v11  ;;  %v1949_v11 = vld [vmem:[%s3429_s5 + $0x20] sm:$0xff]  ;;  %v2601_v12 = vpack.c.bf16 %v1946_v10, %v1945_v9 }
0x12d7   :  { %2726 = vtanh.f32 %v1583_v13  ;;  %v1795_v57 = vrot.slane %v1583_v13, 6  ;;  %v1950_v13 = vld [vmem:[%s3429_s5 + $0x28] sm:$0xff] }
0x12db   :  { %v1693_v17 = vpop.permute.xlu1 %1692 }
0x12dc   :  { %v1695_v20 = vadd.f32 %v1693_v17, %v1685_v16  ;;  %v1948_v16 = vld [vmem:[%s3429_s5 + $0x18] sm:$0xff]  ;;  %v2595_v17 = vpack.c.bf16 %v1950_v13, %v1949_v11 }
0x12de   :  { %2728 = vtanh.f32 %v1695_v20  ;;  %v1904_v63 = vrot.slane %v1695_v20, 2  ;;  %v2604_v20 = vpack.c.bf16 %v1948_v16, %v1947_v14 }
0x12e1   :  { %v2727_v21 = vpop.eup %2726 }
0x12e2   :  { %1586 = vrot.lane.b32.xlu0 %v2727_v21, %s2819_s4  ;;  %v1951_v21 = vld [vmem:[%s3429_s5 + $0x30] sm:$0xff] }
0x12e8   :  { %v2729_v22 = vpop.eup %2728 }
0x12e9   :  { %1698 = vrot.lane.b32.xlu1 %v2729_v22, %s2819_s4  ;;  %v1952_v22 = vld [vmem:[%s3429_s5 + $0x38] sm:$0xff]  ;;  %s2821_s5 = smov 96  }
0x1354   :  { %v1587_v23 = vpop.permute.xlu0 %1586 }
0x1355   :  { %v3276_v26 = vmul.f32 %v1587_v23, %v1569_v60  ;;  %v2598_v23 = vpack.c.bf16 %v1952_v22, %v1951_v21 }
0x1357   :  { %v1707_v25 = vrot.slane %v3276_v26, 4 }
0x1359   :  { %1708 = vrot.lane.b32.xlu0 %v1707_v25, %s2820_s23 }
0x135b   :  { %v1699_v27 = vpop.permute.xlu1 %1698 }
0x135c   :  { %v3280_v28 = vmul.f32 %v1699_v27, %v1681_v0 }
0x135e   :  { %v1819_v29 = vrot.slane %v3280_v28, 2 }
0x1360   :  { %1820 = vrot.lane.b32.xlu1 %v1819_v29, %s2820_s23 }
0x13cb   :  { %v1709_v30 = vpop.permute.xlu0 %1708 }
0x13cc   :  { %2447 = vmatmul.mubr.msk.f32.vlgmr.msra.gmra.mrb[16].mxu0 %vm159_vm6, %v1709_v30 }
0x13cd   :  { %2468 = vmatprep.mubr.msk.f32.mxu0 %vm2817_vm0, %v2818_v8  ;;  %2596 = vmatpush3.bf16.msra.mxu0 %v2595_v17 }
0x13ce   :  { %2597 = vmatprep.subr.bf16.mxu0 %v2816_v7 }
0x13d1   :  { %2599 = vmatpush3.bf16.msra.mxu0 %v2598_v23 }
0x13d2   :  { %v1821_v50 = vpop.permute.xlu1 %1820 }
0x13d3   :  { %2458 = vmatmul.mubr.msk.f32.vlgmr.msra.gmra.mrb[16].mxu1 %vm159_vm6, %v1821_v50 }
0x13d4   :  { %2479 = vmatprep.mubr.msk.f32.mxu1 %vm2817_vm0, %v2818_v8  ;;  %2602 = vmatpush3.bf16.msra.mxu1 %v2601_v12 }
0x13d5   :  { %2603 = vmatprep.subr.bf16.mxu1 %v2816_v7 }
0x13d8   :  { %2605 = vmatpush3.bf16.msra.mxu1 %v2604_v20 }
0x149f   :  { %v1778_v32 = vpop.f32.mrb[16].mxu0 }
0x14a0   :  { %v1783_v34 = vrot.slane %v1778_v32, 2  ;;  %v2448_v35 = vpop.f32.mrb[17].mxu0 }
0x14a2   :  { %v1785_v38 = vadd.f32 %v1783_v34, %v3007_v59 }
0x14a4   :  { %v2187_v39 = vmul.f32 -1.442695, %v1785_v38 }
0x14a6   :  { %2730 = vpow2.f32 %v2187_v39  ;;  %v1890_v40 = vpop.f32.mrb[16].mxu1 }
0x14a7   :  { %v1894_v18 = vadd.f32 %v1890_v40, %v3004_v52  ;;  %v2459_v41 = vpop.f32.mrb[17].mxu1 }
0x14a9   :  { %v2189_v42 = vmul.f32 -1.442695, %v1894_v18 }
0x14ab   :  { %2732 = vpow2.f32 %v2189_v42 }
0x14ac   :  { %2734 = vtanh.f32 %v1785_v38 }
0x14b0   :  { %v2731_v24 = vpop.eup %2730 }
0x14b1   :  { %v1790_v44 = vadd.f32 1.0, %v2731_v24 }
0x14b3   :  { %2736 = vrcp.f32 %v1790_v44 }
0x14b4   :  { %2738 = vtanh.f32 %v1894_v18 }
0x14b5   :  { %v2733_v46 = vpop.eup %2732 }
0x14b6   :  { %v1899_v47 = vadd.f32 1.0, %v2733_v46  ;;  %v2735_v8 = vpop.eup %2734 }
0x14b8   :  { %2740 = vrcp.f32 %v1899_v47 }
0x14bd   :  { %v2737_v48 = vpop.eup %2736 }
0x14be   :  { %v1793_v59 = vsel %vm3012_vm4, %v2735_v8, %v2737_v48  ;;  %v2739_v33 = vpop.eup %2738 }
0x14bf   :  { %1799 = vrot.lane.b32.xlu0 %v1793_v59, %s2819_s4  ;;  %v1797_v58 = vmul.f32 %v1795_v57, %v1793_v59 }
0x14c2   :  { %v2741_v52 = vpop.eup %2740 }
0x14c3   :  { %v1902_v49 = vsel %vm3012_vm4, %v2739_v33, %v2741_v52 }
0x14c4   :  { %1908 = vrot.lane.b32.xlu1 %v1902_v49, %s2819_s4  ;;  %v1906_v0 = vmul.f32 %v1904_v63, %v1902_v49 }
0x1531   :  { %v1800_v51 = vpop.permute.xlu0 %1799 }
0x1532   :  { %v1802_v54 = vmul.f32 %v1800_v51, %v1793_v59 }
0x1534   :  { %1804 = vrot.lane.b32.xlu0 %v1802_v54, %s2820_s23 }
0x1536   :  { %v1909_v37 = vpop.permute.xlu1 %1908 }
0x1537   :  { %v1911_v55 = vmul.f32 %v1909_v37, %v1902_v49 }
0x1539   :  { %1913 = vrot.lane.b32.xlu1 %v1911_v55, %s2820_s23 }
0x15a6   :  { %v1805_v60 = vpop.permute.xlu0 %1804 }
0x15a7   :  { %v1807_v62 = vadd.f32 %v1805_v60, %v1797_v58 }
0x15a9   :  { %2742 = vtanh.f32 %v1807_v62 }
0x15ab   :  { %v1914_v1 = vpop.permute.xlu1 %1913 }
0x15ac   :  { %v1916_v5 = vadd.f32 %v1914_v1, %v1906_v0 }
0x15ae   :  { %2744 = vtanh.f32 %v1916_v5 }
0x15b3   :  { %v2743_v3 = vpop.eup %2742 }
0x15b4   :  { %1810 = vrot.lane.b32.xlu0 %v2743_v3, %s2819_s4 }
0x15b8   :  { %v2745_v4 = vpop.eup %2744 }
0x15b9   :  { %1919 = vrot.lane.b32.xlu1 %v2745_v4, %s2819_s4 }
0x1626   :  { %v1811_v25 = vpop.permute.xlu0 %1810 }
0x1627   :  { %v1813_v27 = vmul.f32 %v1811_v25, %v1793_v59 }
0x1629   :  { %v2025_v29 = vrot.slane %v1813_v27, 6 }
0x162b   :  { %v1920_v30 = vpop.permute.xlu1 %1919  ;;  %2026 = vrot.lane.b32.xlu1 %v2025_v29, %s2820_s23 }
0x162c   :  { %v1922_v50 = vmul.f32 %v1920_v30, %v1902_v49 }
0x162e   :  { %1929 = vrot.lane.b32.xlu0 %v1922_v50, %s2820_s23 }
0x162f   :  { %475 = vrot.lane.b32.xlu1 %v3072_v15, %s2820_s23 }
0x1632   :  { %365 = vrot.lane.b32.xlu0 %v3033_v31, %s2819_s4 }
0x1633   :  { %701 = vrot.lane.b32.xlu1 %v3114_v2, %s2820_s23 }
0x1636   :  { %588 = vrot.lane.b32.xlu0 %v3076_v19, %s2819_s4 }
0x1637   :  { %927 = vrot.lane.b32.xlu1 %v3156_v53, %s2820_s23 }
0x163a   :  { %814 = vrot.lane.b32.xlu0 %v3118_v6, %s2819_s4 }
0x163b   :  { %1815 = vrot.lane.b32.xlu1 %v1813_v27, %s2820_s23 }
0x163e   :  { %1037 = vrot.lane.b32.xlu0 %v3160_v56, %s2819_s4 }
0x163f   :  { %1367 = vrot.lane.b32.xlu1 %v3240_v61, %s2820_s23 }
0x1642   :  { %1258 = vrot.lane.b32.xlu0 %v3199_v43, %s2819_s4 }
0x1643   :  { %1591 = vrot.lane.b32.xlu1 %v3276_v26, %s2820_s23 }
0x1646   :  { %1479 = vrot.lane.b32.xlu0 %v3244_v36, %s2819_s4 }
0x1647   :  { %1924 = vrot.lane.b32.xlu1 %v1922_v50, %s2819_s4 }
0x164a   :  { %1703 = vrot.lane.b32.xlu0 %v3280_v28, %s2819_s4 }
0x164b   :  { %1940 = vrot.lane.b32.xlu1 %v1916_v5, %s2821_s5 }
0x164e   :  { %1935 = vrot.lane.b32.xlu0 %v1807_v62, %s2821_s5 }
0x169d   :  { %v2027_v7 = vpop.permute.xlu1 %2026 }
0x169e   :  { %2480 = vmatmul.mubr.msk.f32.vlgmr.msra.gmra.mrb[18].mxu1 %vm159_vm6, %v2027_v7 }
0x16a0   :  { %v1930_v31 = vpop.permute.xlu0 %1929 }
0x16a1   :  { %1933 = vst.msk [vmem:[#allocation4 + $0x2] sm:$0x3] %vm263_vm5, %v1930_v31  ;;  %v476_v15 = vpop.permute.xlu1 %475  ;;  %2469 = vmatmul.mubr.msk.f32.vlgmr.msra.gmra.mrb[18].mxu0 %vm159_vm6, %v1930_v31 }
0x16a2   :  { %479 = vst.msk [vmem:[#allocation2] sm:$0xc] %vm478_vm7, %v476_v15 }
0x16a4   :  { %v366_v19 = vpop.permute.xlu0 %365 }
0x16a5   :  { %369 = vst.msk [vmem:[#allocation2 + $0x8] sm:$0xc0] %vm368_vm8, %v366_v19  ;;  %v702_v2 = vpop.permute.xlu1 %701 }
0x16a6   :  { %705 = vst.msk [vmem:[#allocation2] sm:$0x30] %vm704_vm9, %v702_v2 }
0x16a8   :  { %v589_v6 = vpop.permute.xlu0 %588 }
0x16a9   :  { %592 = vst.msk [vmem:[#allocation2 + $0x8] sm:$0x30] %vm591_vm10, %v589_v6  ;;  %v928_v53 = vpop.permute.xlu1 %927 }
0x16aa   :  { %931 = vst.msk [vmem:[#allocation2] sm:$0xc0] %vm930_vm11, %v928_v53 }
0x16ac   :  { %v815_v56 = vpop.permute.xlu0 %814 }
0x16ad   :  { %818 = vst.msk [vmem:[#allocation2 + $0x8] sm:$0xc] %vm817_vm12, %v815_v56  ;;  %v1816_v43 = vpop.permute.xlu1 %1815 }
0x16ae   :  { %1818 = vst.msk [vmem:[#allocation2 + $0x8] sm:$0xc0] %vm930_vm11, %v1816_v43  ;;  %1928 = vst.msk [vmem:[#allocation4 - $0x6] sm:$0xc0] %vm930_vm11, %v1816_v43 }
0x16b0   :  { %v1038_v61 = vpop.permute.xlu0 %1037 }
0x16b1   :  { %1041 = vst.msk [vmem:[#allocation2 + $0x8] sm:$0x3] %vm1040_vm13, %v1038_v61  ;;  %v1368_v36 = vpop.permute.xlu1 %1367 }
0x16b2   :  { %1150 = vst.msk [vmem:[#allocation2 + $0x8] sm:$0x3] %vm263_vm5, %v3203_v45 }
0x16b3   :  { %1370 = vst.msk [vmem:[#allocation2 + $0x8] sm:$0xc] %vm478_vm7, %v1368_v36 }
0x16b4   :  { %v1259_v26 = vpop.permute.xlu0 %1258 }
0x16b5   :  { %1261 = vst.msk [vmem:[#allocation2] sm:$0xc0] %vm368_vm8, %v1259_v26  ;;  %v1592_v28 = vpop.permute.xlu1 %1591 }
0x16b6   :  { %1594 = vst.msk [vmem:[#allocation2 + $0x8] sm:$0x30] %vm704_vm9, %v1592_v28 }
0x16b8   :  { %v1480_v32 = vpop.permute.xlu0 %1479 }
0x16b9   :  { %1482 = vst.msk [vmem:[#allocation2] sm:$0x30] %vm591_vm10, %v1480_v32  ;;  %v1925_v34 = vpop.permute.xlu1 %1924 }
0x16ba   :  { %1927 = vst.msk [vmem:[#allocation2] sm:$0x3] %vm1040_vm13, %v1925_v34 }
0x16bc   :  { %v1704_v35 = vpop.permute.xlu0 %1703 }
0x16bd   :  { %1706 = vst.msk [vmem:[#allocation2] sm:$0xc] %vm817_vm12, %v1704_v35  ;;  %v1941_v38 = vpop.permute.xlu1 %1940 }
0x16be   :  { %2190 = vst.msk [vmem:[%s3433_s9 + $0x2] sm:$0x3] %vm263_vm5, %v1941_v38 }
0x16c0   :  { %v1936_v45 = vpop.permute.xlu0 %1935 }
0x16c1   :  { %1938 = vst.msk [vmem:[%s3433_s9 - $0x6] sm:$0xc0] %vm930_vm11, %v1936_v45 }
0x16c2   :  { %2757 = shalt.err (!%p2754_p4)
}
0x16c3   :  { %s2758_s25 = scalar_lea.hbm %s3432_s8, 64 }
0x16c4   :  { %p2759_p5 = scmp.ne.s32.totalorder %s3432_s8, %s2758_s25  ;;  %p2762_p6 = scmp.lt.u32.totalorder %s2758_s25, %s3432_s8 }
0x16c6   :  { %p2764_p7 = pnand %p2762_p6, %p2759_p5 }
0x16c8   :  { %2767 = shalt.err (!%p2764_p7)
}
0x16c9   :  { %s2823_s29 = smov 2   ;;  %s2824_s2 = smov [#allocation2]  }
0x16ca   :  { %2132 = dma.vmem_to_hbm [thread:$0]  %s2127_s0, 64, %s3432_s8, [#allocation5], %s2820_s23, %s2820_s23, %s2823_s29  }
0x16cb   :  { %s2114_s12 = sshll.u32 %s2824_s2, 4  ;;  %s2115_s12 = int_to_ptr.vmem [resolvable:$true] %s2114_s12 }
0x16cc   :  { %s2768_s13 = scalar_lea.vmem %s2115_s12, 256  ;;  %p2773_p9 = scmp.lt.s32.totalorder %s2115_s12, %s2115_s12 }
0x16cd   :  { %p2769_p8 = scmp.ne.s32.totalorder %s2115_s12, %s2768_s13  ;;  %p2774_p10 = scmp.lt.s32.totalorder %s2768_s13, %s2768_s13 }
0x16cf   :  { %p2775_p11 = por %p2774_p10, %p2773_p9 }
0x16d1   :  { %p2776_p12 = pnand %p2775_p11, %p2769_p8 }
0x16d3   :  { %2779 = shalt.err (!%p2776_p12)
}
0x16d4   :  { %s2780_s16 = scalar_lea.hbm %s3431_s7, 256 }
0x16d5   :  { %p2781_p13 = scmp.ne.s32.totalorder %s3431_s7, %s2780_s16  ;;  %p2784_p0 = scmp.lt.u32.totalorder %s2780_s16, %s3431_s7 }
0x16d7   :  { %p2786_p1 = pnand %p2784_p0, %p2781_p13 }
0x16d9   :  { %2789 = shalt.err (!%p2786_p1)
}
0x16da   :  { %s2825_s23 = smov 128   ;;  %s2826_s19 = smov 8   ;;  %v2193_v41 = vld [vmem:[%s3430_s6] ss:$0 sm:$0xff] }
0x16db   :  { %2120 = dma.vmem_to_hbm [thread:$0]  %s2115_s12, 256, %s3431_s7, [#allocation3], %s2825_s23, %s2825_s23, %s2826_s19  }
0x16dc   :  { %s2827_s0 = smov [#allocation6]  }
0x16dd   :  { %s2141_s22 = sshll.u32 %s2827_s0, 4  ;;  %s2142_s22 = int_to_ptr.vmem [resolvable:$true] %s2141_s22 }
0x16de   :  { %s2790_s4 = scalar_lea.vmem %s2142_s22, 32  ;;  %p2795_p3 = scmp.lt.s32.totalorder %s2142_s22, %s2142_s22 }
0x16df   :  { %p2791_p2 = scmp.ne.s32.totalorder %s2142_s22, %s2790_s4  ;;  %p2796_p4 = scmp.lt.s32.totalorder %s2790_s4, %s2790_s4 }
0x16e1   :  { %p2797_p5 = por %p2796_p4, %p2795_p3 }
0x16e3   :  { %p2798_p6 = pnand %p2797_p5, %p2791_p2 }
0x1771   :  { %v2096_v39 = vpop.f32.mrb[18].mxu1 }
0x1772   :  { %v2481_v40 = vpop.f32.mrb[19].mxu1 }
0x1774   :  { %v2021_v18 = vpop.f32.mrb[18].mxu0 }
0x1775   :  { %v2097_v42 = vadd.f32 %v2096_v39, %v2021_v18  ;;  %v2470_v24 = vpop.f32.mrb[19].mxu0 }
0x1777   :  { %v2107_v44 = vadd.f32 %v2193_v41, %v2097_v42 }
0x1779   :  { %2108 = vst.msk [vmem:[#allocation6] sm:$0x3] %vm263_vm5, %v2107_v44 }
0x177a   :  { %2801 = shalt.err (!%p2798_p6)
}
0x177b   :  { %s2802_s25 = scalar_lea.hbm %s3434_s10, 32 }
0x177c   :  { %p2803_p7 = scmp.ne.s32.totalorder %s3434_s10, %s2802_s25  ;;  %p2806_p8 = scmp.lt.u32.totalorder %s2802_s25, %s3434_s10 }
0x177e   :  { %p2808_p9 = pnand %p2806_p8, %p2803_p7 }
0x1780   :  { %2811 = shalt.err (!%p2808_p9)
}
0x1781   :  { %2144 = dma.vmem_to_hbm [thread:$0]  %s2142_s22, 32, %s3434_s10, [#allocation5]  }
0x1782   :  { %2812 = dma.done.wait [#allocation3], 256  }
0x1783   :  { %2813 = vsyncadd [#allocation3], 4294967040 }
0x1784   :  { %2814 = dma.done.wait [#allocation5], 96  }
0x1785   :  { %2815 = vsyncadd [#allocation5], 4294967200 }
0x1786   :  { %2156 = vsyncpa [#allocation3], 1 }
0x1787   :  { %2157 = vsyncpa [#allocation5], 1 }

</bundles_post_ra>
